<compile_context>
chip_gen: v6e
topology: v6e:2x2x1
jax: 0.10.0
libtpu: 0.0.40
codegen_flags: <defaults>
</compile_context>

<pallas_src>
import functools

import jax
import jax.numpy as jnp
from jax import lax
from jax.experimental import pallas as pl
from jax.experimental.pallas import tpu as pltpu

_LANE = 128
_SUBLANE = 8


def _round_up(n, m):
    return ((n + m - 1) // m) * m


# --------------------------------- kernel ----------------------------------

def _inverted_residual_kernel(
        x_hbm,                      # (B, Hp, Wp2, Cp_in) bf16 HBM (manual halo DMA)
        w1_ref, b1_ref,             # (Cp_in, Cp_hid) bf16, (1, Cp_hid) f32
        wdw_ref, b2_ref,            # (3, 3, Cp_hid) f32,   (1, Cp_hid) f32
        w3_ref, b3_ref,             # (Cp_hid, Cp_out) bf16,(1, Cp_out) f32
        o_ref,                      # (block_h, Wo_pad, Cp_out)
        xbuf, sem,                  # VMEM (2, th_in, Wp2, Cp_in) bf16, DMA sems (2,)
        *, stride, expand, use_res, block_h, H, W):
    b = pl.program_id(0)
    t = pl.program_id(1)
    nt = pl.num_programs(1)

    th_in = xbuf.shape[1]           # (block_h - 1) * stride + 3
    wp2 = xbuf.shape[2]             # padded W+2 (multiple of 8)
    cp_in = xbuf.shape[3]
    cp_hid = wdw_ref.shape[-1]
    cp_out = o_ref.shape[-1]
    wo = o_ref.shape[1]             # padded Wo (multiple of 8)
    wacc = wo * stride if stride > 1 else wo

    # ---- manual double-buffered halo DMA: HBM rows -> VMEM slot ------------
    def start_fetch(tile, slot):
        row0 = tile * (block_h * stride)
        pltpu.make_async_copy(x_hbm.at[b, pl.ds(row0, th_in)],
                              xbuf.at[slot], sem.at[slot]).start()

    slot = t % 2

    @pl.when(t == 0)                # prime this image's first row-tile
    def _():
        start_fetch(0, 0)

    @pl.when(t + 1 < nt)            # prefetch next row-tile of the same image
    def _():
        start_fetch(jnp.minimum(t + 1, nt - 1), 1 - slot)

    pltpu.make_async_copy(x_hbm.at[0, pl.ds(0, th_in)],
                          xbuf.at[slot], sem.at[slot]).wait()

    xt = xbuf[slot]                 # (th_in, wp2, cp_in) bf16

    # ---- expand 1x1 conv (BN scale folded into weights) + ReLU6 ------------
    if expand:
        h = jnp.dot(xt.reshape(th_in * wp2, cp_in), w1_ref[...],
                    preferred_element_type=jnp.float32)
        h = jnp.clip(h + b1_ref[...], 0.0, 6.0).reshape(th_in, wp2, cp_hid)
        # Depthwise zero-padding applies *after* expand+BN+ReLU6; the padded
        # x rows/cols would otherwise leak relu6(b1) into the borders.
        row0 = t * (block_h * stride)
        r = lax.broadcasted_iota(jnp.int32, (th_in, wp2, 1), 0) + row0
        c = lax.broadcasted_iota(jnp.int32, (th_in, wp2, 1), 1)
        keep = ((r >= 1) & (r <= H) & (c >= 1) & (c <= W)).astype(jnp.float32)
        h = h * keep
    else:
        h = xt.astype(jnp.float32)  # spatial zero-padding already correct

    # ---- depthwise 3x3 (BN scale folded into taps) + ReLU6 ------------------
    # dy: 3 leading-axis strided slices (no sublane relayout); dx: only 3
    # small misaligned column slices of the dy-combined (block_h-row) arrays.
    hrows = [lax.slice(h, (dy, 0, 0),
                       (dy + (block_h - 1) * stride + 1, wp2, cp_hid),
                       (stride, 1, 1)) for dy in range(3)]
    acc = jnp.zeros((block_h, wacc, cp_hid), jnp.float32)
    for dx in range(3):
        u = (hrows[0] * wdw_ref[0, dx, :].reshape(1, 1, cp_hid)
             + hrows[1] * wdw_ref[1, dx, :].reshape(1, 1, cp_hid)
             + hrows[2] * wdw_ref[2, dx, :].reshape(1, 1, cp_hid))
        acc = acc + lax.slice(u, (0, dx, 0), (block_h, dx + wacc, cp_hid))
    if stride > 1:
        acc = lax.slice(acc, (0, 0, 0), (block_h, wacc, cp_hid),
                        (1, stride, 1))
    acc = jnp.clip(acc + b2_ref[...].reshape(1, 1, cp_hid), 0.0, 6.0)

    # ---- project 1x1 conv (BN scale folded), no activation ------------------
    out = jnp.dot(acc.reshape(block_h * wo, cp_hid).astype(jnp.bfloat16),
                  w3_ref[...], preferred_element_type=jnp.float32)
    out = (out + b3_ref[...]).reshape(block_h, wo, cp_out)

    if use_res:
        res = lax.slice(xt, (1, 1, 0), (1 + block_h, 1 + wo, cp_in))
        out = out + res.astype(jnp.float32)

    o_ref[...] = out.astype(o_ref.dtype)


# ------------------------- host-side param prep -----------------------------

def _prepare_kernel_params(params, cp_in, cp_hid, cp_out, expand):
    """Fold BN scales into conv weights, zero-pad channels to lane multiples,
    cast MXU operands to bf16."""
    hidden = params["wdw"].shape[-1]

    def pad2(a, rows, cols):
        return jnp.pad(a, ((0, rows - a.shape[0]), (0, cols - a.shape[1])))

    if expand:
        w1 = pad2(params["w1"] * params["s1"], cp_in, cp_hid).astype(jnp.bfloat16)
        b1 = pad2(params["b1"], 1, cp_hid).astype(jnp.float32)
    else:  # no expand conv: dummies (never read in-kernel)
        w1 = jnp.zeros((cp_in, cp_hid), jnp.bfloat16)
        b1 = jnp.zeros((1, cp_hid), jnp.float32)

    wdw = params["wdw"] * params["s2"].reshape(1, 1, hidden)
    wdw = jnp.pad(wdw, ((0, 0), (0, 0), (0, cp_hid - hidden))).astype(jnp.float32)
    b2 = pad2(params["b2"], 1, cp_hid).astype(jnp.float32)

    w3 = pad2(params["w3"] * params["s3"], cp_hid, cp_out).astype(jnp.bfloat16)
    b3 = pad2(params["b3"], 1, cp_out).astype(jnp.float32)
    return dict(w1=w1, b1=b1, wdw=wdw, b2=b2, w3=w3, b3=b3)


# --------------------------------- wrapper ----------------------------------

def inverted_residual(x_nchw, params, *, stride, expand_ratio, block_h=16):
    """NCHW in, NCHW out (matches the PyTorch module)."""
    assert stride in (1, 2)
    B, Cin, H, W = x_nchw.shape
    hidden = params["wdw"].shape[-1]
    Cout = params["w3"].shape[-1]
    expand = (expand_ratio != 1)
    use_res = (stride == 1) and (Cin == Cout)

    cp_in = _round_up(Cin, _LANE)
    cp_hid = _round_up(hidden, _LANE)
    cp_out = _round_up(Cout, _LANE)

    Ho = (H - 1) // stride + 1
    Wo = (W - 1) // stride + 1
    wo_pad = _round_up(Wo, _SUBLANE)              # sublane-aligned output width
    wacc = wo_pad * stride if stride > 1 else wo_pad
    wp2_pad = _round_up(max(W + 2, wacc + 2), _SUBLANE)

    # ---- VMEM-aware block_h / vmem_limit (safe on v7x 64 MiB/TC too) -------
    try:
        vmem_cap = int(pltpu.get_tpu_info().vmem_capacity_bytes)
    except Exception:
        vmem_cap = 64 * 1024 * 1024               # conservative fallback
    budget = min(vmem_cap // 3, 40 * 1024 * 1024)

    def footprint(bh):
        th = (bh - 1) * stride + 3
        f32, bf16 = 4, 2
        xb = 2 * th * wp2_pad * cp_in * bf16                        # halo dbuf
        wts = 2 * (cp_in * cp_hid * bf16 + 9 * cp_hid * f32
                   + 2 * cp_hid * f32 + cp_hid * cp_out * bf16 + cp_out * f32)
        outb = 2 * bh * wo_pad * cp_out * f32                       # out dbuf
        tmp = (th * wp2_pad * cp_hid * f32                          # h
               + 3 * bh * wp2_pad * cp_hid * f32                    # hrows
               + 2 * bh * wacc * cp_hid * f32                       # acc + u
               + bh * wo_pad * cp_hid * bf16                        # proj in
               + bh * wo_pad * cp_out * f32)                        # out tmp
        return xb + wts + outb + tmp

    bh = max(1, min(block_h, Ho))
    while bh > 1 and footprint(bh) > budget:
        bh -= 1

    nt = pl.cdiv(Ho, bh)
    Ho_pad = nt * bh                      # output rows incl. tiling pad
    th_in = (bh - 1) * stride + 3         # input rows per tile (with halo)
    Hp = (Ho_pad - 1) * stride + 3        # padded input height kernel reads

    est = footprint(bh)
    vmem_limit = int(min(max(2 * est, 24 * 1024 * 1024), 56 * 1024 * 1024))

    kp = _prepare_kernel_params(params, cp_in, cp_hid, cp_out, expand)

    # Boundary glue (NCHW -> NHWC, halo pad, sublane/lane-dense pad, bf16).
    # TODO(synk): in a full network keep activations channel-padded NHWC bf16
    # end-to-end so these per-block HBM passes disappear.
    x_nhwc = jnp.transpose(x_nchw, (0, 2, 3, 1))
    x_pad = jnp.pad(x_nhwc, ((0, 0), (1, Hp - H - 1),
                             (1, wp2_pad - W - 1), (0, cp_in - Cin)))
    x_pad = x_pad.astype(jnp.bfloat16)

    kernel = functools.partial(
        _inverted_residual_kernel, stride=stride, expand=expand,
        use_res=use_res, block_h=bh, H=H, W=W)

    const = lambda shape: pl.BlockSpec(shape, lambda b, t: (0,) * len(shape))

    out = pl.pallas_call(
        kernel,
        out_shape=jax.ShapeDtypeStruct((B, Ho_pad, wo_pad, cp_out),
                                       x_nchw.dtype),
        grid_spec=pltpu.PrefetchScalarGridSpec(
            num_scalar_prefetch=0,
            grid=(B, nt),
            in_specs=[
                pl.BlockSpec(memory_space=pl.ANY),   # x (manual halo DMA)
                const((cp_in, cp_hid)),              # w1 * s1   (bf16)
                const((1, cp_hid)),                  # b1
                const((3, 3, cp_hid)),               # wdw * s2  (f32)
                const((1, cp_hid)),                  # b2
                const((cp_hid, cp_out)),             # w3 * s3   (bf16)
                const((1, cp_out)),                  # b3
            ],
            out_specs=pl.BlockSpec((None, bh, wo_pad, cp_out),
                                   lambda b, t: (b, t, 0, 0)),
            scratch_shapes=[
                pltpu.VMEM((2, th_in, wp2_pad, cp_in), jnp.bfloat16),
                pltpu.SemaphoreType.DMA((2,)),
            ]),
        compiler_params=pltpu.CompilerParams(
            dimension_semantics=("parallel", "arbitrary"),
            vmem_limit_bytes=vmem_limit),
    )(x_pad, kp["w1"], kp["b1"], kp["wdw"], kp["b2"], kp["w3"], kp["b3"])

    out = out[:, :Ho, :Wo, :Cout]
    return jnp.transpose(out, (0, 3, 1, 2))


# ------------------------- parameter construction ---------------------------

def _fold_bn(key, c, eps=1e-5):
    k1, k2, k3, k4 = jax.random.split(key, 4)
    gamma = 1.0 + 0.1 * jax.random.normal(k1, (c,), jnp.float32)
    beta = 0.1 * jax.random.normal(k2, (c,), jnp.float32)
    mean = 0.1 * jax.random.normal(k3, (c,), jnp.float32)
    var = 1.0 + 0.1 * jax.random.uniform(k4, (c,), jnp.float32)
    scale = gamma * lax.rsqrt(var + eps)
    bias = beta - mean * scale
    return scale.reshape(1, c), bias.reshape(1, c)


def make_params(key, cin, cout, expand_ratio):
    hidden = int(round(cin * expand_ratio))
    kw1, kdw, kw3, kbn1, kbn2, kbn3 = jax.random.split(key, 6)
    w1 = jax.random.normal(kw1, (cin, hidden), jnp.float32) * jnp.sqrt(2.0 / hidden)
    wdw = jax.random.normal(kdw, (3, 3, hidden), jnp.float32) * jnp.sqrt(2.0 / (9 * hidden))
    w3 = jax.random.normal(kw3, (hidden, cout), jnp.float32) * jnp.sqrt(2.0 / cout)
    s1, b1 = _fold_bn(kbn1, hidden)
    s2, b2 = _fold_bn(kbn2, hidden)
    s3, b3 = _fold_bn(kbn3, cout)
    return dict(w1=w1, s1=s1, b1=b1, wdw=wdw, s2=s2, b2=b2,
                w3=w3, s3=s3, b3=b3)


# ---------------------------- pure-JAX reference ----------------------------

def reference(x_nchw, params, *, stride, expand_ratio):
    def bn(y, s, b):
        return y * s.reshape(1, -1, 1, 1) + b.reshape(1, -1, 1, 1)

    def conv1x1(y, w_io):  # w_io: (Cin, Cout)
        w = jnp.transpose(w_io, (1, 0))[:, :, None, None]  # OIHW
        return lax.conv_general_dilated(
            y, w, (1, 1), "VALID",
            dimension_numbers=("NCHW", "OIHW", "NCHW"))

    x = x_nchw.astype(jnp.float32)
    h = x
    if expand_ratio != 1:
        h = conv1x1(h, params["w1"])
        h = jnp.clip(bn(h, params["s1"], params["b1"]), 0.0, 6.0)
    hidden = params["wdw"].shape[-1]
    wdw = jnp.transpose(params["wdw"], (2, 0, 1))[:, None, :, :]  # (hid,1,3,3)
    h = lax.conv_general_dilated(
        h, wdw, (stride, stride), ((1, 1), (1, 1)),
        dimension_numbers=("NCHW", "OIHW", "NCHW"),
        feature_group_count=hidden)
    h = jnp.clip(bn(h, params["s2"], params["b2"]), 0.0, 6.0)
    h = conv1x1(h, params["w3"])
    h = bn(h, params["s3"], params["b3"])
    if stride == 1 and x.shape[1] == h.shape[1]:
        h = h + x
    return h


if __name__ == "__main__":
    key = jax.random.PRNGKey(0)
    configs = [
        # (B,  H,  W, Cin, Cout, stride, expand_ratio, block_h)
        (2, 16, 16, 4, 4, 1, 6, 16),   # expand + residual, single row tile
        (2, 16, 16, 4, 8, 2, 6, 16),   # stride-2 downsample, no residual
        (2, 16, 16, 4, 4, 1, 1, 16),   # no expand conv, residual
        (2, 16, 16, 4, 4, 1, 6, 4),    # multi-tile: double-buffered halo DMA
        (2, 12, 12, 4, 8, 2, 6, 4),    # non-multiple-of-8 widths + tile pad
    ]
    for i, (B, H, W, cin, cout, s, er, bh) in enumerate(configs):
        kx, kparams = jax.random.split(jax.random.fold_in(key, i))
        x = jax.random.normal(kx, (B, cin, H, W), jnp.float32)
        params = make_params(kparams, cin, cout, er)

        out = jax.block_until_ready(
            inverted_residual(x, params, stride=s, expand_ratio=er, block_h=bh))
        ref = jax.block_until_ready(
            reference(x, params, stride=s, expand_ratio=er))

        assert out.shape == ref.shape, (out.shape, ref.shape)
        # bf16 activation stream + bf16 MXU feeds -> looser than pure-f32 tol
        assert jnp.allclose(out, ref, atol=5e-2, rtol=5e-2), (
            i, float(jnp.max(jnp.abs(out - ref))))

    print("KERNEL_OK")
</pallas_src>

<mosaic_0001>
module attributes {stable_mosaic.version = 11 : i64} {
  func.func @_inverted_residual_kernel(%arg0: i32, %arg1: i32, %arg2: memref<2x18x24x128xbf16, #tpu.memory_space<any>>, %arg3: memref<128x128xbf16, #tpu.memory_space<vmem>>, %arg4: memref<1x128xf32, #tpu.memory_space<vmem>>, %arg5: memref<3x3x128xf32, #tpu.memory_space<vmem>>, %arg6: memref<1x128xf32, #tpu.memory_space<vmem>>, %arg7: memref<128x128xbf16, #tpu.memory_space<vmem>>, %arg8: memref<1x128xf32, #tpu.memory_space<vmem>>, %arg9: memref<1x16x16x128xf32, #tpu.memory_space<vmem>>, %arg10: memref<2x18x24x128xbf16, #tpu.memory_space<vmem>>, %arg11: memref<2x!tpu.dma_semaphore, #tpu.memory_space<semaphore_mem>>) attributes {dimension_semantics = [#tpu.dimension_semantics<parallel>, #tpu.dimension_semantics<arbitrary>], iteration_bounds = array<i64: 2, 1>, scalar_prefetch = 0 : i64, scratch_operands = 2 : i64, tpu.core_type = #tpu.core_type<tc>, window_params = [{}, {pipeline_mode = #tpu.pipeline_mode<synchronous>, transform_indices = @transform_1, window_bounds = array<i64: 128, 128>}, {pipeline_mode = #tpu.pipeline_mode<synchronous>, transform_indices = @transform_2, window_bounds = array<i64: 1, 128>}, {pipeline_mode = #tpu.pipeline_mode<synchronous>, transform_indices = @transform_3, window_bounds = array<i64: 3, 3, 128>}, {pipeline_mode = #tpu.pipeline_mode<synchronous>, transform_indices = @transform_4, window_bounds = array<i64: 1, 128>}, {pipeline_mode = #tpu.pipeline_mode<synchronous>, transform_indices = @transform_5, window_bounds = array<i64: 128, 128>}, {pipeline_mode = #tpu.pipeline_mode<synchronous>, transform_indices = @transform_6, window_bounds = array<i64: 1, 128>}, {transform_indices = @transform_7, window_bounds = array<i64: 1, 16, 16, 128>}]} {
    %c2_i32 = arith.constant 2 : i32
    %c0_i32 = arith.constant 0 : i32
    %0 = arith.cmpi eq, %c2_i32, %c0_i32 : i32
    %c1_i32 = arith.constant 1 : i32
    %1 = arith.select %0, %c1_i32, %c2_i32 : i32
    %2 = arith.remsi %arg1, %1 : i32
    %c0_i32_0 = arith.constant 0 : i32
    %3 = arith.cmpi ne, %2, %c0_i32_0 : i32
    %c0_i32_1 = arith.constant 0 : i32
    %4 = arith.cmpi slt, %2, %c0_i32_1 : i32
    %c0_i32_2 = arith.constant 0 : i32
    %5 = arith.cmpi slt, %1, %c0_i32_2 : i32
    %6 = arith.xori %4, %5 : i1
    %7 = arith.andi %6, %3 : i1
    %8 = arith.addi %2, %1 : i32
    %9 = arith.select %7, %8, %2 : i32
    %c0_i32_3 = arith.constant 0 : i32
    %10 = arith.cmpi eq, %arg1, %c0_i32_3 : i32
    %11 = arith.extui %10 : i1 to i32
    %c0_i32_4 = arith.constant 0 : i32
    %12 = arith.cmpi ne, %11, %c0_i32_4 : i32
    scf.if %12 {
      %c0_i32_66 = arith.constant 0 : i32
      %c0_i32_67 = arith.constant 0 : i32
      %c0_i32_68 = arith.constant 0 : i32
      %c0_i32_69 = arith.constant 0 : i32
      %c0_i32_70 = arith.constant 0 : i32
      %140 = tpu.memref_slice %arg2[%arg0, %c0_i32_68, %c0_i32_69, %c0_i32_70] : memref<2x18x24x128xbf16, #tpu.memory_space<any>> -> memref<1x18x24x128xbf16, #tpu.memory_space<any>>
      %141 = tpu.memref_squeeze %140 : memref<1x18x24x128xbf16, #tpu.memory_space<any>> -> memref<18x24x128xbf16, #tpu.memory_space<any>>
      %c0_i32_71 = arith.constant 0 : i32
      %c0_i32_72 = arith.constant 0 : i32
      %c0_i32_73 = arith.constant 0 : i32
      %142 = tpu.memref_slice %arg10[%c0_i32_66, %c0_i32_71, %c0_i32_72, %c0_i32_73] : memref<2x18x24x128xbf16, #tpu.memory_space<vmem>> -> memref<1x18x24x128xbf16, #tpu.memory_space<vmem>>
      %143 = tpu.memref_squeeze %142 : memref<1x18x24x128xbf16, #tpu.memory_space<vmem>> -> memref<18x24x128xbf16, #tpu.memory_space<vmem>>
      %144 = tpu.memref_slice %arg11[%c0_i32_67] : memref<2x!tpu.dma_semaphore, #tpu.memory_space<semaphore_mem>> -> memref<1x!tpu.dma_semaphore, #tpu.memory_space<semaphore_mem>>
      %145 = tpu.memref_squeeze %144 : memref<1x!tpu.dma_semaphore, #tpu.memory_space<semaphore_mem>> -> memref<!tpu.dma_semaphore, #tpu.memory_space<semaphore_mem>>
      tpu.enqueue_dma source(%141 : memref<18x24x128xbf16, #tpu.memory_space<any>>) target(%143 : memref<18x24x128xbf16, #tpu.memory_space<vmem>>) target_semaphore(%145 : memref<!tpu.dma_semaphore, #tpu.memory_space<semaphore_mem>>)
    } else {
    }
    %c1_i32_5 = arith.constant 1 : i32
    %13 = arith.addi %arg1, %c1_i32_5 : i32
    %c1_i32_6 = arith.constant 1 : i32
    %14 = arith.cmpi slt, %13, %c1_i32_6 : i32
    %15 = arith.extui %14 : i1 to i32
    %c0_i32_7 = arith.constant 0 : i32
    %16 = arith.cmpi ne, %15, %c0_i32_7 : i32
    scf.if %16 {
      %c1_i32_66 = arith.constant 1 : i32
      %140 = arith.addi %arg1, %c1_i32_66 : i32
      %c0_i32_67 = arith.constant 0 : i32
      %141 = arith.minsi %140, %c0_i32_67 : i32
      %c1_i32_68 = arith.constant 1 : i32
      %142 = arith.subi %c1_i32_68, %9 : i32
      %c16_i32_69 = arith.constant 16 : i32
      %143 = arith.muli %141, %c16_i32_69 : i32
      %c0_i32_70 = arith.constant 0 : i32
      %c0_i32_71 = arith.constant 0 : i32
      %144 = tpu.memref_slice %arg2[%arg0, %143, %c0_i32_70, %c0_i32_71] : memref<2x18x24x128xbf16, #tpu.memory_space<any>> -> memref<1x18x24x128xbf16, #tpu.memory_space<any>>
      %145 = tpu.memref_squeeze %144 : memref<1x18x24x128xbf16, #tpu.memory_space<any>> -> memref<18x24x128xbf16, #tpu.memory_space<any>>
      %c0_i32_72 = arith.constant 0 : i32
      %c0_i32_73 = arith.constant 0 : i32
      %c0_i32_74 = arith.constant 0 : i32
      %146 = tpu.memref_slice %arg10[%142, %c0_i32_72, %c0_i32_73, %c0_i32_74] : memref<2x18x24x128xbf16, #tpu.memory_space<vmem>> -> memref<1x18x24x128xbf16, #tpu.memory_space<vmem>>
      %147 = tpu.memref_squeeze %146 : memref<1x18x24x128xbf16, #tpu.memory_space<vmem>> -> memref<18x24x128xbf16, #tpu.memory_space<vmem>>
      %148 = tpu.memref_slice %arg11[%142] : memref<2x!tpu.dma_semaphore, #tpu.memory_space<semaphore_mem>> -> memref<1x!tpu.dma_semaphore, #tpu.memory_space<semaphore_mem>>
      %149 = tpu.memref_squeeze %148 : memref<1x!tpu.dma_semaphore, #tpu.memory_space<semaphore_mem>> -> memref<!tpu.dma_semaphore, #tpu.memory_space<semaphore_mem>>
      tpu.enqueue_dma source(%145 : memref<18x24x128xbf16, #tpu.memory_space<any>>) target(%147 : memref<18x24x128xbf16, #tpu.memory_space<vmem>>) target_semaphore(%149 : memref<!tpu.dma_semaphore, #tpu.memory_space<semaphore_mem>>)
    } else {
    }
    %c0_i32_8 = arith.constant 0 : i32
    %c0_i32_9 = arith.constant 0 : i32
    %c0_i32_10 = arith.constant 0 : i32
    %c0_i32_11 = arith.constant 0 : i32
    %17 = tpu.memref_slice %arg2[%c0_i32_8, %c0_i32_9, %c0_i32_10, %c0_i32_11] : memref<2x18x24x128xbf16, #tpu.memory_space<any>> -> memref<1x18x24x128xbf16, #tpu.memory_space<any>>
    %18 = tpu.memref_squeeze %17 : memref<1x18x24x128xbf16, #tpu.memory_space<any>> -> memref<18x24x128xbf16, #tpu.memory_space<any>>
    %c0_i32_12 = arith.constant 0 : i32
    %c0_i32_13 = arith.constant 0 : i32
    %c0_i32_14 = arith.constant 0 : i32
    %19 = tpu.memref_slice %arg10[%9, %c0_i32_12, %c0_i32_13, %c0_i32_14] : memref<2x18x24x128xbf16, #tpu.memory_space<vmem>> -> memref<1x18x24x128xbf16, #tpu.memory_space<vmem>>
    %20 = tpu.memref_squeeze %19 : memref<1x18x24x128xbf16, #tpu.memory_space<vmem>> -> memref<18x24x128xbf16, #tpu.memory_space<vmem>>
    %21 = tpu.memref_slice %arg11[%9] : memref<2x!tpu.dma_semaphore, #tpu.memory_space<semaphore_mem>> -> memref<1x!tpu.dma_semaphore, #tpu.memory_space<semaphore_mem>>
    %22 = tpu.memref_squeeze %21 : memref<1x!tpu.dma_semaphore, #tpu.memory_space<semaphore_mem>> -> memref<!tpu.dma_semaphore, #tpu.memory_space<semaphore_mem>>
    tpu.wait_dma2 semaphore(%22 : memref<!tpu.dma_semaphore, #tpu.memory_space<semaphore_mem>>) src(%18 : memref<18x24x128xbf16, #tpu.memory_space<any>>) dst(%20 : memref<18x24x128xbf16, #tpu.memory_space<vmem>>)
    %23 = arith.index_cast %9 : i32 to index
    %c0 = arith.constant 0 : index
    %c0_15 = arith.constant 0 : index
    %c0_16 = arith.constant 0 : index
    %24 = vector.load %arg10[%23, %c0, %c0_15, %c0_16] : memref<2x18x24x128xbf16, #tpu.memory_space<vmem>>, vector<1x18x24x128xbf16>
    %25 = vector.shape_cast %24 : vector<1x18x24x128xbf16> to vector<18x24x128xbf16>
    %26 = vector.shape_cast %25 : vector<18x24x128xbf16> to vector<432x128xbf16>
    %c0_17 = arith.constant 0 : index
    %c0_18 = arith.constant 0 : index
    %27 = vector.load %arg3[%c0_17, %c0_18] : memref<128x128xbf16, #tpu.memory_space<vmem>>, vector<128x128xbf16>
    %cst = arith.constant dense<0.000000e+00> : vector<432x128xf32>
    %28 = tpu.matmul %26, %27, %cst {dimension_numbers = #tpu.dot_dimension_numbers<[1], [0], [0], [1], [0, 0, 1, 1], [], []>} : vector<432x128xbf16>, vector<128x128xbf16>, vector<432x128xf32> -> vector<432x128xf32>
    %c0_19 = arith.constant 0 : index
    %c0_20 = arith.constant 0 : index
    %29 = vector.load %arg4[%c0_19, %c0_20] : memref<1x128xf32, #tpu.memory_space<vmem>>, vector<1x128xf32>
    %30 = vector.broadcast %29 : vector<1x128xf32> to vector<432x128xf32>
    %31 = arith.addf %28, %30 : vector<432x128xf32>
    %cst_21 = arith.constant 0.000000e+00 : f32
    %cst_22 = arith.constant 6.000000e+00 : f32
    %32 = vector.broadcast %cst_21 : f32 to vector<432x128xf32>
    %33 = arith.maximumf %32, %31 : vector<432x128xf32>
    %34 = vector.broadcast %cst_22 : f32 to vector<432x128xf32>
    %35 = arith.minimumf %34, %33 : vector<432x128xf32>
    %36 = vector.shape_cast %35 : vector<432x128xf32> to vector<18x24x128xf32>
    %c16_i32 = arith.constant 16 : i32
    %37 = arith.muli %arg1, %c16_i32 : i32
    %38 = tpu.iota {dimensions = array<i32: 0>} : vector<18x24x1xi32>
    %39 = vector.broadcast %37 : i32 to vector<18x24x1xi32>
    %40 = arith.addi %38, %39 : vector<18x24x1xi32>
    %41 = tpu.iota {dimensions = array<i32: 1>} : vector<18x24x1xi32>
    %c1_i32_23 = arith.constant 1 : i32
    %42 = vector.broadcast %c1_i32_23 : i32 to vector<18x24x1xi32>
    %43 = arith.cmpi sge, %40, %42 : vector<18x24x1xi32>
    %c16_i32_24 = arith.constant 16 : i32
    %44 = vector.broadcast %c16_i32_24 : i32 to vector<18x24x1xi32>
    %45 = arith.cmpi sle, %40, %44 : vector<18x24x1xi32>
    %46 = arith.andi %43, %45 : vector<18x24x1xi1>
    %c1_i32_25 = arith.constant 1 : i32
    %47 = vector.broadcast %c1_i32_25 : i32 to vector<18x24x1xi32>
    %48 = arith.cmpi sge, %41, %47 : vector<18x24x1xi32>
    %49 = arith.andi %46, %48 : vector<18x24x1xi1>
    %c16_i32_26 = arith.constant 16 : i32
    %50 = vector.broadcast %c16_i32_26 : i32 to vector<18x24x1xi32>
    %51 = arith.cmpi sle, %41, %50 : vector<18x24x1xi32>
    %52 = arith.andi %49, %51 : vector<18x24x1xi1>
    %53 = arith.extui %52 : vector<18x24x1xi1> to vector<18x24x1xi32>
    %54 = arith.sitofp %53 : vector<18x24x1xi32> to vector<18x24x1xf32>
    %55 = vector.broadcast %54 : vector<18x24x1xf32> to vector<18x24x128xf32>
    %56 = arith.mulf %36, %55 : vector<18x24x128xf32>
    %57 = vector.extract_strided_slice %56 {offsets = [0, 0, 0], sizes = [16, 24, 128], strides = [1, 1, 1]} : vector<18x24x128xf32> to vector<16x24x128xf32>
    %58 = vector.extract_strided_slice %56 {offsets = [1, 0, 0], sizes = [16, 24, 128], strides = [1, 1, 1]} : vector<18x24x128xf32> to vector<16x24x128xf32>
    %59 = vector.extract_strided_slice %56 {offsets = [2, 0, 0], sizes = [16, 24, 128], strides = [1, 1, 1]} : vector<18x24x128xf32> to vector<16x24x128xf32>
    %cst_27 = arith.constant 0.000000e+00 : f32
    %60 = vector.broadcast %cst_27 : f32 to vector<16x16x128xf32>
    %c0_28 = arith.constant 0 : index
    %c0_29 = arith.constant 0 : index
    %c0_30 = arith.constant 0 : index
    %61 = vector.load %arg5[%c0_28, %c0_29, %c0_30] : memref<3x3x128xf32, #tpu.memory_space<vmem>>, vector<1x1x128xf32>
    %62 = vector.shape_cast %61 : vector<1x1x128xf32> to vector<128xf32>
    %63 = vector.shape_cast %62 : vector<128xf32> to vector<1x1x128xf32>
    %64 = vector.broadcast %63 : vector<1x1x128xf32> to vector<16x24x128xf32>
    %65 = arith.mulf %57, %64 : vector<16x24x128xf32>
    %c1 = arith.constant 1 : index
    %c0_31 = arith.constant 0 : index
    %c0_32 = arith.constant 0 : index
    %66 = vector.load %arg5[%c1, %c0_31, %c0_32] : memref<3x3x128xf32, #tpu.memory_space<vmem>>, vector<1x1x128xf32>
    %67 = vector.shape_cast %66 : vector<1x1x128xf32> to vector<128xf32>
    %68 = vector.shape_cast %67 : vector<128xf32> to vector<1x1x128xf32>
    %69 = vector.broadcast %68 : vector<1x1x128xf32> to vector<16x24x128xf32>
    %70 = arith.mulf %58, %69 : vector<16x24x128xf32>
    %71 = arith.addf %65, %70 : vector<16x24x128xf32>
    %c2 = arith.constant 2 : index
    %c0_33 = arith.constant 0 : index
    %c0_34 = arith.constant 0 : index
    %72 = vector.load %arg5[%c2, %c0_33, %c0_34] : memref<3x3x128xf32, #tpu.memory_space<vmem>>, vector<1x1x128xf32>
    %73 = vector.shape_cast %72 : vector<1x1x128xf32> to vector<128xf32>
    %74 = vector.shape_cast %73 : vector<128xf32> to vector<1x1x128xf32>
    %75 = vector.broadcast %74 : vector<1x1x128xf32> to vector<16x24x128xf32>
    %76 = arith.mulf %59, %75 : vector<16x24x128xf32>
    %77 = arith.addf %71, %76 : vector<16x24x128xf32>
    %78 = vector.extract_strided_slice %77 {offsets = [0, 0, 0], sizes = [16, 16, 128], strides = [1, 1, 1]} : vector<16x24x128xf32> to vector<16x16x128xf32>
    %79 = arith.addf %60, %78 : vector<16x16x128xf32>
    %c0_35 = arith.constant 0 : index
    %c1_36 = arith.constant 1 : index
    %c0_37 = arith.constant 0 : index
    %80 = vector.load %arg5[%c0_35, %c1_36, %c0_37] : memref<3x3x128xf32, #tpu.memory_space<vmem>>, vector<1x1x128xf32>
    %81 = vector.shape_cast %80 : vector<1x1x128xf32> to vector<128xf32>
    %82 = vector.shape_cast %81 : vector<128xf32> to vector<1x1x128xf32>
    %83 = vector.broadcast %82 : vector<1x1x128xf32> to vector<16x24x128xf32>
    %84 = arith.mulf %57, %83 : vector<16x24x128xf32>
    %c1_38 = arith.constant 1 : index
    %c1_39 = arith.constant 1 : index
    %c0_40 = arith.constant 0 : index
    %85 = vector.load %arg5[%c1_38, %c1_39, %c0_40] : memref<3x3x128xf32, #tpu.memory_space<vmem>>, vector<1x1x128xf32>
    %86 = vector.shape_cast %85 : vector<1x1x128xf32> to vector<128xf32>
    %87 = vector.shape_cast %86 : vector<128xf32> to vector<1x1x128xf32>
    %88 = vector.broadcast %87 : vector<1x1x128xf32> to vector<16x24x128xf32>
    %89 = arith.mulf %58, %88 : vector<16x24x128xf32>
    %90 = arith.addf %84, %89 : vector<16x24x128xf32>
    %c2_41 = arith.constant 2 : index
    %c1_42 = arith.constant 1 : index
    %c0_43 = arith.constant 0 : index
    %91 = vector.load %arg5[%c2_41, %c1_42, %c0_43] : memref<3x3x128xf32, #tpu.memory_space<vmem>>, vector<1x1x128xf32>
    %92 = vector.shape_cast %91 : vector<1x1x128xf32> to vector<128xf32>
    %93 = vector.shape_cast %92 : vector<128xf32> to vector<1x1x128xf32>
    %94 = vector.broadcast %93 : vector<1x1x128xf32> to vector<16x24x128xf32>
    %95 = arith.mulf %59, %94 : vector<16x24x128xf32>
    %96 = arith.addf %90, %95 : vector<16x24x128xf32>
    %97 = vector.extract_strided_slice %96 {offsets = [0, 1, 0], sizes = [16, 16, 128], strides = [1, 1, 1]} : vector<16x24x128xf32> to vector<16x16x128xf32>
    %98 = arith.addf %79, %97 : vector<16x16x128xf32>
    %c0_44 = arith.constant 0 : index
    %c2_45 = arith.constant 2 : index
    %c0_46 = arith.constant 0 : index
    %99 = vector.load %arg5[%c0_44, %c2_45, %c0_46] : memref<3x3x128xf32, #tpu.memory_space<vmem>>, vector<1x1x128xf32>
    %100 = vector.shape_cast %99 : vector<1x1x128xf32> to vector<128xf32>
    %101 = vector.shape_cast %100 : vector<128xf32> to vector<1x1x128xf32>
    %102 = vector.broadcast %101 : vector<1x1x128xf32> to vector<16x24x128xf32>
    %103 = arith.mulf %57, %102 : vector<16x24x128xf32>
    %c1_47 = arith.constant 1 : index
    %c2_48 = arith.constant 2 : index
    %c0_49 = arith.constant 0 : index
    %104 = vector.load %arg5[%c1_47, %c2_48, %c0_49] : memref<3x3x128xf32, #tpu.memory_space<vmem>>, vector<1x1x128xf32>
    %105 = vector.shape_cast %104 : vector<1x1x128xf32> to vector<128xf32>
    %106 = vector.shape_cast %105 : vector<128xf32> to vector<1x1x128xf32>
    %107 = vector.broadcast %106 : vector<1x1x128xf32> to vector<16x24x128xf32>
    %108 = arith.mulf %58, %107 : vector<16x24x128xf32>
    %109 = arith.addf %103, %108 : vector<16x24x128xf32>
    %c2_50 = arith.constant 2 : index
    %c2_51 = arith.constant 2 : index
    %c0_52 = arith.constant 0 : index
    %110 = vector.load %arg5[%c2_50, %c2_51, %c0_52] : memref<3x3x128xf32, #tpu.memory_space<vmem>>, vector<1x1x128xf32>
    %111 = vector.shape_cast %110 : vector<1x1x128xf32> to vector<128xf32>
    %112 = vector.shape_cast %111 : vector<128xf32> to vector<1x1x128xf32>
    %113 = vector.broadcast %112 : vector<1x1x128xf32> to vector<16x24x128xf32>
    %114 = arith.mulf %59, %113 : vector<16x24x128xf32>
    %115 = arith.addf %109, %114 : vector<16x24x128xf32>
    %116 = vector.extract_strided_slice %115 {offsets = [0, 2, 0], sizes = [16, 16, 128], strides = [1, 1, 1]} : vector<16x24x128xf32> to vector<16x16x128xf32>
    %117 = arith.addf %98, %116 : vector<16x16x128xf32>
    %c0_53 = arith.constant 0 : index
    %c0_54 = arith.constant 0 : index
    %118 = vector.load %arg6[%c0_53, %c0_54] : memref<1x128xf32, #tpu.memory_space<vmem>>, vector<1x128xf32>
    %119 = vector.shape_cast %118 : vector<1x128xf32> to vector<1x1x128xf32>
    %120 = vector.broadcast %119 : vector<1x1x128xf32> to vector<16x16x128xf32>
    %121 = arith.addf %117, %120 : vector<16x16x128xf32>
    %cst_55 = arith.constant 0.000000e+00 : f32
    %cst_56 = arith.constant 6.000000e+00 : f32
    %122 = vector.broadcast %cst_55 : f32 to vector<16x16x128xf32>
    %123 = arith.maximumf %122, %121 : vector<16x16x128xf32>
    %124 = vector.broadcast %cst_56 : f32 to vector<16x16x128xf32>
    %125 = arith.minimumf %124, %123 : vector<16x16x128xf32>
    %126 = vector.shape_cast %125 : vector<16x16x128xf32> to vector<256x128xf32>
    %127 = arith.truncf %126 : vector<256x128xf32> to vector<256x128xbf16>
    %c0_57 = arith.constant 0 : index
    %c0_58 = arith.constant 0 : index
    %128 = vector.load %arg7[%c0_57, %c0_58] : memref<128x128xbf16, #tpu.memory_space<vmem>>, vector<128x128xbf16>
    %cst_59 = arith.constant dense<0.000000e+00> : vector<256x128xf32>
    %129 = tpu.matmul %127, %128, %cst_59 {dimension_numbers = #tpu.dot_dimension_numbers<[1], [0], [0], [1], [0, 0, 1, 1], [], []>} : vector<256x128xbf16>, vector<128x128xbf16>, vector<256x128xf32> -> vector<256x128xf32>
    %c0_60 = arith.constant 0 : index
    %c0_61 = arith.constant 0 : index
    %130 = vector.load %arg8[%c0_60, %c0_61] : memref<1x128xf32, #tpu.memory_space<vmem>>, vector<1x128xf32>
    %131 = vector.broadcast %130 : vector<1x128xf32> to vector<256x128xf32>
    %132 = arith.addf %129, %131 : vector<256x128xf32>
    %133 = vector.shape_cast %132 : vector<256x128xf32> to vector<16x16x128xf32>
    %134 = vector.extract_strided_slice %25 {offsets = [1, 1, 0], sizes = [16, 16, 128], strides = [1, 1, 1]} : vector<18x24x128xbf16> to vector<16x16x128xbf16>
    %135 = arith.extf %134 : vector<16x16x128xbf16> to vector<16x16x128xf32>
    %136 = arith.addf %133, %135 : vector<16x16x128xf32>
    %c0_62 = arith.constant 0 : index
    %c0_63 = arith.constant 0 : index
    %c0_64 = arith.constant 0 : index
    %c0_65 = arith.constant 0 : index
    %137 = vector.load %arg9[%c0_62, %c0_63, %c0_64, %c0_65] : memref<1x16x16x128xf32, #tpu.memory_space<vmem>>, vector<1x16x16x128xf32>
    %138 = vector.shape_cast %137 : vector<1x16x16x128xf32> to vector<16x16x128xf32>
    %139 = vector.shape_cast %136 : vector<16x16x128xf32> to vector<1x16x16x128xf32>
    tpu.vector_store %arg9[%c0_62, %c0_63, %c0_64, %c0_65], %139 {strides = array<i32>} : memref<1x16x16x128xf32, #tpu.memory_space<vmem>>, vector<1x16x16x128xf32>,
    return
  }
  func.func @transform_1(%arg0: i32, %arg1: i32) -> (i32, i32) {
    %c0_i32 = arith.constant 0 : i32
    %c0_i32_0 = arith.constant 0 : i32
    %c0_i32_1 = arith.constant 0 : i32
    return %c0_i32, %c0_i32_0 : i32, i32
  }
  func.func @transform_2(%arg0: i32, %arg1: i32) -> (i32, i32) {
    %c0_i32 = arith.constant 0 : i32
    %c0_i32_0 = arith.constant 0 : i32
    %c0_i32_1 = arith.constant 0 : i32
    return %c0_i32, %c0_i32_0 : i32, i32
  }
  func.func @transform_3(%arg0: i32, %arg1: i32) -> (i32, i32, i32) {
    %c0_i32 = arith.constant 0 : i32
    %c0_i32_0 = arith.constant 0 : i32
    %c0_i32_1 = arith.constant 0 : i32
    %c0_i32_2 = arith.constant 0 : i32
    return %c0_i32, %c0_i32_0, %c0_i32_1 : i32, i32, i32
  }
  func.func @transform_4(%arg0: i32, %arg1: i32) -> (i32, i32) {
    %c0_i32 = arith.constant 0 : i32
    %c0_i32_0 = arith.constant 0 : i32
    %c0_i32_1 = arith.constant 0 : i32
    return %c0_i32, %c0_i32_0 : i32, i32
  }
  func.func @transform_5(%arg0: i32, %arg1: i32) -> (i32, i32) {
    %c0_i32 = arith.constant 0 : i32
    %c0_i32_0 = arith.constant 0 : i32
    %c0_i32_1 = arith.constant 0 : i32
    return %c0_i32, %c0_i32_0 : i32, i32
  }
  func.func @transform_6(%arg0: i32, %arg1: i32) -> (i32, i32) {
    %c0_i32 = arith.constant 0 : i32
    %c0_i32_0 = arith.constant 0 : i32
    %c0_i32_1 = arith.constant 0 : i32
    return %c0_i32, %c0_i32_0 : i32, i32
  }
  func.func @transform_7(%arg0: i32, %arg1: i32) -> (i32, i32, i32, i32) {
    %c0_i32 = arith.constant 0 : i32
    %c0_i32_0 = arith.constant 0 : i32
    %c0_i32_1 = arith.constant 0 : i32
    return %arg0, %arg1, %c0_i32, %c0_i32_0 : i32, i32, i32, i32
  }
}

</mosaic_0001>

<bundles_post_ra>
// kernel: tpu_custom_call.1
= control target key start
LH: loop header
LB: loop body
LE: loop exit
PB: predicated region body
PF: predicated region fallthrough
CT: control target
= control target key end

     0   :  { %s5813_s0 = inlined_call_operand.hbm [shape: bf16[2,18,24,128], index: 0, kind: input, shape index: {}]   ;;  %s5814_s1 = inlined_call_operand.hbm [shape: bf16[128,128], index: 1, kind: input, shape index: {}]   ;;  %s5815_s2 = inlined_call_operand.vmem [shape: f32[1,128], index: 2, kind: input, shape index: {}]   ;;  %s5816_s3 = inlined_call_operand.hbm [shape: f32[3,3,128], index: 3, kind: input, shape index: {}]   ;;  %s5817_s4 = inlined_call_operand.vmem [shape: f32[1,128], index: 4, kind: input, shape index: {}]   ;;  %s5818_s5 = inlined_call_operand.hbm [shape: bf16[128,128], index: 5, kind: input, shape index: {}]   ;;  %s5819_s6 = inlined_call_operand.vmem [shape: f32[1,128], index: 6, kind: input, shape index: {}]   ;;  %s5820_s7 = inlined_call_operand.hbm [shape: f32[2,16,16,128], index: 7, kind: output, shape index: {}]  }
   0x1   :  { %5851 = sst [smem:[#allocation60_spill]] %s5814_s1 }
   0x2   :  { %12 = vsyncpa [#allocation5], 0 }
   0x3   :  { %13 = vsyncpa [#allocation8], 0 }
   0x4   :  { %14 = vsyncpa [#allocation6], 0 }
   0x5   :  { %16 = vsyncpa [#allocation6 + $0x1], 0  ;;  %s4012_s24 = smov 0   ;;  %s4014_s25 = smov 0  }
   0x6   :  { %s4016_s26 = smov 0   ;;  %s4018_s27 = smov 0  }
   0x7   :  { %s4020_s28 = smov 0   ;;  %s4022_s29 = smov 0  }
   0x8 LB: > { %s3219_s30 = sadd.s32 4294967295, %s3959_s29   ;;  %s3220_s8 = sadd.s32 4294967294, %s3959_s29   ;;  %s3959_s29 = sphi %s4022_s29, %s22_s29   ;;  %s3955_s28 = sphi %s4020_s28, %s5954_s28   ;;  %s3951_s27 = sphi %s4018_s27, %s5953_s27   ;;  %s3947_s26 = sphi %s4016_s26, %s5952_s26   ;;  %s3943_s25 = sphi %s4014_s25, %s5951_s25   ;;  %s3939_s24 = sphi %s4012_s24, %s5950_s24  }
   0x9   : > { %s34_s9 = sadd.s32 1, %s3955_s28  ;;  %s169_s10 = sadd.s32 1, %s3947_s26 }
   0xa   : > { %p36_p0 = scmp.ge.s32.totalorder %s34_s9, 2  ;;  %p179_p1 = scmp.ne.s32.totalorder %s3947_s26, %s3943_s25 }
   0xb   : > { %p180_p2 = scmp.eq.s32.totalorder %s3219_s30, 1  ;;  %p185_p3 = scmp.ne.s32.totalorder %s3943_s25, %s3939_s24 }
   0xc   : > { %s5956_s9 = smov (%p36_p0, %s34_s9), 0  ;;  %p186_p5 = scmp.eq.s32.totalorder %s3220_s8, 1 }
   0xd   : > { %p4052_p4 = por %p180_p2, %p179_p1  ;;  %s164_s12 = ssub.s32 %s3955_s28, %s5956_s9 }
   0xe   : > { %p3221_p6 = scmp.ge.s32.totalorder %s3959_s29, 1  ;;  %p167_p7 = scmp.eq.s32.totalorder %s164_s12, 0 }
   0xf   : > { %p4059_p8 = por %p186_p5, %p185_p3  ;;  %p193_p9 = scmp.lt.s32.totalorder %s3959_s29, 3 }
  0x10   : > { %s4065_s14 = scalar_select %p167_p7, %s3947_s26, %s169_s10  }
  0x11   : > { %s5853_s13 = scalar_select %p4059_p8, 1, 0 }
  0x12   : > { %p4067_p10 = pnand %p3221_p6, %p193_p9  ;;  %p4071_p11 = scmp.eq.s32.totalorder %s3219_s30, 0 }
  0x13   : > { %s3961_s17 = smov [#allocation7]   ;;  %s3962_s20 = smov [#allocation4]  }
  0x14   : > { %p3590_p12 = pneg %p4067_p10  ;;  %s221_s18 = sshll.u32 %s3961_s17, 4  ;;  %s222_s18 = int_to_ptr.vmem [resolvable:$true] %s221_s18 }
  0x15   : > { %s205_s21 = sshll.u32 %s3962_s20, 4  ;;  %s3784_s22 = scalar_lea.vmem %s222_s18, 192  ;;  %s206_s21 = int_to_ptr.vmem [resolvable:$true] %s205_s21 }
  0x16   : > { %p4079_p13 = pnand %p4071_p11, %p3590_p12  ;;  %p3785_p1 = scmp.ne.s32.totalorder %s222_s18, %s3784_s22 }
  0x17   : > { %p3792_p5 = scmp.lt.s32.totalorder %s222_s18, %s222_s18  ;;  %p3793_p6 = scmp.lt.s32.totalorder %s3784_s22, %s3784_s22 }
  0x18   : > { %p3775_p0 = pneg %p4079_p13 }
  0x19   : > { %p3794_p7 = por %p3793_p6, %p3792_p5 }
  0x1a   : > { %p3787_p2 = pnand %p3785_p1, %p3775_p0 }
  0x1c   : > { %p3788_p3 = pneg %p3787_p2 }
  0x1e   : > { %p3795_p9 = pnand %p3794_p7, %p3788_p3 }
  0x20   : > { %3798 = shalt.err (!%p3795_p9)
}
  0x21   : > { %s3963_s23 = smov 64   ;;  %s3964_s30 = smov 4  }
  0x22   : > { %3596 = dma.hbm_to_vmem [thread:$0]  (!%p4079_p13), %s5816_s3, 192, %s222_s18, [#allocation8], %s3963_s23, %s3963_s23, %s3964_s30  }
  0x23   : > { %s3810_s12 = scalar_lea.vmem %s206_s21, 1024  ;;  %p3818_p8 = scmp.lt.s32.totalorder %s206_s21, %s206_s21 }
  0x24   : > { %p3811_p12 = scmp.ne.s32.totalorder %s206_s21, %s3810_s12  ;;  %p3819_p5 = scmp.lt.s32.totalorder %s3810_s12, %s3810_s12 }
  0x26   : > { %p3813_p1 = pnand %p3811_p12, %p3775_p0  ;;  %p3820_p3 = por %p3819_p5, %p3818_p8 }
  0x28   : > { %p3814_p2 = pneg %p3813_p1 }
  0x2a   : > { %p3821_p6 = pnand %p3820_p3, %p3814_p2 }
  0x2c   : > { %3824 = shalt.err (!%p3821_p6)
}
  0x2d   : > { %s5857_s1 = sld [smem:[#allocation60_spill]]  ;;  %s3965_s18 = smov [#allocation9]  }
  0x2e   : > { %s237_s22 = sshll.u32 %s3965_s18, 4  ;;  %s238_s22 = int_to_ptr.vmem [resolvable:$true] %s237_s22 }
  0x2f   : > { %s3836_s8 = scalar_lea.vmem %s238_s22, 1024  ;;  %p3844_p1 = scmp.lt.s32.totalorder %s238_s22, %s238_s22 }
  0x30   : > { %p3837_p7 = scmp.ne.s32.totalorder %s238_s22, %s3836_s8  ;;  %p3845_p8 = scmp.lt.s32.totalorder %s3836_s8, %s3836_s8 }
  0x32   : > { %p3839_p9 = pnand %p3837_p7, %p3775_p0  ;;  %p3846_p2 = por %p3845_p8, %p3844_p1 }
  0x33   : > { %3593 = dma.hbm_to_vmem [thread:$0]  (!%p4079_p13), %s5857_s1, 1024, %s206_s21, [#allocation5], %s3963_s23, %s3963_s23, %s3964_s30  }
  0x34   : > { %p3840_p12 = pneg %p3839_p9 }
  0x36   : > { %p3847_p5 = pnand %p3846_p2, %p3840_p12 }
  0x38   : > { %3850 = shalt.err (!%p3847_p5)
}
  0x39   : > { %3599 = dma.hbm_to_vmem [thread:$0]  (!%p4079_p13), %s5818_s5, 1024, %s238_s22, [#allocation8], %s3963_s23, %s3963_s23, %s3964_s30  }
  0x3a   : > { %256 = sbr.rel (%p4067_p10) target bundleno = 850 (0x352), region = 44 }
  0x3f   : > { %3924 = dma.done.wait (%p4071_p11), [#allocation5], 1024  }
  0x40   : > { %3926 = vsyncadd (%p4071_p11), [#allocation5], 4294966272 }
  0x41   : > { %3928 = dma.done.wait (%p4071_p11), [#allocation8], 1216  }
  0x42   : > { %3930 = vsyncadd (%p4071_p11), [#allocation8], 4294966080  ;;  %s5821_s19 = sand.u32 1, %s3943_s25   ;;  %s3326_s21 = smul.u32 3456, %s3951_s27 }
  0x43   : > { %s3229_s15 = sshll.u32 %s5821_s19, 8  ;;  %s3966_s20 = smov [#allocation2]  }
  0x44   : > { %s309_s17 = scalar_lea.hbm %s5813_s0, %s3326_s21  ;;  %s317_s18 = sshll.u32 %s3966_s20, 4  ;;  %s318_s18 = int_to_ptr.vmem [resolvable:$true] %s317_s18 }
  0x45   : > { %s3851_s22 = scalar_lea.hbm %s309_s17, 3456  ;;  %s3853_s16 = scalar_lea.hbm %s5813_s0, 6912 }
  0x46   : > { %p3852_p10 = scmp.ne.s32.totalorder %s309_s17, %s3851_s22  ;;  %p3854_p11 = scmp.lt.s32.totalorder %s309_s17, %s5813_s0 }
  0x47   : > { %p3855_p13 = scmp.lt.s32.totalorder %s3853_s16, %s3851_s22 }
  0x49   : > { %p3856_p0 = por %p3855_p13, %p3854_p11 }
  0x4b   : > { %p3857_p3 = pnand %p3856_p0, %p3852_p10 }
  0x4d   : > { %3860 = shalt.err (!%p3857_p3)  }
  0x4e   : > { %s3861_s19 = scalar_lea.vmem %s318_s18, 3456  ;;  %s3865_s21 = scalar_lea.vmem %s318_s18, 6912 }
  0x4f   : > { %p3862_p6 = scmp.ne.s32.totalorder %s318_s18, %s3861_s19  ;;  %p3866_p7 = scmp.lt.s32.totalorder %s318_s18, %s318_s18 }
  0x50   : > { %p3867_p9 = scmp.lt.s32.totalorder %s3865_s21, %s3861_s19 }
  0x52   : > { %p3868_p12 = por %p3867_p9, %p3866_p7 }
  0x54   : > { %p3869_p1 = pnand %p3868_p12, %p3862_p6 }
  0x56   : > { %3872 = shalt.err (!%p3869_p1)  }
  0x57   : > { %320 = dma.hbm_to_vmem [thread:$0]  %s309_s17, 3456, %s318_s18, [#allocation3] }
  0x58   : > { %s4132_s23 = scalar_lea.vmem [#allocation10], %s3229_s15 }
  0x59   : > { %3931 = dma.done.wait [#allocation3], 3456 }
  0x5a   : > { %3932 = vsyncadd [#allocation3], 4294963840  ;;  %v3967_v0 = vmov 0.0   ;;  %vm3968_vm0 = vmmov 0   ;;  %v3669_v1 = vld [vmem:[#allocation4 + $0x38] sm:$0xff]   ;;  %v3670_v2 = vld [vmem:[#allocation4 + $0x30] sm:$0xff]  }
  0x5b   : > { %3388 = vmatprep.subr.bf16.mxu0 %v3967_v0  ;;  %3404 = vmatprep.mubr.msk.bf16.mxu0 %vm3968_vm0, %v3967_v0  ;;  %v3671_v3 = vld [vmem:[#allocation4 + $0x28] sm:$0xff]   ;;  %v3672_v4 = vld [vmem:[#allocation4 + $0x20] sm:$0xff]   ;;  %v3673_v5 = vld [vmem:[#allocation4 + $0x18] sm:$0xff]   ;;  %vm1868_vm3 = vcmask 1046528   ;;  %vm2316_vm4 = vcmask 1045504   ;;  %s3328_s16 = sshll.u32 %s3951_s27, 12 }
  0x5c   : > { %3560 = vmatprep.subr.bf16.mxu1 %v3967_v0  ;;  %3476 = vmatprep.mubr.msk.bf16.mxu1 %vm3968_vm0, %v3967_v0  ;;  %v3674_v6 = vld [vmem:[#allocation4 + $0x10] sm:$0xff]   ;;  %v3675_v7 = vld [vmem:[#allocation4 + $0x8] sm:$0xff]   ;;  %v3676_v8 = vld [vmem:[#allocation4] sm:$0xff]   ;;  %s3101_s12 = sshll.u32 %s4132_s23, 4  ;;  %s5760_s19 = scalar_lea.hbm %s5820_s7, %s3328_s16  ;;  %s5762_s12 = int_to_ptr.vmem [resolvable:$true] %s3101_s12 }
  0x5d   : > { %3389 = vmatpush3.bf16.msra.mxu0 %v3669_v1  ;;  %3568 = vmatpush3.bf16.msra.mxu1 %v3669_v1  ;;  %v395_v9 = vld [vmem:[#allocation2 + $0x90] sm:$0xff]   ;;  %v3677_v10 = vld [vmem:[#allocation2] sm:$0xff]   ;;  %v4156_v11 = vld [vmem:[#allocation2 + $0x8] sm:$0xff]   ;;  %s5948_s27 = sand.u32 1, %s3943_s25   ;;  %s3873_s30 = scalar_lea.vmem %s5762_s12, 4096 }
  0x5e   : > { %3390 = vmatprep.subr.bf16.mxu0 %v3967_v0  ;;  %3561 = vmatprep.subr.bf16.mxu1 %v3967_v0  ;;  %v397_v12 = vld [vmem:[#allocation2 + $0x98] sm:$0xff]   ;;  %v4163_v13 = vld [vmem:[#allocation2 + $0x10] sm:$0xff]   ;;  %v399_v14 = vld [vmem:[#allocation2 + $0xa0] sm:$0xff]   ;;  %v2812_v44 = vunpack.c.h.bf16 %v4156_v11  ;;  %s5768_s15 = scalar_lea.sflag [#allocation6], %s5948_s27  ;;  %p3874_p8 = scmp.ne.s32.totalorder %s5762_s12, %s3873_s30 }
  0x5f   : > { %v4170_v15 = vld [vmem:[#allocation2 + $0x18] sm:$0xff]   ;;  %v401_v16 = vld [vmem:[#allocation2 + $0xa8] sm:$0xff]   ;;  %v4177_v17 = vld [vmem:[#allocation2 + $0x20] sm:$0xff]   ;;  %v2813_v45 = vunpack.c.l.bf16 %v4163_v13  ;;  %v2814_v46 = vunpack.c.h.bf16 %v4163_v13  ;;  %s3969_s17 = smov [#allocation10]  }
  0x60   : > { %v403_v18 = vld [vmem:[#allocation2 + $0xb0] sm:$0xff]   ;;  %v4184_v19 = vld [vmem:[#allocation2 + $0x28] sm:$0xff]   ;;  %v405_v20 = vld [vmem:[#allocation2 + $0xb8] sm:$0xff]   ;;  %v2815_v47 = vunpack.c.l.bf16 %v4170_v15  ;;  %v2816_v48 = vunpack.c.h.bf16 %v4170_v15  ;;  %v2817_v49 = vunpack.c.l.bf16 %v4177_v17  ;;  %v2818_v50 = vunpack.c.h.bf16 %v4177_v17  ;;  %p3875_p2 = pnand %p3874_p8, %p4052_p4  ;;  %s3877_s20 = sshll.u32 %s3969_s17, 4  ;;  %s3878_s20 = int_to_ptr.vmem [resolvable:$false] %s3877_s20 }
  0x61   : > { %3391 = vmatpush3.bf16.msra.mxu0 %v3670_v2  ;;  %3569 = vmatpush3.bf16.msra.mxu1 %v3670_v2  ;;  %v4191_v21 = vld [vmem:[#allocation2 + $0x30] sm:$0xff]   ;;  %v407_v22 = vld [vmem:[#allocation2 + $0xc0] sm:$0xff]   ;;  %v4198_v23 = vld [vmem:[#allocation2 + $0x38] sm:$0xff]   ;;  %v2819_v51 = vunpack.c.l.bf16 %v4184_v19  ;;  %v2820_v52 = vunpack.c.h.bf16 %v4184_v19  ;;  %v4266_v54 = vrot.slane %v2812_v44, 1  ;;  %v4269_v58 = vrot.slane %v2813_v45, 1  ;;  %s3879_s18 = scalar_lea.vmem %s3878_s20, 8192  ;;  %p3880_p10 = scmp.lt.s32.totalorder %s5762_s12, %s3878_s20 }
  0x62   : > { %3392 = vmatprep.subr.bf16.mxu0 %v3967_v0  ;;  %3562 = vmatprep.subr.bf16.mxu1 %v3967_v0  ;;  %v409_v24 = vld [vmem:[#allocation2 + $0xc8] sm:$0xff]   ;;  %v4205_v25 = vld [vmem:[#allocation2 + $0x40] sm:$0xff]   ;;  %v3701_v26 = vld [vmem:[#allocation2 + $0xd0] sm:$0xff]   ;;  %v2821_v55 = vunpack.c.l.bf16 %v4191_v21  ;;  %v4271_v59 = vrot.slane %v2814_v46, 1  ;;  %v4273_v60 = vrot.slane %v2815_v47, 1  ;;  %v4275_v61 = vrot.slane %v2816_v48, 1  ;;  %p3876_p5 = pneg %p3875_p2  ;;  %p3881_p11 = scmp.lt.s32.totalorder %s3879_s18, %s3873_s30 }
  0x63   : > { %v4212_v27 = vld [vmem:[#allocation2 + $0x48] sm:$0xff]   ;;  %v4217_v28 = vld [vmem:[#allocation2 + $0x50] sm:$0xff]   ;;  %v4222_v29 = vld [vmem:[#allocation2 + $0x58] sm:$0xff]   ;;  %5861 = vst [vmem:[#allocation24_spill] sm:$0xff] %v4266_v54  ;;  %v4277_v62 = vrot.slane %v2817_v49, 1  ;;  %v2822_v63 = vunpack.c.h.bf16 %v4191_v21  ;;  %v2823_v1 = vunpack.c.l.bf16 %v4198_v23 }
  0x64   : > { %v4227_v30 = vld [vmem:[#allocation2 + $0x60] sm:$0xff]   ;;  %v4232_v31 = vld [vmem:[#allocation2 + $0x68] sm:$0xff]   ;;  %v3704_v32 = vld [vmem:[#allocation9 + $0x38] sm:$0xff]   ;;  %5862 = vst [vmem:[#allocation25_spill] sm:$0xff] %v4269_v58  ;;  %p3882_p13 = por %p3881_p11, %p3880_p10 }
  0x65   : > { %3393 = vmatpush3.bf16.msra.mxu0 %v3671_v3  ;;  %3570 = vmatpush3.bf16.msra.mxu1 %v3671_v3  ;;  %v4237_v33 = vld [vmem:[#allocation2 + $0x70] sm:$0xff]   ;;  %v3706_v35 = vld [vmem:[#allocation9 + $0x28] sm:$0xff]   ;;  %v4242_v36 = vld [vmem:[#allocation2 + $0x78] sm:$0xff]   ;;  %5863 = vst [vmem:[#allocation26_spill] sm:$0xff] %v4271_v59 }
  0x66   : > { %3394 = vmatprep.subr.bf16.mxu0 %v3967_v0  ;;  %3563 = vmatprep.subr.bf16.mxu1 %v3967_v0  ;;  %5858 = vst [vmem:[#allocation21_spill] sm:$0xff] %v4237_v33  ;;  %v3705_v34 = vld [vmem:[#allocation9 + $0x30] sm:$0xff]   ;;  %5859 = vst [vmem:[#allocation22_spill] sm:$0xff] %v4242_v36  ;;  %v3707_v37 = vld [vmem:[#allocation9 + $0x20] sm:$0xff]   ;;  %p3883_p0 = pnand %p3882_p13, %p3876_p5 }
  0x67   : > { %v3708_v38 = vld [vmem:[#allocation9 + $0x18] sm:$0xff]   ;;  %v4247_v39 = vld [vmem:[#allocation2 + $0x80] sm:$0xff]   ;;  %v3709_v40 = vld [vmem:[#allocation9 + $0x10] sm:$0xff]   ;;  %5864 = vst [vmem:[#allocation27_spill] sm:$0xff] %v4273_v60 }
  0x68   : > { %5860 = vst [vmem:[#allocation23_spill] sm:$0xff] %v4247_v39  ;;  %v3710_v41 = vld [vmem:[#allocation9 + $0x8] sm:$0xff]   ;;  %v3711_v43 = vld [vmem:[#allocation9] sm:$0xff]   ;;  %5865 = vst [vmem:[#allocation28_spill] sm:$0xff] %v4275_v61 }
  0x69   : > { %3395 = vmatpush3.bf16.msra.mxu0 %v3672_v4  ;;  %3571 = vmatpush3.bf16.msra.mxu1 %v3672_v4  ;;  %v393_v42 = vld [vmem:[#allocation2 + $0x88] sm:$0xff]   ;;  %v4264_v53 = vld [vmem:[%s5815_s2] ss:$0 sm:$0xff]  ;;  %5866 = vst [vmem:[#allocation29_spill] sm:$0xff] %v4277_v62 }
  0x6a   : > { %3396 = vmatprep.subr.bf16.mxu0 %v3967_v0  ;;  %3564 = vmatprep.subr.bf16.mxu1 %v3967_v0 }
  0x6d   : > { %3397 = vmatpush3.bf16.msra.mxu0 %v3673_v5  ;;  %3572 = vmatpush3.bf16.msra.mxu1 %v3673_v5  ;;  %v4282_v5 = vrot.slane %v2818_v50, 1 }
  0x6e   : > { %3398 = vmatprep.subr.bf16.mxu0 %v3967_v0  ;;  %3565 = vmatprep.subr.bf16.mxu1 %v3967_v0 }
  0x6f   : > { %5867 = vst [vmem:[#allocation30_spill] sm:$0xff] %v4282_v5 }
  0x71   : > { %3399 = vmatpush3.bf16.msra.mxu0 %v3674_v6  ;;  %3573 = vmatpush3.bf16.msra.mxu1 %v3674_v6  ;;  %v4284_v6 = vrot.slane %v2819_v51, 1 }
  0x72   : > { %3400 = vmatprep.subr.bf16.mxu0 %v3967_v0  ;;  %3566 = vmatprep.subr.bf16.mxu1 %v3967_v0 }
  0x73   : > { %5868 = vst [vmem:[#allocation31_spill] sm:$0xff] %v4284_v6 }
  0x75   : > { %3401 = vmatpush3.bf16.msra.mxu0 %v3675_v7  ;;  %3574 = vmatpush3.bf16.msra.mxu1 %v3675_v7  ;;  %v4286_v7 = vrot.slane %v2820_v52, 1 }
  0x76   : > { %3402 = vmatprep.subr.bf16.mxu0 %v3967_v0  ;;  %3567 = vmatprep.subr.bf16.mxu1 %v3967_v0 }
  0x77   : > { %5869 = vst [vmem:[#allocation32_spill] sm:$0xff] %v4286_v7 }
  0x79   : > { %3403 = vmatpush3.bf16.msra.mxu0 %v3676_v8  ;;  %3575 = vmatpush3.bf16.msra.mxu1 %v3676_v8  ;;  %v1022_v8 = vlaneseq }
  0x7a   : > { %3512 = vmatprep.subr.bf16.mxu1 %v3704_v32 }
  0x7c   : > { %3405 = vmatmul.mubr.bf16.vlgmr.msra.gmra.mxu0 %v3677_v10  ;;  %3477 = vmatmul.mubr.bf16.vlgmr.msra.gmra.mxu1 %v395_v9  ;;  %v4288_v9 = vrot.slane %v2821_v55, 1  ;;  %v2824_v10 = vunpack.c.h.bf16 %v4198_v23 }
  0x7d   : > { %3408 = vmatprep.mubr.msk.bf16.mxu0 %vm3968_vm0, %v3967_v0  ;;  %3480 = vmatprep.mubr.msk.bf16.mxu1 %vm3968_vm0, %v3967_v0 }
  0x7e   : > { %3513 = vmatpush3.bf16.msra.mxu1 %v3704_v32  ;;  %5870 = vst [vmem:[#allocation33_spill] sm:$0xff] %v4288_v9  ;;  %v4305_v32 = vrot.slane %v2824_v10, 1 }
  0x7f   : > { %3514 = vmatprep.subr.bf16.mxu1 %v3705_v34 }
  0x80   : > { %5873 = vst [vmem:[#allocation36_spill] sm:$0xff] %v4305_v32 }
  0x82   : > { %3515 = vmatpush3.bf16.msra.mxu1 %v3705_v34 }
  0x83   : > { %3516 = vmatprep.subr.bf16.mxu1 %v3706_v35 }
  0x84   : > { %3409 = vmatmul.mubr.bf16.gmra.mxu0 %v4156_v11  ;;  %3481 = vmatmul.mubr.bf16.gmra.mxu1 %v397_v12  ;;  %v2825_v11 = vunpack.c.l.bf16 %v4205_v25  ;;  %v2828_v12 = vunpack.c.h.bf16 %v4212_v27 }
  0x85   : > { %3412 = vmatprep.mubr.msk.bf16.mxu0 %vm3968_vm0, %v3967_v0  ;;  %3484 = vmatprep.mubr.msk.bf16.mxu1 %vm3968_vm0, %v3967_v0 }
  0x86   : > { %3517 = vmatpush3.bf16.msra.mxu1 %v3706_v35  ;;  %v4309_v34 = vrot.slane %v2828_v12, 1 }
  0x87   : > { %3518 = vmatprep.subr.bf16.mxu1 %v3707_v37 }
  0x88   : > { %5875 = vst [vmem:[#allocation38_spill] sm:$0xff] %v4309_v34 }
  0x8a   : > { %3519 = vmatpush3.bf16.msra.mxu1 %v3707_v37 }
  0x8b   : > { %3520 = vmatprep.subr.bf16.mxu1 %v3708_v38 }
  0x8c   : > { %3413 = vmatmul.mubr.bf16.gmra.mxu0 %v4163_v13  ;;  %3485 = vmatmul.mubr.bf16.gmra.mxu1 %v399_v14 }
  0x8d   : > { %3416 = vmatprep.mubr.msk.bf16.mxu0 %vm3968_vm0, %v3967_v0  ;;  %3488 = vmatprep.mubr.msk.bf16.mxu1 %vm3968_vm0, %v3967_v0 }
  0x8e   : > { %3521 = vmatpush3.bf16.msra.mxu1 %v3708_v38 }
  0x8f   : > { %3522 = vmatprep.subr.bf16.mxu1 %v3709_v40 }
  0x92   : > { %3523 = vmatpush3.bf16.msra.mxu1 %v3709_v40 }
  0x93   : > { %3524 = vmatprep.subr.bf16.mxu1 %v3710_v41 }
  0x94   : > { %3417 = vmatmul.mubr.bf16.gmra.mxu0 %v4170_v15  ;;  %3489 = vmatmul.mubr.bf16.gmra.mxu1 %v401_v16  ;;  %v2829_v15 = vunpack.c.l.bf16 %v4217_v28  ;;  %v2830_v16 = vunpack.c.h.bf16 %v4217_v28 }
  0x95   : > { %3420 = vmatprep.mubr.msk.bf16.mxu0 %vm3968_vm0, %v3967_v0  ;;  %3492 = vmatprep.mubr.msk.bf16.mxu1 %vm3968_vm0, %v3967_v0 }
  0x96   : > { %3525 = vmatpush3.bf16.msra.mxu1 %v3710_v41  ;;  %v4311_v40 = vrot.slane %v2829_v15, 1  ;;  %v4313_v41 = vrot.slane %v2830_v16, 1  ;;  %v4333_v16 = vld [vmem:[#allocation7 + $0x1] ss:$0 sm:$0xff] }
  0x97   : > { %3526 = vmatprep.subr.bf16.mxu1 %v3711_v43 }
  0x98   : > { %5876 = vst [vmem:[#allocation39_spill] sm:$0xff] %v4311_v40  ;;  %5877 = vst [vmem:[#allocation40_spill] sm:$0xff] %v4313_v41 }
  0x9a   : > { %3527 = vmatpush3.bf16.msra.mxu1 %v3711_v43 }
  0x9c   : > { %3421 = vmatmul.mubr.bf16.gmra.mxu0 %v4177_v17  ;;  %3493 = vmatmul.mubr.bf16.gmra.mxu1 %v403_v18  ;;  %v2831_v17 = vunpack.c.l.bf16 %v4222_v29 }
  0x9d   : > { %3424 = vmatprep.mubr.msk.bf16.mxu0 %vm3968_vm0, %v3967_v0  ;;  %3496 = vmatprep.mubr.msk.bf16.mxu1 %vm3968_vm0, %v3967_v0 }
  0xa4   : > { %3425 = vmatmul.mubr.bf16.gmra.mxu0 %v4184_v19  ;;  %3497 = vmatmul.mubr.bf16.gmra.mxu1 %v405_v20  ;;  %v4297_v19 = vrot.slane %v2822_v63, 1  ;;  %v4299_v20 = vrot.slane %v2823_v1, 1 }
  0xa5   : > { %3428 = vmatprep.mubr.msk.bf16.mxu0 %vm3968_vm0, %v3967_v0  ;;  %3500 = vmatprep.mubr.msk.bf16.mxu1 %vm3968_vm0, %v3967_v0 }
  0xa6   : > { %5871 = vst [vmem:[#allocation34_spill] sm:$0xff] %v4297_v19  ;;  %5872 = vst [vmem:[#allocation35_spill] sm:$0xff] %v4299_v20 }
  0xac   : > { %3429 = vmatmul.mubr.bf16.gmra.mxu0 %v4191_v21  ;;  %3501 = vmatmul.mubr.bf16.gmra.mxu1 %v407_v22 }
  0xad   : > { %3432 = vmatprep.mubr.msk.bf16.mxu0 %vm3968_vm0, %v3967_v0  ;;  %3504 = vmatprep.mubr.msk.bf16.mxu1 %vm3968_vm0, %v3967_v0 }
  0xb4   : > { %3433 = vmatmul.mubr.bf16.gmra.mxu0 %v4198_v23  ;;  %3505 = vmatmul.mubr.bf16.gmra.mxu1 %v409_v24 }
  0xb5   : > { %3436 = vmatprep.mubr.msk.bf16.mxu0 %vm3968_vm0, %v3967_v0  ;;  %3508 = vmatprep.mubr.msk.bf16.mxu1 %vm3968_vm0, %v3967_v0 }
  0xbc   : > { %3437 = vmatmul.mubr.bf16.gmra.mxu0 %v4205_v25  ;;  %3509 = vmatmul.mubr.bf16.gmra.mxu1 %v3701_v26  ;;  %v2834_v25 = vunpack.c.h.bf16 %v4227_v30  ;;  %v2835_v26 = vunpack.c.l.bf16 %v4232_v31 }
  0xbd   : > { %3440 = vmatprep.mubr.msk.bf16.mxu0 %vm3968_vm0, %v3967_v0 }
  0xbe   : > { %v4319_v48 = vrot.slane %v2834_v25, 1  ;;  %v4321_v49 = vrot.slane %v2835_v26, 1 }
  0xc0   : > { %5879 = vst [vmem:[#allocation42_spill] sm:$0xff] %v4319_v48  ;;  %5880 = vst [vmem:[#allocation43_spill] sm:$0xff] %v4321_v49 }
  0xc4   : > { %3441 = vmatmul.mubr.bf16.gmra.mxu0 %v4212_v27  ;;  %v2836_v27 = vunpack.c.h.bf16 %v4232_v31 }
  0xc5   : > { %3444 = vmatprep.mubr.msk.bf16.mxu0 %vm3968_vm0, %v3967_v0 }
  0xc6   : > { %v4323_v50 = vrot.slane %v2836_v27, 1 }
  0xc8   : > { %5881 = vst [vmem:[#allocation44_spill] sm:$0xff] %v4323_v50 }
  0xcc   : > { %3445 = vmatmul.mubr.bf16.gmra.mxu0 %v4217_v28  ;;  %v1023_v28 = vshrl.u32 %v1022_v8, 7  ;;  %v4329_v8 = vld [vmem:[#allocation7] ss:$0 sm:$0xff] }
  0xcd   : > { %3448 = vmatprep.mubr.msk.bf16.mxu0 %vm3968_vm0, %v3967_v0 }
  0xce   : > { %vm1080_vm1 = vcmp.ge.s32.totalorder %v1023_v28, 1 }
  0xd4   : > { %3449 = vmatmul.mubr.bf16.gmra.mxu0 %v4222_v29  ;;  %v4307_v29 = vrot.slane %v2825_v11, 1 }
  0xd5   : > { %3452 = vmatprep.mubr.msk.bf16.mxu0 %vm3968_vm0, %v3967_v0 }
  0xd6   : > { %5874 = vst [vmem:[#allocation37_spill] sm:$0xff] %v4307_v29 }
  0xdc   : > { %3453 = vmatmul.mubr.bf16.gmra.mxu0 %v4227_v30  ;;  %v1025_v30 = vadd.s32 16, %v1023_v28 }
  0xdd   : > { %3456 = vmatprep.mubr.msk.bf16.mxu0 %vm3968_vm0, %v3967_v0 }
  0xde   : > { %vm1139_vm2 = vcmp.le.s32.totalorder %v1025_v30, 16 }
  0xdf   : > { %v4343_v25 = vsel %vm1139_vm2, 1.0, %v3967_v0 }
  0xe4   : > { %3457 = vmatmul.mubr.bf16.gmra.mxu0 %v4232_v31 }
  0xe5   : > { %3460 = vmatprep.mubr.msk.bf16.mxu0 %vm3968_vm0, %v3967_v0 }
  0xec   : > { %3461 = vmatmul.mubr.bf16.gmra.mxu0 %v4237_v33 }
  0xed   : > { %3464 = vmatprep.mubr.msk.bf16.mxu0 %vm3968_vm0, %v3967_v0 }
  0xf4   : > { %3465 = vmatmul.mubr.bf16.gmra.mxu0 %v4242_v36 }
  0xf5   : > { %3468 = vmatprep.mubr.msk.bf16.mxu0 %vm3968_vm0, %v3967_v0 }
  0xfc   : > { %3469 = vmatmul.mubr.bf16.gmra.mxu0 %v4247_v39 }
  0xfd   : > { %3472 = vmatprep.mubr.msk.bf16.mxu0 %vm3968_vm0, %v3967_v0 }
 0x104   : > { %3473 = vmatmul.mubr.bf16.gmra.mxu0 %v393_v42  ;;  %v4315_v42 = vrot.slane %v2831_v17, 1 }
 0x106   : > { %5878 = vst [vmem:[#allocation41_spill] sm:$0xff] %v4315_v42 }
 0x13c   : > { %v680_v56 = vpop.f32.mrf.mxu0  ;;  %v824_v57 = vpop.f32.mrf.mxu1 }
 0x13d   : > { %v681_v2 = vadd.f32 %v4264_v53, %v680_v56  ;;  %v825_v23 = vadd.f32 %v4264_v53, %v824_v57 }
 0x13e   : > { %v3406_v3 = vpop.f32.mrf.mxu0  ;;  %v3478_v4 = vpop.f32.mrf.mxu1 }
 0x13f   : > { %v895_v21 = vmax.f32 %v681_v2, 0.0  ;;  %v931_v45 = vmax.f32 %v825_v23, 0.0 }
 0x140   : > { %v683_v13 = vpop.f32.mrf.mxu0  ;;  %v827_v14 = vpop.f32.mrf.mxu1 }
 0x141   : > { %v684_v18 = vadd.f32 %v4264_v53, %v683_v13  ;;  %v949_v43 = vmin.f32 %v895_v21, 6.0  ;;  %v828_v51 = vadd.f32 %v4264_v53, %v827_v14  ;;  %v985_v12 = vmin.f32 %v931_v45, 6.0 }
 0x142   : > { %v3407_v22 = vpop.f32.mrf.mxu0  ;;  %v3479_v24 = vpop.f32.mrf.mxu1 }
 0x143   : > { %v896_v35 = vmax.f32 %v684_v18, 0.0  ;;  %v1302_v4 = vmul.f32 0.0, %v949_v43  ;;  %v4337_v18 = vsel %vm1080_vm1, 1.0, %v3967_v0  ;;  %v932_v21 = vmax.f32 %v828_v51, 0.0  ;;  %v4339_v22 = vld [vmem:[#allocation7 + $0x2] ss:$0 sm:$0xff] }
 0x144   : > { %v688_v37 = vpop.f32.mrf.mxu0  ;;  %v832_v38 = vpop.f32.mrf.mxu1 }
 0x145   : > { %v689_v31 = vadd.f32 %v4264_v53, %v688_v37  ;;  %v833_v46 = vadd.f32 %v4264_v53, %v832_v38  ;;  %v950_v52 = vmin.f32 %v896_v35, 6.0 }
 0x146   : > { %v3410_v44 = vpop.f32.mrf.mxu0  ;;  %v3482_v47 = vpop.f32.mrf.mxu1 }
 0x147   : > { %v897_v55 = vmax.f32 %v689_v31, 0.0  ;;  %v933_v57 = vmax.f32 %v833_v46, 0.0  ;;  %v1303_v23 = vmul.f32 0.0, %v950_v52  ;;  %v1361_v31 = vmul.f32 %v4329_v8, %v1302_v4 }
 0x148   : > { %v691_v56 = vpop.f32.mrf.mxu0  ;;  %v835_v63 = vpop.f32.mrf.mxu1  ;;  %v1570_v44 = vmul.f32 %v4333_v16, %v1302_v4  ;;  %v4350_v46 = vmul.f32 %v4337_v18, %v985_v12  ;;  %v2018_v47 = vmul.f32 %v4339_v22, %v1302_v4  ;;  %v4363_v12 = vld [vmem:[#allocation7 + $0x6] ss:$0 sm:$0xff] }
 0x149   : > { %v692_v3 = vadd.f32 %v4264_v53, %v691_v56  ;;  %v951_v10 = vmin.f32 %v897_v55, 6.0  ;;  %v836_v13 = vadd.f32 %v4264_v53, %v835_v63  ;;  %v987_v26 = vmin.f32 %v933_v57, 6.0  ;;  %v4354_v55 = vld [vmem:[#allocation7 + $0x5] ss:$0 sm:$0xff]  ;;  %v4356_v56 = vld [vmem:[#allocation7 + $0x4] ss:$0 sm:$0xff] }
 0x14a   : > { %v3411_v11 = vpop.f32.mrf.mxu0  ;;  %v3483_v14 = vpop.f32.mrf.mxu1  ;;  %v4358_v57 = vmin.f32 %v932_v21, 6.0  ;;  %v1362_v63 = vmul.f32 %v4329_v8, %v1303_v23 }
 0x14b   : > { %v898_v17 = vmax.f32 %v692_v3, 0.0  ;;  %v934_v27 = vmax.f32 %v836_v13, 0.0  ;;  %v1304_v37 = vmul.f32 0.0, %v951_v10  ;;  %v1571_v3 = vmul.f32 %v4333_v16, %v1303_v23 }
 0x14c   : > { %v696_v24 = vpop.f32.mrf.mxu0  ;;  %v840_v35 = vpop.f32.mrf.mxu1  ;;  %5882 = vst [vmem:[#allocation45_spill] sm:$0xff] %v4358_v57  ;;  %v2019_v10 = vmul.f32 %v4339_v22, %v1303_v23  ;;  %v4366_v4 = vmul.f32 %v4343_v25, %v987_v26 }
 0x14d   : > { %v952_v38 = vmin.f32 %v898_v17, 6.0  ;;  %v697_v43 = vadd.f32 %v4264_v53, %v696_v24  ;;  %v841_v28 = vadd.f32 %v4264_v53, %v840_v35  ;;  %v988_v30 = vmin.f32 %v934_v27, 6.0 }
 0x14e   : > { %v3414_v45 = vpop.f32.mrf.mxu0  ;;  %v3486_v0 = vpop.f32.mrf.mxu1  ;;  %5883 = vst [vmem:[#allocation46_spill] sm:$0xff] %v4366_v4  ;;  %v1572_v14 = vmul.f32 %v4333_v16, %v1304_v37  ;;  %v2020_v17 = vmul.f32 %v4339_v22, %v1304_v37 }
 0x14f   : > { %v1305_v51 = vmul.f32 %v4337_v18, %v952_v38  ;;  %v899_v52 = vmax.f32 %v697_v43, 0.0  ;;  %v935_v21 = vmax.f32 %v841_v28, 0.0  ;;  %v4374_v43 = vmul.f32 %v4337_v18, %v988_v30 }
 0x150   : > { %v699_v11 = vpop.f32.mrf.mxu0  ;;  %v843_v13 = vpop.f32.mrf.mxu1 }
 0x151   : > { %v953_v24 = vmin.f32 %v899_v52, 6.0  ;;  %v700_v27 = vadd.f32 %v4264_v53, %v699_v11  ;;  %v1399_v38 = vmul.f32 %v4356_v56, %v1305_v51  ;;  %v1623_v23 = vmul.f32 %v4354_v55, %v1305_v51  ;;  %5884 = vst [vmem:[#allocation47_spill] sm:$0xff] %v4374_v43 }
 0x152   : > { %v3415_v35 = vpop.f32.mrf.mxu0  ;;  %v3487_v45 = vpop.f32.mrf.mxu1  ;;  %v4377_v26 = vmul.f32 %v4329_v8, %v1305_v51  ;;  %v4380_v0 = vmul.f32 %v4333_v16, %v1305_v51  ;;  %v2071_v28 = vmul.f32 %v4363_v12, %v1305_v51  ;;  %v4385_v52 = vmul.f32 %v4339_v22, %v1305_v51 }
 0x153   : > { %v1624_v37 = vmul.f32 %v4354_v55, %v953_v24  ;;  %v4388_v11 = vmul.f32 %v4329_v8, %v953_v24  ;;  %v900_v35 = vmax.f32 %v700_v27, 0.0  ;;  %v1400_v45 = vmul.f32 %v4356_v56, %v953_v24 }
 0x154   : > { %v704_v30 = vpop.f32.mrf.mxu0  ;;  %v848_v2 = vpop.f32.mrf.mxu1  ;;  %v4392_v15 = vmul.f32 %v4333_v16, %v953_v24  ;;  %v4395_v1 = vmul.f32 %v4339_v22, %v953_v24  ;;  %v1431_v50 = vadd.f32 %v1399_v38, %v1361_v31  ;;  %v1671_v49 = vadd.f32 %v1623_v23, %v1570_v44  ;;  %v4423_v23 = vld [vmem:[#allocation7 + $0xa] ss:$0 sm:$0xff] }
 0x155   : > { %v705_v7 = vadd.f32 %v4264_v53, %v704_v30  ;;  %v954_v48 = vmin.f32 %v900_v35, 6.0  ;;  %v2072_v41 = vmul.f32 %v4363_v12, %v953_v24  ;;  %v844_v27 = vadd.f32 %v4264_v53, %v843_v13 }
 0x156   : > { %v3418_v51 = vpop.f32.mrf.mxu0  ;;  %v3490_v42 = vpop.f32.mrf.mxu1  ;;  %v1672_v34 = vadd.f32 %v1624_v37, %v1571_v3  ;;  %v2119_v40 = vadd.f32 %v2071_v28, %v2018_v47  ;;  %v849_v32 = vadd.f32 %v4264_v53, %v848_v2  ;;  %v1432_v33 = vadd.f32 %v1400_v45, %v1362_v63  ;;  %v4413_v47 = vld [vmem:[#allocation7 + $0x9] ss:$0 sm:$0xff]  ;;  %v4415_v63 = vld [vmem:[#allocation7 + $0x8] ss:$0 sm:$0xff] }
 0x157   : > { %v901_v36 = vmax.f32 %v705_v7, 0.0  ;;  %v1307_v29 = vmul.f32 %v4343_v25, %v954_v48  ;;  %v4402_v20 = vmin.f32 %v935_v21, 6.0  ;;  %v936_v31 = vmax.f32 %v844_v27, 0.0 }
 0x158   : > { %v707_v39 = vpop.f32.mrf.mxu0  ;;  %v851_v38 = vpop.f32.mrf.mxu1  ;;  %v937_v24 = vmax.f32 %v849_v32, 0.0  ;;  %v2120_v3 = vadd.f32 %v2072_v41, %v2019_v10 }
 0x159   : > { %5885 = vst [vmem:[#allocation48_spill] sm:$0xff] %v4402_v20  ;;  %v955_v35 = vmin.f32 %v901_v36, 6.0  ;;  %v708_v44 = vadd.f32 %v4264_v53, %v707_v39  ;;  %v4406_v13 = vadd.f32 %v4264_v53, %v851_v38  ;;  %v4409_v7 = vmul.f32 %v4333_v16, %v1307_v29 }
 0x15a   : > { %v1625_v42 = vmul.f32 %v4354_v55, %v1307_v29  ;;  %v2073_v48 = vmul.f32 %v4363_v12, %v1307_v29  ;;  %v3419_v2 = vpop.f32.mrf.mxu0  ;;  %v3491_v36 = vpop.f32.mrf.mxu1  ;;  %v4418_v39 = vmul.f32 %v4339_v22, %v1307_v29  ;;  %v4425_v37 = vmin.f32 %v936_v31, 6.0 }
 0x15b   : > { %v4421_v32 = vmul.f32 %v4337_v18, %v955_v35  ;;  %v902_v21 = vmax.f32 %v708_v44, 0.0  ;;  %v4427_v51 = vmin.f32 %v937_v24, 6.0 }
 0x15c   : > { %v1673_v28 = vadd.f32 %v1625_v42, %v1572_v14  ;;  %v2121_v30 = vadd.f32 %v2073_v48, %v2020_v17  ;;  %v712_v45 = vpop.f32.mrf.mxu0  ;;  %v4430_v10 = vpop.f32.mrf.mxu1 }
 0x15d   : > { %v4432_v29 = vmin.f32 %v902_v21, 6.0  ;;  %v713_v27 = vadd.f32 %v4264_v53, %v712_v45  ;;  %v1469_v38 = vmul.f32 %v4415_v63, %v4421_v32  ;;  %v1724_v31 = vmul.f32 %v4413_v47, %v4421_v32 }
 0x15e   : > { %v3422_v35 = vpop.f32.mrf.mxu0  ;;  %v2172_v14 = vmul.f32 %v4423_v23, %v4421_v32  ;;  %v1401_v17 = vmul.f32 %v4356_v56, %v4421_v32  ;;  %v1626_v44 = vmul.f32 %v4354_v55, %v4421_v32  ;;  %v2074_v24 = vmul.f32 %v4363_v12, %v4421_v32  ;;  %v3494_v42 = vpop.f32.mrf.mxu1 }
 0x15f   : > { %v903_v48 = vmax.f32 %v713_v27, 0.0  ;;  %v1470_v2 = vmul.f32 %v4415_v63, %v4432_v29  ;;  %v1501_v36 = vadd.f32 %v1469_v38, %v1431_v50  ;;  %v1725_v21 = vmul.f32 %v4413_v47, %v4432_v29 }
 0x160   : > { %v715_v45 = vpop.f32.mrf.mxu0  ;;  %v1772_v35 = vadd.f32 %v1724_v31, %v1671_v49  ;;  %v2173_v41 = vmul.f32 %v4423_v23, %v4432_v29  ;;  %v2220_v5 = vadd.f32 %v2172_v14, %v2119_v40  ;;  %v1402_v6 = vmul.f32 %v4356_v56, %v4432_v29  ;;  %v4455_v9 = vpop.f32.mrf.mxu1 }
 0x161   : > { %v957_v42 = vmin.f32 %v903_v48, 6.0  ;;  %v716_v27 = vadd.f32 %v4264_v53, %v715_v45  ;;  %v1502_v19 = vadd.f32 %v1470_v2, %v1432_v33  ;;  %v1773_v59 = vadd.f32 %v1725_v21, %v1672_v34 }
 0x162   : > { %v3423_v50 = vpop.f32.mrf.mxu0  ;;  %v1869_v38 = vrot.slane %v1772_v35, 1  ;;  %v2221_v62 = vadd.f32 %v2173_v41, %v2120_v3  ;;  %v2317_v54 = vrot.slane %v2220_v5, 2  ;;  %v1433_v49 = vadd.f32 %v1401_v17, %v4377_v26  ;;  %v3495_v31 = vpop.f32.mrf.mxu1 }
 0x163   : > { %v4460_v58 = vmul.f32 %v4343_v25, %v957_v42  ;;  %v904_v40 = vmax.f32 %v716_v27, 0.0  ;;  %v1870_v14 = vrot.slane %v1773_v59, 1  ;;  %v1434_v60 = vadd.f32 %v1402_v6, %v4388_v11 }
 0x164   : > { %v720_v61 = vpop.f32.mrf.mxu0  ;;  %v2318_v48 = vrot.slane %v2221_v62, 2  ;;  %v1627_v33 = vmul.f32 %v4354_v55, %v4432_v29  ;;  %v1674_v34 = vadd.f32 %v1626_v44, %v4380_v0  ;;  %v2075_v5 = vmul.f32 %v4363_v12, %v4432_v29  ;;  %v4468_v3 = vpop.f32.mrf.mxu1 }
 0x165   : > { %v1628_v26 = vmul.f32 %v4354_v55, %v4460_v58  ;;  %v2076_v59 = vmul.f32 %v4363_v12, %v4460_v58  ;;  %v958_v41 = vmin.f32 %v904_v40, 6.0  ;;  %v721_v6 = vadd.f32 %v4264_v53, %v720_v61 }
 0x166   : > { %v3426_v62 = vpop.f32.mrf.mxu0  ;;  %v1726_v11 = vmul.f32 %v4413_v47, %v4460_v58  ;;  %v1871_v0 = vsel %vm1868_vm3, %v1869_v38, %v1870_v14  ;;  %v2174_v17 = vmul.f32 %v4423_v23, %v4460_v58  ;;  %v2319_v44 = vsel %vm2316_vm4, %v2317_v54, %v2318_v48  ;;  %v3498_v2 = vpop.f32.mrf.mxu1 }
 0x167   : > { %v1676_v21 = vadd.f32 %v1628_v26, %v4409_v7  ;;  %v4483_v45 = vadd.f32 %v2076_v59, %v4418_v39  ;;  %v4486_v35 = vmul.f32 %v4337_v18, %v958_v41  ;;  %v905_v61 = vmax.f32 %v721_v6, 0.0  ;;  %v4497_v7 = vld [vmem:[%s5817_s4] ss:$0 sm:$0xff] }
 0x168   : > { %v723_v42 = vpop.f32.mrf.mxu0  ;;  %v1774_v27 = vadd.f32 %v1726_v11, %v1673_v28  ;;  %v1981_v50 = vadd.f32 %v1871_v0, %v1501_v36  ;;  %v2222_v31 = vadd.f32 %v2174_v17, %v2121_v30  ;;  %v1675_v38 = vadd.f32 %v1627_v33, %v4392_v15  ;;  %v4489_v40 = vpop.f32.mrf.mxu1 }
 0x169   : > { %v4491_v62 = vmin.f32 %v905_v61, 6.0  ;;  %v724_v54 = vadd.f32 %v4264_v53, %v723_v42  ;;  %v1471_v39 = vmul.f32 %v4415_v63, %v4486_v35  ;;  %v1727_v28 = vmul.f32 %v4413_v47, %v4486_v35 }
 0x16a   : > { %v3427_v30 = vpop.f32.mrf.mxu0  ;;  %v1872_v36 = vrot.slane %v1774_v27, 1  ;;  %v2320_v15 = vrot.slane %v2222_v31, 2  ;;  %v2429_v33 = vadd.f32 %v2319_v44, %v1981_v50  ;;  %v2122_v26 = vadd.f32 %v2074_v24, %v4385_v52  ;;  %v3499_v59 = vpop.f32.mrf.mxu1 }
 0x16b   : > { %v906_v41 = vmax.f32 %v724_v54, 0.0  ;;  %v1472_v6 = vmul.f32 %v4415_v63, %v4491_v62  ;;  %v1503_v11 = vadd.f32 %v1471_v39, %v1433_v49  ;;  %v1728_v0 = vmul.f32 %v4413_v47, %v4491_v62 }
 0x16c   : > { %v728_v17 = vpop.f32.mrf.mxu0  ;;  %v1873_v2 = vsel %vm1868_vm3, %v1870_v14, %v1872_v36  ;;  %v2321_v61 = vsel %vm2316_vm4, %v2318_v48, %v2320_v15  ;;  %v2468_v42 = vadd.f32 %v4497_v7, %v2429_v33  ;;  %v1775_v27 = vadd.f32 %v1727_v28, %v1674_v34  ;;  %v4511_v44 = vpop.f32.mrf.mxu1 }
 0x16d   : > { %v960_v52 = vmin.f32 %v906_v41, 6.0  ;;  %v729_v24 = vadd.f32 %v4264_v53, %v728_v17  ;;  %v1982_v50 = vadd.f32 %v1873_v2, %v1502_v19  ;;  %v1504_v31 = vadd.f32 %v1472_v6, %v1434_v60 }
 0x16e   : > { %v3430_v54 = vpop.f32.mrf.mxu0  ;;  %v2500_v49 = vmax.f32 %v2468_v42, 0.0  ;;  %v1776_v39 = vadd.f32 %v1728_v0, %v1675_v38  ;;  %v1874_v30 = vrot.slane %v1775_v27, 1  ;;  %v2123_v59 = vadd.f32 %v2075_v5, %v4395_v1  ;;  %v3502_v20 = vpop.f32.mrf.mxu1 }
 0x16f   : > { %v4516_v14 = vmul.f32 %v4343_v25, %v960_v52  ;;  %v907_v48 = vmax.f32 %v729_v24, 0.0  ;;  %v2430_v36 = vadd.f32 %v2321_v61, %v1982_v50  ;;  %v2175_v34 = vmul.f32 %v4423_v23, %v4486_v35 }
 0x170   : > { %v731_v28 = vpop.f32.mrf.mxu0  ;;  %v2532_v15 = vmin.f32 %v2500_v49, 6.0  ;;  %v1875_v33 = vrot.slane %v1776_v39, 1  ;;  %v2176_v60 = vmul.f32 %v4423_v23, %v4491_v62  ;;  %v4524_v19 = vmul.f32 %v4343_v25, %v4425_v37  ;;  %v4526_v1 = vpop.f32.mrf.mxu1 }
 0x171   : > { %v1729_v20 = vmul.f32 %v4413_v47, %v4516_v14  ;;  %v2177_v5 = vmul.f32 %v4423_v23, %v4516_v14  ;;  %v961_v38 = vmin.f32 %v907_v48, 6.0  ;;  %v732_v41 = vadd.f32 %v4264_v53, %v731_v28 }
 0x172   : > { %5886 = vst [vmem:[#allocation49_spill] sm:$0xff] %v4524_v19  ;;  %v3431_v6 = vpop.f32.mrf.mxu0  ;;  %v2469_v0 = vadd.f32 %v4497_v7, %v2430_v36  ;;  %v1876_v17 = vsel %vm1868_vm3, %v1874_v30, %v1875_v33  ;;  %v2223_v2 = vadd.f32 %v2175_v34, %v2122_v26  ;;  %v2224_v61 = vadd.f32 %v2176_v60, %v2123_v59  ;;  %v3503_v37 = vpop.f32.mrf.mxu1 }
 0x173   : > { %v1777_v42 = vadd.f32 %v1729_v20, %v1676_v21  ;;  %v4536_v27 = vmul.f32 %v4337_v18, %v961_v38  ;;  %v908_v52 = vmax.f32 %v732_v41, 0.0  ;;  %v1983_v24 = vadd.f32 %v1876_v17, %v1503_v11 }
 0x174   : > { %v736_v50 = vpop.f32.mrf.mxu0  ;;  %v2501_v54 = vmax.f32 %v2469_v0, 0.0  ;;  %v2225_v49 = vadd.f32 %v2177_v5, %v4483_v45  ;;  %v2322_v39 = vrot.slane %v2223_v2, 2  ;;  %v2323_v48 = vrot.slane %v2224_v61, 2  ;;  %v4539_v28 = vpop.f32.mrf.mxu1 }
 0x175   : > { %v1877_v36 = vrot.slane %v1777_v42, 1  ;;  %v4541_v6 = vmin.f32 %v908_v52, 6.0  ;;  %v737_v26 = vadd.f32 %v4264_v53, %v736_v50  ;;  %v4546_v21 = vmul.f32 %v4337_v18, %v4427_v51 }
 0x176   : > { %v3434_v30 = vpop.f32.mrf.mxu0  ;;  %v2533_v59 = vmin.f32 %v2501_v54, 6.0  ;;  %v2324_v11 = vsel %vm2316_vm4, %v2322_v39, %v2323_v48  ;;  %v2325_v34 = vrot.slane %v2225_v49, 2  ;;  %v1365_v45 = vmul.f32 %v4329_v8, %v4421_v32  ;;  %v3506_v60 = vpop.f32.mrf.mxu1 }
 0x177   : > { %5887 = vst [vmem:[#allocation50_spill] sm:$0xff] %v4546_v21  ;;  %v909_v20 = vmax.f32 %v737_v26, 0.0  ;;  %v1878_v5 = vsel %vm1868_vm3, %v1875_v33, %v1877_v36  ;;  %v2431_v38 = vadd.f32 %v2324_v11, %v1983_v24  ;;  %v1366_v41 = vmul.f32 %v4329_v8, %v4432_v29 }
 0x178   : > { %v739_v0 = vpop.f32.mrf.mxu0  ;;  %v2564_v17 = vpack.c.bf16 %v2533_v59, %v2532_v15  ;;  %v1984_v51 = vadd.f32 %v1878_v5, %v1504_v31  ;;  %v2326_v2 = vsel %vm2316_vm4, %v2323_v48, %v2325_v34  ;;  %v1403_v61 = vmul.f32 %v4356_v56, %v4486_v35  ;;  %v4557_v37 = vpop.f32.mrf.mxu1 }
 0x179   : > { %v963_v42 = vmin.f32 %v909_v20, 6.0  ;;  %v740_v52 = vadd.f32 %v4264_v53, %v739_v0  ;;  %v2470_v50 = vadd.f32 %v4497_v7, %v2431_v38  ;;  %v1404_v33 = vmul.f32 %v4356_v56, %v4491_v62 }
 0x17a   : > { %3528 = vmatprep.mubr.bf16.mxu1 %v2564_v17  ;;  %v3435_v24 = vpop.f32.mrf.mxu0  ;;  %v2432_v54 = vadd.f32 %v2326_v2, %v1984_v51  ;;  %v1435_v15 = vadd.f32 %v1403_v61, %v1365_v45  ;;  %v1473_v31 = vmul.f32 %v4415_v63, %v4536_v27  ;;  %v1474_v49 = vmul.f32 %v4415_v63, %v4541_v6  ;;  %v3507_v39 = vpop.f32.mrf.mxu1 }
 0x17b   : > { %v4568_v48 = vmul.f32 %v4343_v25, %v963_v42  ;;  %v910_v36 = vmax.f32 %v740_v52, 0.0  ;;  %v2502_v26 = vmax.f32 %v2470_v50, 0.0  ;;  %v1436_v30 = vadd.f32 %v1404_v33, %v1366_v41 }
 0x17c   : > { %v744_v59 = vpop.f32.mrf.mxu0  ;;  %v2471_v11 = vadd.f32 %v4497_v7, %v2432_v54  ;;  %v1505_v34 = vadd.f32 %v1473_v31, %v1435_v15  ;;  %v1576_v45 = vmul.f32 %v4333_v16, %v4421_v32  ;;  %v1577_v60 = vmul.f32 %v4333_v16, %v4432_v29  ;;  %v4575_v20 = vpop.f32.mrf.mxu1 }
 0x17d   : > { %v964_v5 = vmin.f32 %v910_v36, 6.0  ;;  %v745_v38 = vadd.f32 %v4264_v53, %v744_v59  ;;  %v2534_v0 = vmin.f32 %v2502_v26, 6.0  ;;  %v1506_v17 = vadd.f32 %v1474_v49, %v1436_v30 }
 0x17e   : > { %v3438_v51 = vpop.f32.mrf.mxu0  ;;  %v2503_v2 = vmax.f32 %v2471_v11, 0.0  ;;  %v1578_v41 = vmul.f32 %v4333_v16, %v4460_v58  ;;  %v1629_v61 = vmul.f32 %v4354_v55, %v4486_v35  ;;  %v1630_v42 = vmul.f32 %v4354_v55, %v4491_v62  ;;  %v3510_v52 = vpop.f32.mrf.mxu1 }
 0x17f   : > { %v4585_v50 = vmul.f32 %v4337_v18, %v964_v5  ;;  %v911_v33 = vmax.f32 %v745_v38, 0.0  ;;  %v1631_v24 = vmul.f32 %v4354_v55, %v4516_v14  ;;  %v1730_v54 = vmul.f32 %v4413_v47, %v4536_v27 }
 0x180   : > { %v747_v15 = vpop.f32.mrf.mxu0  ;;  %v2535_v31 = vmin.f32 %v2503_v2, 6.0  ;;  %v1677_v49 = vadd.f32 %v1629_v61, %v1576_v45  ;;  %v1678_v39 = vadd.f32 %v1630_v42, %v1577_v60  ;;  %v1731_v36 = vmul.f32 %v4413_v47, %v4541_v6  ;;  %v4593_v26 = vpop.f32.mrf.mxu1 }
 0x181   : > { %v4595_v30 = vmin.f32 %v911_v33, 6.0  ;;  %v748_v59 = vadd.f32 %v4264_v53, %v747_v15  ;;  %v1679_v11 = vadd.f32 %v1631_v24, %v1578_v41  ;;  %v1732_v5 = vmul.f32 %v4413_v47, %v4568_v48 }
 0x182   : > { %v3439_v38 = vpop.f32.mrf.mxu0  ;;  %v2565_v51 = vpack.c.bf16 %v2535_v31, %v2534_v0  ;;  %v1778_v52 = vadd.f32 %v1730_v54, %v1677_v49  ;;  %v1779_v21 = vadd.f32 %v1731_v36, %v1678_v39  ;;  %v2024_v45 = vmul.f32 %v4339_v22, %v4421_v32  ;;  %v3511_v60 = vpop.f32.mrf.mxu1 }
 0x183   : > { %v912_v2 = vmax.f32 %v748_v59, 0.0  ;;  %v1780_v61 = vadd.f32 %v1732_v5, %v1679_v11  ;;  %v2025_v42 = vmul.f32 %v4339_v22, %v4432_v29  ;;  %v2026_v33 = vmul.f32 %v4339_v22, %v4460_v58 }
 0x184   : > { %v752_v41 = vpop.f32.mrf.mxu0  ;;  %3529 = vmatmul.mubr.bf16.vlgmr.msra.gmra.mxu1 %v2565_v51  ;;  %v1879_v24 = vrot.slane %v1778_v52, 1  ;;  %v1880_v15 = vrot.slane %v1779_v21, 1  ;;  %v2077_v0 = vmul.f32 %v4363_v12, %v4486_v35  ;;  %v2078_v54 = vmul.f32 %v4363_v12, %v4491_v62 }
 0x185   : > { %v966_v32 = vmin.f32 %v912_v2, 6.0  ;;  %v753_v31 = vadd.f32 %v4264_v53, %v752_v41  ;;  %v1882_v49 = vrot.slane %v1780_v61, 1  ;;  %v2079_v29 = vmul.f32 %v4363_v12, %v4516_v14 }
 0x186   : > { %v3442_v39 = vpop.f32.mrf.mxu0  ;;  %v1881_v58 = vsel %vm1868_vm3, %v1879_v24, %v1880_v15  ;;  %v2125_v36 = vadd.f32 %v2077_v0, %v2024_v45  ;;  %v2126_v59 = vadd.f32 %v2078_v54, %v2025_v42  ;;  %v2178_v21 = vmul.f32 %v4423_v23, %v4536_v27 }
 0x187   : > { %v4617_v11 = vmul.f32 %v4343_v25, %v966_v32  ;;  %v913_v5 = vmax.f32 %v753_v31, 0.0  ;;  %v1883_v38 = vsel %vm1868_vm3, %v1880_v15, %v1882_v49  ;;  %v1985_v51 = vadd.f32 %v1881_v58, %v1505_v34 }
 0x188   : > { %v755_v52 = vpop.f32.mrf.mxu0  ;;  %v1986_v60 = vadd.f32 %v1883_v38, %v1506_v17  ;;  %v2127_v2 = vadd.f32 %v2079_v29, %v2026_v33  ;;  %v2179_v61 = vmul.f32 %v4423_v23, %v4541_v6  ;;  %v2180_v45 = vmul.f32 %v4423_v23, %v4568_v48 }
 0x189   : > { %v967_v42 = vmin.f32 %v913_v5, 6.0  ;;  %v756_v41 = vadd.f32 %v4264_v53, %v755_v52  ;;  %v2226_v24 = vadd.f32 %v2178_v21, %v2125_v36  ;;  %v5888_v0 = vmax.f32 %v4406_v13, 0.0 }
 0x18a   : > { %v3443_v32 = vpop.f32.mrf.mxu0  ;;  %v2227_v15 = vadd.f32 %v2179_v61, %v2126_v59  ;;  %v2228_v34 = vadd.f32 %v2180_v45, %v2127_v2  ;;  %v857_v17 = vadd.f32 %v4264_v53, %v4430_v10  ;;  %v860_v33 = vadd.f32 %v4264_v53, %v4455_v9 }
 0x18b   : > { %v4627_v54 = vmin.f32 %v5888_v0, 6.0  ;;  %v4634_v31 = vmul.f32 %v4337_v18, %v967_v42  ;;  %v914_v49 = vmax.f32 %v756_v41, 0.0  ;;  %v2327_v29 = vrot.slane %v2226_v24, 2 }
 0x18c   : > { %v1367_v39 = vmul.f32 %v4329_v8, %v4486_v35  ;;  %v760_v13 = vpop.f32.mrf.mxu0  ;;  %v2328_v58 = vrot.slane %v2227_v15, 2  ;;  %v2330_v36 = vrot.slane %v2228_v34, 2  ;;  %v939_v21 = vmax.f32 %v857_v17, 0.0 }
 0x18d   : > { %5889 = vst [vmem:[#allocation51_spill] sm:$0xff] %v4627_v54  ;;  %v940_v59 = vmax.f32 %v860_v33, 0.0  ;;  %v4638_v5 = vmin.f32 %v914_v49, 6.0  ;;  %v761_v10 = vadd.f32 %v4264_v53, %v760_v13  ;;  %v1368_v9 = vmul.f32 %v4329_v8, %v4491_v62 }
 0x18e   : > { %v1405_v38 = vmul.f32 %v4356_v56, %v4536_v27  ;;  %v3446_v52 = vpop.f32.mrf.mxu0  ;;  %v2329_v2 = vsel %vm2316_vm4, %v2327_v29, %v2328_v58  ;;  %v2331_v61 = vsel %vm2316_vm4, %v2328_v58, %v2330_v36  ;;  %v993_v45 = vmin.f32 %v939_v21, 6.0 }
 0x18f   : > { %v994_v42 = vmin.f32 %v940_v59, 6.0  ;;  %v915_v41 = vmax.f32 %v761_v10, 0.0  ;;  %v2433_v24 = vadd.f32 %v2329_v2, %v1985_v51  ;;  %v2434_v0 = vadd.f32 %v2331_v61, %v1986_v60 }
 0x190   : > { %v1406_v32 = vmul.f32 %v4356_v56, %v4541_v6  ;;  %v763_v15 = vpop.f32.mrf.mxu0  ;;  %v4650_v34 = vmul.f32 %v4343_v25, %v993_v45  ;;  %v1437_v33 = vadd.f32 %v1405_v38, %v1367_v39  ;;  %v1475_v49 = vmul.f32 %v4415_v63, %v4585_v50 }
 0x191   : > { %v4653_v17 = vmul.f32 %v4337_v18, %v994_v42  ;;  %v969_v29 = vmin.f32 %v915_v41, 6.0  ;;  %v764_v13 = vadd.f32 %v4264_v53, %v763_v15  ;;  %v2472_v51 = vadd.f32 %v4497_v7, %v2433_v24 }
 0x192   : > { %5890 = vst [vmem:[#allocation52_spill] sm:$0xff] %v4650_v34  ;;  %v2473_v60 = vadd.f32 %v4497_v7, %v2434_v0  ;;  %v3447_v58 = vpop.f32.mrf.mxu0  ;;  %v1438_v36 = vadd.f32 %v1406_v32, %v1368_v9  ;;  %v1476_v21 = vmul.f32 %v4415_v63, %v4595_v30  ;;  %v1507_v59 = vadd.f32 %v1475_v49, %v1437_v33 }
 0x193   : > { %5891 = vst [vmem:[#allocation53_spill] sm:$0xff] %v4653_v17  ;;  %v1579_v10 = vmul.f32 %v4333_v16, %v4486_v35  ;;  %v4665_v39 = vmul.f32 %v4343_v25, %v969_v29  ;;  %v916_v38 = vmax.f32 %v764_v13, 0.0  ;;  %v2504_v52 = vmax.f32 %v2472_v51, 0.0 }
 0x194   : > { %v2505_v2 = vmax.f32 %v2473_v60, 0.0  ;;  %v768_v61 = vpop.f32.mrf.mxu0  ;;  %v1508_v45 = vadd.f32 %v1476_v21, %v1438_v36  ;;  %v1580_v42 = vmul.f32 %v4333_v16, %v4491_v62  ;;  %v1581_v9 = vmul.f32 %v4333_v16, %v4516_v14 }
 0x195   : > { %v1632_v41 = vmul.f32 %v4354_v55, %v4536_v27  ;;  %v970_v24 = vmin.f32 %v916_v38, 6.0  ;;  %v2536_v0 = vmin.f32 %v2504_v52, 6.0  ;;  %v769_v15 = vadd.f32 %v4264_v53, %v768_v61 }
 0x196   : > { %v2537_v32 = vmin.f32 %v2505_v2, 6.0  ;;  %v3450_v33 = vpop.f32.mrf.mxu0  ;;  %v1633_v49 = vmul.f32 %v4354_v55, %v4541_v6  ;;  %v1634_v29 = vmul.f32 %v4354_v55, %v4568_v48  ;;  %v1733_v51 = vmul.f32 %v4413_v47, %v4585_v50 }
 0x197   : > { %v1680_v13 = vadd.f32 %v1632_v41, %v1579_v10  ;;  %v4681_v60 = vmul.f32 %v4337_v18, %v970_v24  ;;  %v917_v36 = vmax.f32 %v769_v15, 0.0  ;;  %v1734_v21 = vmul.f32 %v4413_v47, %v4595_v30 }
 0x198   : > { %v2566_v58 = vpack.c.bf16 %v2537_v32, %v2536_v0  ;;  %v771_v38 = vpop.f32.mrf.mxu0  ;;  %v1681_v52 = vadd.f32 %v1633_v49, %v1580_v42  ;;  %v1682_v2 = vadd.f32 %v1634_v29, %v1581_v9  ;;  %v1735_v61 = vmul.f32 %v4413_v47, %v4617_v11 }
 0x199   : > { %v1781_v33 = vadd.f32 %v1733_v51, %v1680_v13  ;;  %v4687_v10 = vmin.f32 %v917_v36, 6.0  ;;  %v772_v41 = vadd.f32 %v4264_v53, %v771_v38  ;;  %v2027_v24 = vmul.f32 %v4339_v22, %v4486_v35 }
 0x19a   : > { %3532 = vmatprep.mubr.bf16.mxu1 %v2566_v58  ;;  %v2028_v0 = vmul.f32 %v4339_v22, %v4491_v62  ;;  %v3451_v32 = vpop.f32.mrf.mxu0  ;;  %v1782_v15 = vadd.f32 %v1734_v21, %v1681_v52  ;;  %v1783_v54 = vadd.f32 %v1735_v61, %v1682_v2  ;;  %v2029_v9 = vmul.f32 %v4339_v22, %v4516_v14 }
 0x19b   : > { %v1884_v42 = vrot.slane %v1781_v33, 1  ;;  %v918_v49 = vmax.f32 %v772_v41, 0.0  ;;  %v2080_v29 = vmul.f32 %v4363_v12, %v4536_v27  ;;  %v2081_v13 = vmul.f32 %v4363_v12, %v4541_v6 }
 0x19c   : > { %v2082_v35 = vmul.f32 %v4363_v12, %v4568_v48  ;;  %v776_v51 = vpop.f32.mrf.mxu0  ;;  %v1885_v58 = vrot.slane %v1782_v15, 1  ;;  %v1887_v62 = vrot.slane %v1783_v54, 1  ;;  %v2181_v36 = vmul.f32 %v4423_v23, %v4585_v50 }
 0x19d   : > { %v2182_v21 = vmul.f32 %v4423_v23, %v4595_v30  ;;  %v972_v14 = vmin.f32 %v918_v49, 6.0  ;;  %v777_v38 = vadd.f32 %v4264_v53, %v776_v51  ;;  %v2128_v52 = vadd.f32 %v2080_v29, %v2027_v24 }
 0x19e   : > { %v2129_v2 = vadd.f32 %v2081_v13, %v2028_v0  ;;  %v1886_v61 = vsel %vm1868_vm3, %v1884_v42, %v1885_v58  ;;  %v1888_v33 = vsel %vm1868_vm3, %v1885_v58, %v1887_v62  ;;  %v2130_v41 = vadd.f32 %v2082_v35, %v2029_v9  ;;  %v3454_v54 = vpop.f32.mrf.mxu0 }
 0x19f   : > { %v2183_v32 = vmul.f32 %v4423_v23, %v4617_v11  ;;  %v4712_v15 = vmul.f32 %v4343_v25, %v972_v14  ;;  %v919_v19 = vmax.f32 %v777_v38, 0.0  ;;  %v1987_v43 = vadd.f32 %v1886_v61, %v1507_v59 }
 0x1a0   : > { %v1988_v4 = vadd.f32 %v1888_v33, %v1508_v45  ;;  %v2229_v49 = vadd.f32 %v2181_v36, %v2128_v52  ;;  %v2230_v57 = vadd.f32 %v2182_v21, %v2129_v2  ;;  %v865_v24 = vadd.f32 %v4264_v53, %v4468_v3  ;;  %v779_v0 = vpop.f32.mrf.mxu0  ;;  %v4735_v33 = vld [vmem:[%s5815_s2] ss:$0 sm:$0xff] }
 0x1a1   : > { %v2231_v51 = vadd.f32 %v2183_v32, %v2130_v41  ;;  %v973_v42 = vmin.f32 %v919_v19, 6.0  ;;  %v780_v9 = vadd.f32 %v4264_v53, %v779_v0  ;;  %v868_v29 = vadd.f32 %v4264_v53, %v4489_v40 }
 0x1a2   : > { %v873_v13 = vadd.f32 %v4264_v53, %v4511_v44  ;;  %v2332_v35 = vrot.slane %v2229_v49, 2  ;;  %v2333_v58 = vrot.slane %v2230_v57, 2  ;;  %v941_v45 = vmax.f32 %v865_v24, 0.0  ;;  %v3455_v62 = vpop.f32.mrf.mxu0 }
 0x1a3   : > { %v2335_v59 = vrot.slane %v2231_v51, 2  ;;  %v4722_v36 = vmul.f32 %v4337_v18, %v973_v42  ;;  %v920_v21 = vmax.f32 %v780_v9, 0.0  ;;  %v942_v3 = vmax.f32 %v868_v29, 0.0 }
 0x1a4   : > { %v943_v14 = vmax.f32 %v873_v13, 0.0  ;;  %v2334_v19 = vsel %vm2316_vm4, %v2332_v35, %v2333_v58  ;;  %v4726_v52 = vmin.f32 %v941_v45, 6.0  ;;  %v784_v40 = vpop.f32.mrf.mxu0  ;;  %v1369_v53 = vmul.f32 %v4329_v8, %v4536_v27 }
 0x1a5   : > { %v2336_v38 = vsel %vm2316_vm4, %v2333_v58, %v2335_v59  ;;  %v2435_v57 = vadd.f32 %v2334_v19, %v1987_v43  ;;  %v4730_v2 = vmin.f32 %v920_v21, 6.0  ;;  %v996_v61 = vmin.f32 %v942_v3, 6.0 }
 0x1a6   : > { %v2436_v44 = vadd.f32 %v2336_v38, %v1988_v4  ;;  %v785_v41 = vadd.f32 %v4735_v33, %v784_v40  ;;  %v3458_v32 = vpop.f32.mrf.mxu0  ;;  %v997_v54 = vmin.f32 %v943_v14, 6.0  ;;  %v1370_v49 = vmul.f32 %v4329_v8, %v4541_v6 }
 0x1a7   : > { %v1407_v51 = vmul.f32 %v4356_v56, %v4585_v50  ;;  %v2474_v4 = vadd.f32 %v4497_v7, %v2435_v57  ;;  %v4745_v24 = vmul.f32 %v4343_v25, %v996_v61  ;;  %v1408_v0 = vmul.f32 %v4356_v56, %v4595_v30 }
 0x1a8   : > { %v2475_v43 = vadd.f32 %v4497_v7, %v2436_v44  ;;  %v921_v42 = vmax.f32 %v785_v41, 0.0  ;;  %v4750_v9 = vmul.f32 %v4337_v18, %v997_v54  ;;  %v787_v29 = vpop.f32.mrf.mxu0  ;;  %v1477_v8 = vmul.f32 %v4415_v63, %v4634_v31 }
 0x1a9   : > { %v1439_v13 = vadd.f32 %v1407_v51, %v1369_v53  ;;  %v2506_v35 = vmax.f32 %v2474_v4, 0.0  ;;  %v788_v59 = vadd.f32 %v4735_v33, %v787_v29  ;;  %v1440_v45 = vadd.f32 %v1408_v0, %v1370_v49 }
 0x1aa   : > { %5892 = vst [vmem:[#allocation54_spill] sm:$0xff] %v4750_v9  ;;  %v2507_v58 = vmax.f32 %v2475_v43, 0.0  ;;  %v975_v62 = vmin.f32 %v921_v42, 6.0  ;;  %v1478_v21 = vmul.f32 %v4415_v63, %v4638_v5  ;;  %v1582_v56 = vmul.f32 %v4333_v16, %v4536_v27  ;;  %v3459_v14 = vpop.f32.mrf.mxu0 }
 0x1ab   : > { %v1509_v3 = vadd.f32 %v1477_v8, %v1439_v13  ;;  %v2538_v19 = vmin.f32 %v2506_v35, 6.0  ;;  %v922_v40 = vmax.f32 %v788_v59, 0.0  ;;  %v1583_v53 = vmul.f32 %v4333_v16, %v4541_v6 }
 0x1ac   : > { %v2539_v38 = vmin.f32 %v2507_v58, 6.0  ;;  %v4762_v57 = vmul.f32 %v4343_v25, %v975_v62  ;;  %v1510_v44 = vadd.f32 %v1478_v21, %v1440_v45  ;;  %v1584_v61 = vmul.f32 %v4333_v16, %v4568_v48  ;;  %v792_v32 = vpop.f32.mrf.mxu0 }
 0x1ad   : > { %v1635_v41 = vmul.f32 %v4354_v55, %v4585_v50  ;;  %v976_v49 = vmin.f32 %v922_v40, 6.0  ;;  %v1636_v51 = vmul.f32 %v4354_v55, %v4595_v30  ;;  %v1637_v4 = vmul.f32 %v4354_v55, %v4617_v11 }
 0x1ae   : > { %v2567_v54 = vpack.c.bf16 %v2539_v38, %v2538_v19  ;;  %v1736_v0 = vmul.f32 %v4413_v47, %v4634_v31  ;;  %v1737_v42 = vmul.f32 %v4413_v47, %v4638_v5  ;;  %v1738_v16 = vmul.f32 %v4413_v47, %v4665_v39  ;;  %v3462_v29 = vpop.f32.mrf.mxu0 }
 0x1af   : > { %v1683_v43 = vadd.f32 %v1635_v41, %v1582_v56  ;;  %v4779_v13 = vmul.f32 %v4337_v18, %v976_v49  ;;  %v1684_v8 = vadd.f32 %v1636_v51, %v1583_v53  ;;  %v1685_v35 = vadd.f32 %v1637_v4, %v1584_v61 }
 0x1b0   : > { %3533 = vmatmul.mubr.bf16.gmra.mxu1 %v2567_v54  ;;  %v2030_v58 = vmul.f32 %v4339_v22, %v4536_v27  ;;  %v2031_v45 = vmul.f32 %v4339_v22, %v4541_v6  ;;  %v2032_v62 = vmul.f32 %v4339_v22, %v4568_v48  ;;  %v2083_v21 = vmul.f32 %v4363_v12, %v4585_v50  ;;  %v795_v56 = vpop.f32.mrf.mxu0 }
 0x1b1   : > { %v1784_v59 = vadd.f32 %v1736_v0, %v1683_v43  ;;  %v1785_v14 = vadd.f32 %v1737_v42, %v1684_v8  ;;  %v1786_v19 = vadd.f32 %v1738_v16, %v1685_v35  ;;  %v2084_v38 = vmul.f32 %v4363_v12, %v4595_v30 }
 0x1b2   : > { %v2085_v40 = vmul.f32 %v4363_v12, %v4617_v11  ;;  %v2131_v53 = vadd.f32 %v2083_v21, %v2030_v58  ;;  %v2184_v6 = vmul.f32 %v4423_v23, %v4634_v31  ;;  %v2185_v22 = vmul.f32 %v4423_v23, %v4638_v5  ;;  %v3463_v48 = vpop.f32.mrf.mxu0 }
 0x1b3   : > { %v1889_v27 = vrot.slane %v1784_v59, 1  ;;  %v1890_v61 = vrot.slane %v1785_v14, 1  ;;  %v1892_v41 = vrot.slane %v1786_v19, 1  ;;  %v2132_v54 = vadd.f32 %v2084_v38, %v2031_v45  ;;  %v4808_v38 = vld [vmem:[#allocation7 + $0x1] ss:$0 sm:$0xff] }
 0x1b4   : > { %v2133_v49 = vadd.f32 %v2085_v40, %v2032_v62  ;;  %v2186_v51 = vmul.f32 %v4423_v23, %v4665_v39  ;;  %v2232_v4 = vadd.f32 %v2184_v6, %v2131_v53  ;;  %v876_v12 = vadd.f32 %v4735_v33, %v4526_v1  ;;  %v4802_v0 = vpop.f32.mrf.mxu0  ;;  %v4814_v53 = vld [vmem:[#allocation7 + $0x2] ss:$0 sm:$0xff] }
 0x1b5   : > { %v793_v43 = vadd.f32 %v4735_v33, %v792_v32  ;;  %v1891_v42 = vsel %vm1868_vm3, %v1889_v27, %v1890_v61  ;;  %v1893_v16 = vsel %vm1868_vm3, %v1890_v61, %v1892_v41  ;;  %v2233_v29 = vadd.f32 %v2185_v22, %v2132_v54 }
 0x1b6   : > { %v881_v8 = vadd.f32 %v4735_v33, %v4539_v28  ;;  %v1989_v35 = vadd.f32 %v1891_v42, %v1509_v3  ;;  %v1990_v58 = vadd.f32 %v1893_v16, %v1510_v44  ;;  %v2234_v59 = vadd.f32 %v2186_v51, %v2133_v49  ;;  %v3466_v62 = vpop.f32.mrf.mxu0  ;;  %v4826_v49 = vld [vmem:[#allocation7 + $0x6] ss:$0 sm:$0xff] }
 0x1b7   : > { %v2337_v45 = vrot.slane %v2232_v4, 2  ;;  %v2338_v21 = vrot.slane %v2233_v29, 2  ;;  %v944_v14 = vmax.f32 %v876_v12, 0.0  ;;  %v923_v1 = vmax.f32 %v793_v43, 0.0 }
 0x1b8   : > { %v945_v19 = vmax.f32 %v881_v8, 0.0  ;;  %v2340_v32 = vrot.slane %v2234_v59, 2  ;;  %v1614_v40 = vmul.f32 %v4808_v38, %v4650_v34  ;;  %v1667_v27 = vmul.f32 %v4354_v55, %v4745_v24  ;;  %v4818_v3 = vpop.f32.mrf.mxu0  ;;  %v4837_v8 = vld [vmem:[#allocation7] ss:$0 sm:$0xff]  ;;  %v4841_v59 = vld [vmem:[#allocation7 + $0x4] ss:$0 sm:$0xff] }
 0x1b9   : > { %v2062_v28 = vmul.f32 %v4814_v53, %v4650_v34  ;;  %v2339_v44 = vsel %vm2316_vm4, %v2337_v45, %v2338_v21  ;;  %v4821_v6 = vmin.f32 %v944_v14, 6.0  ;;  %v4823_v22 = vmin.f32 %v923_v1, 6.0 }
 0x1ba   : > { %v999_v48 = vmin.f32 %v945_v19, 6.0  ;;  %v2341_v61 = vsel %vm2316_vm4, %v2338_v21, %v2340_v32  ;;  %v2437_v41 = vadd.f32 %v2339_v44, %v1989_v35  ;;  %v1715_v54 = vadd.f32 %v1667_v27, %v1614_v40  ;;  %v3467_v51 = vpop.f32.mrf.mxu0 }
 0x1bb   : > { %v2115_v55 = vmul.f32 %v4826_v49, %v4745_v24  ;;  %v2438_v4 = vadd.f32 %v2341_v61, %v1990_v58  ;;  %v796_v43 = vadd.f32 %v4735_v33, %v795_v56  ;;  %v884_v42 = vadd.f32 %v4735_v33, %v4557_v37 }
 0x1bc   : > { %v4831_v12 = vmul.f32 %v4343_v25, %v999_v48  ;;  %v2476_v16 = vadd.f32 %v4497_v7, %v2437_v41  ;;  %v1391_v35 = vmul.f32 %v4837_v8, %v4653_v17  ;;  %v1429_v58 = vmul.f32 %v4841_v59, %v4750_v9  ;;  %v4845_v45 = vpop.f32.mrf.mxu0 }
 0x1bd   : > { %v2163_v29 = vadd.f32 %v2115_v55, %v2062_v28  ;;  %v2477_v56 = vadd.f32 %v4497_v7, %v2438_v4  ;;  %v924_v21 = vmax.f32 %v796_v43, 0.0  ;;  %v946_v1 = vmax.f32 %v884_v42, 0.0  ;;  %v4858_v55 = vld [vmem:[#allocation7 + $0x5] ss:$0 sm:$0xff] }
 0x1be   : > { %v1768_v37 = vmul.f32 %v4413_v47, %v4831_v12  ;;  %v2216_v62 = vmul.f32 %v4423_v23, %v4831_v12  ;;  %v2508_v14 = vmax.f32 %v2476_v16, 0.0  ;;  %v1461_v19 = vadd.f32 %v1429_v58, %v1391_v35  ;;  %v3470_v40 = vpop.f32.mrf.mxu0 }
 0x1bf   : > { %v1615_v32 = vmul.f32 %v4808_v38, %v4653_v17  ;;  %v2509_v27 = vmax.f32 %v2477_v56, 0.0  ;;  %v978_v48 = vmin.f32 %v924_v21, 6.0  ;;  %v1000_v41 = vmin.f32 %v946_v1, 6.0 }
 0x1c0   : > { %v4854_v28 = vadd.f32 %v1768_v37, %v1715_v54  ;;  %v4856_v44 = vadd.f32 %v2216_v62, %v2163_v29  ;;  %v2540_v61 = vmin.f32 %v2508_v14, 6.0  ;;  %v1668_v51 = vmul.f32 %v4858_v55, %v4750_v9  ;;  %v4864_v43 = vpop.f32.mrf.mxu0 }
 0x1c1   : > { %v2063_v4 = vmul.f32 %v4814_v53, %v4653_v17  ;;  %v2541_v42 = vmin.f32 %v2509_v27, 6.0  ;;  %v4869_v29 = vmul.f32 %v4343_v25, %v978_v48  ;;  %v1353_v35 = vmul.f32 0.0, %v1000_v41 }
 0x1c2   : > { %5893 = vst [vmem:[#allocation55_spill] sm:$0xff] %v4854_v28  ;;  %5894 = vst [vmem:[#allocation56_spill] sm:$0xff] %v4856_v44  ;;  %v1716_v58 = vadd.f32 %v1668_v51, %v1615_v32  ;;  %v2116_v56 = vmul.f32 %v4826_v49, %v4750_v9  ;;  %v801_v37 = vadd.f32 %v4735_v33, %v4802_v0  ;;  %v3471_v62 = vpop.f32.mrf.mxu0 }
 0x1c3   : > { %v2568_v21 = vpack.c.bf16 %v2541_v42, %v2540_v61  ;;  %v1371_v14 = vmul.f32 %v4837_v8, %v4585_v50  ;;  %v1372_v1 = vmul.f32 %v4837_v8, %v4595_v30  ;;  %v1409_v40 = vmul.f32 %v4841_v59, %v4634_v31  ;;  %v4888_v62 = vld [vmem:[#allocation7 + $0x8] ss:$0 sm:$0xff] }
 0x1c4   : > { %v1499_v27 = vmul.f32 %v4415_v63, %v1353_v35  ;;  %v1769_v32 = vmul.f32 %v4413_v47, %v1353_v35  ;;  %v2164_v48 = vadd.f32 %v2116_v56, %v2063_v4  ;;  %v2217_v41 = vmul.f32 %v4423_v23, %v1353_v35  ;;  %v4884_v51 = vpop.f32.mrf.mxu0 }
 0x1c5   : > { %3536 = vmatprep.mubr.bf16.mxu1 %v2568_v21  ;;  %v925_v0 = vmax.f32 %v801_v37, 0.0  ;;  %v1410_v61 = vmul.f32 %v4841_v59, %v4638_v5  ;;  %v1441_v42 = vadd.f32 %v1409_v40, %v1371_v14  ;;  %v1479_v54 = vmul.f32 %v4888_v62, %v4681_v60 }
 0x1c6   : > { %v4892_v16 = vadd.f32 %v1499_v27, %v1461_v19  ;;  %v4894_v63 = vadd.f32 %v1769_v32, %v1716_v58  ;;  %v4896_v47 = vadd.f32 %v2217_v41, %v2164_v48  ;;  %v1480_v23 = vmul.f32 %v4888_v62, %v4687_v10  ;;  %v3474_v4 = vpop.f32.mrf.mxu0 }
 0x1c7   : > { %v979_v35 = vmin.f32 %v925_v0, 6.0  ;;  %v1442_v56 = vadd.f32 %v1410_v61, %v1372_v1  ;;  %v1511_v37 = vadd.f32 %v1479_v54, %v1441_v42  ;;  %v1585_v21 = vmul.f32 %v4808_v38, %v4585_v50  ;;  %v4919_v0 = vld [vmem:[#allocation7 + $0x9] ss:$0 sm:$0xff] }
 0x1c8   : > { %5895 = vst [vmem:[#allocation57_spill] sm:$0xff] %v4892_v16  ;;  %5896 = vst [vmem:[#allocation58_spill] sm:$0xff] %v4894_v63  ;;  %v1586_v19 = vmul.f32 %v4808_v38, %v4595_v30  ;;  %v1587_v58 = vmul.f32 %v4808_v38, %v4617_v11  ;;  %v4908_v27 = vpop.f32.mrf.mxu0  ;;  %v1638_v54 = vmul.f32 %v4858_v55, %v4634_v31 }
 0x1c9   : > { %5897 = vst [vmem:[#allocation59_spill] sm:$0xff] %v4896_v47  ;;  %v4911_v32 = vmul.f32 %v4337_v18, %v979_v35  ;;  %v1512_v1 = vadd.f32 %v1480_v23, %v1442_v56  ;;  %v1639_v48 = vmul.f32 %v4858_v55, %v4638_v5  ;;  %v1640_v41 = vmul.f32 %v4858_v55, %v4665_v39 }
 0x1ca   : > { %v1739_v61 = vmul.f32 %v4919_v0, %v4681_v60  ;;  %v1740_v42 = vmul.f32 %v4919_v0, %v4687_v10  ;;  %v1741_v23 = vmul.f32 %v4919_v0, %v4712_v15  ;;  %v3475_v4 = vpop.f32.mrf.mxu0  ;;  %v1686_v35 = vadd.f32 %v1638_v54, %v1585_v21 }
 0x1cb   : > { %v1687_v56 = vadd.f32 %v1639_v48, %v1586_v19  ;;  %v2033_v40 = vmul.f32 %v4814_v53, %v4585_v50  ;;  %v2034_v14 = vmul.f32 %v4814_v53, %v4595_v30  ;;  %v1688_v44 = vadd.f32 %v1640_v41, %v1587_v58  ;;  %v4939_v19 = vld [vmem:[#allocation7 + $0xa] ss:$0 sm:$0xff] }
 0x1cc   : > { %v2035_v47 = vmul.f32 %v4814_v53, %v4617_v11  ;;  %v2086_v28 = vmul.f32 %v4826_v49, %v4634_v31  ;;  %v2087_v16 = vmul.f32 %v4826_v49, %v4638_v5  ;;  %v1787_v63 = vadd.f32 %v1739_v61, %v1686_v35 }
 0x1cd   : > { %v1788_v4 = vadd.f32 %v1740_v42, %v1687_v56  ;;  %v2088_v21 = vmul.f32 %v4826_v49, %v4665_v39  ;;  %v2187_v50 = vmul.f32 %v4939_v19, %v4681_v60  ;;  %v1789_v30 = vadd.f32 %v1741_v23, %v1688_v44 }
 0x1ce   : > { %v2134_v58 = vadd.f32 %v2086_v28, %v2033_v40  ;;  %v2135_v54 = vadd.f32 %v2087_v16, %v2034_v14  ;;  %v2188_v11 = vmul.f32 %v4939_v19, %v4687_v10  ;;  %v1894_v48 = vrot.slane %v1787_v63, 1 }
 0x1cf   : > { %v1895_v41 = vrot.slane %v1788_v4, 1  ;;  %v2136_v9 = vadd.f32 %v2088_v21, %v2035_v47  ;;  %v2189_v61 = vmul.f32 %v4939_v19, %v4712_v15  ;;  %v1897_v42 = vrot.slane %v1789_v30, 1 }
 0x1d0   : > { %v2235_v35 = vadd.f32 %v2187_v50, %v2134_v58  ;;  %v2236_v56 = vadd.f32 %v2188_v11, %v2135_v54  ;;  %v889_v17 = vadd.f32 %v4735_v33, %v4575_v20  ;;  %v1392_v28 = vmul.f32 %v4837_v8, %v4726_v52 }
 0x1d1   : > { %v1896_v34 = vsel %vm1868_vm3, %v1894_v48, %v1895_v41  ;;  %v2237_v44 = vadd.f32 %v2189_v61, %v2136_v9  ;;  %v1430_v16 = vmul.f32 %v4841_v59, %v4821_v6  ;;  %v1898_v63 = vsel %vm1868_vm3, %v1895_v41, %v1897_v42 }
 0x1d2   : > { %v1991_v47 = vadd.f32 %v1896_v34, %v1511_v37  ;;  %v2342_v14 = vrot.slane %v2235_v35, 2  ;;  %v2343_v40 = vrot.slane %v2236_v56, 2  ;;  %v1992_v23 = vadd.f32 %v1898_v63, %v1512_v1 }
 0x1d3   : > { %v2345_v4 = vrot.slane %v2237_v44, 2  ;;  %v947_v21 = vmax.f32 %v889_v17, 0.0  ;;  %v1462_v50 = vadd.f32 %v1430_v16, %v1392_v28  ;;  %v1616_v9 = vmul.f32 %v4808_v38, %v4726_v52 }
 0x1d4   : > { %v2344_v20 = vsel %vm2316_vm4, %v2342_v14, %v2343_v40  ;;  %v1669_v30 = vmul.f32 %v4858_v55, %v4821_v6  ;;  %v2064_v58 = vmul.f32 %v4814_v53, %v4726_v52  ;;  %v2117_v1 = vmul.f32 %v4826_v49, %v4821_v6 }
 0x1d5   : > { %v2346_v54 = vsel %vm2316_vm4, %v2343_v40, %v2345_v4  ;;  %v2439_v34 = vadd.f32 %v2344_v20, %v1991_v47  ;;  %v1001_v37 = vmin.f32 %v947_v21, 6.0  ;;  %v804_v48 = vadd.f32 %v4735_v33, %v4818_v3 }
 0x1d6   : > { %v2440_v17 = vadd.f32 %v2346_v54, %v1992_v23  ;;  %v1717_v11 = vadd.f32 %v1669_v30, %v1616_v9  ;;  %v892_v41 = vadd.f32 %v4735_v33, %v4593_v26  ;;  %v2165_v35 = vadd.f32 %v2117_v1, %v2064_v58 }
 0x1d7   : > { %v2478_v61 = vadd.f32 %v4497_v7, %v2439_v34  ;;  %v1354_v42 = vmul.f32 0.0, %v1001_v37  ;;  %v1617_v56 = vmul.f32 %v4808_v38, %v4745_v24  ;;  %v926_v28 = vmax.f32 %v804_v48, 0.0 }
 0x1d8   : > { %v2479_v44 = vadd.f32 %v4497_v7, %v2440_v17  ;;  %v948_v16 = vmax.f32 %v892_v41, 0.0  ;;  %v1670_v63 = vmul.f32 %v4858_v55, %v4831_v12  ;;  %v2065_v34 = vmul.f32 %v4814_v53, %v4745_v24 }
 0x1d9   : > { %v2510_v47 = vmax.f32 %v2478_v61, 0.0  ;;  %v1500_v3 = vmul.f32 %v4888_v62, %v1354_v42  ;;  %v1770_v14 = vmul.f32 %v4919_v0, %v1354_v42  ;;  %v2218_v26 = vmul.f32 %v4939_v19, %v1354_v42 }
 0x1da   : > { %v2511_v40 = vmax.f32 %v2479_v44, 0.0  ;;  %v4978_v23 = vmin.f32 %v926_v28, 6.0  ;;  %v1002_v4 = vmin.f32 %v948_v16, 6.0  ;;  %v1718_v21 = vadd.f32 %v1670_v63, %v1617_v56 }
 0x1db   : > { %v2542_v20 = vmin.f32 %v2510_v47, 6.0  ;;  %v4980_v9 = vadd.f32 %v1500_v3, %v1462_v50  ;;  %v4982_v7 = vadd.f32 %v1770_v14, %v1717_v11  ;;  %v4984_v30 = vadd.f32 %v2218_v26, %v2165_v35 }
 0x1dc   : > { %v2543_v58 = vmin.f32 %v2511_v40, 6.0  ;;  %v1355_v54 = vmul.f32 0.0, %v1002_v4  ;;  %v2118_v37 = vmul.f32 %v4826_v49, %v4831_v12  ;;  %v809_v50 = vadd.f32 %v4735_v33, %v4845_v45 }
 0x1dd   : > { %v5850_v1 = vrot.slane %v4982_v7, 1  ;;  %v812_v11 = vadd.f32 %v4735_v33, %v4864_v43  ;;  %v1373_v12 = vmul.f32 %v4837_v8, %v4634_v31  ;;  %v1374_v44 = vmul.f32 %v4837_v8, %v4638_v5 }
 0x1de   : > { %v2569_v48 = vpack.c.bf16 %v2543_v58, %v2542_v20  ;;  %v1771_v41 = vmul.f32 %v4919_v0, %v1355_v54  ;;  %v2166_v61 = vadd.f32 %v2118_v37, %v2065_v34  ;;  %v2219_v42 = vmul.f32 %v4939_v19, %v1355_v54 }
 0x1df   : > { %v927_v35 = vmax.f32 %v809_v50, 0.0  ;;  %v928_v56 = vmax.f32 %v812_v11, 0.0  ;;  %v1411_v43 = vmul.f32 %v4841_v59, %v4681_v60  ;;  %v1412_v16 = vmul.f32 %v4841_v59, %v4687_v10 }
 0x1e0   : > { %3537 = vmatmul.mubr.bf16.gmra.mxu1 %v2569_v48  ;;  %v1819_v28 = vadd.f32 %v1771_v41, %v1718_v21  ;;  %v5002_v45 = vadd.f32 %v2219_v42, %v2166_v61  ;;  %v1481_v3 = vmul.f32 %v4888_v62, %v4722_v36  ;;  %v1482_v14 = vmul.f32 %v4888_v62, %v4730_v2 }
 0x1e1   : > { %v981_v63 = vmin.f32 %v927_v35, 6.0  ;;  %v982_v47 = vmin.f32 %v928_v56, 6.0  ;;  %v1443_v4 = vadd.f32 %v1411_v43, %v1373_v12  ;;  %v1444_v21 = vadd.f32 %v1412_v16, %v1374_v44 }
 0x1e2   : > { %v1947_v26 = vrot.slane %v1819_v28, 1  ;;  %v1588_v54 = vmul.f32 %v4808_v38, %v4634_v31  ;;  %v1589_v34 = vmul.f32 %v4808_v38, %v4638_v5  ;;  %v1590_v48 = vmul.f32 %v4808_v38, %v4665_v39 }
 0x1e3   : > { %v5014_v20 = vmul.f32 %v4343_v25, %v981_v63  ;;  %v5017_v58 = vmul.f32 %v4337_v18, %v982_v47  ;;  %v1513_v50 = vadd.f32 %v1481_v3, %v1443_v4  ;;  %v1514_v11 = vadd.f32 %v1482_v14, %v1444_v21 }
 0x1e4   : > { %v5026_v37 = vsel %vm1868_vm3, %v5850_v1, %v1947_v26  ;;  %v1641_v18 = vmul.f32 %v4858_v55, %v4681_v60  ;;  %v1642_v41 = vmul.f32 %v4858_v55, %v4687_v10  ;;  %v1643_v61 = vmul.f32 %v4858_v55, %v4712_v15 }
 0x1e5   : > { %v1742_v42 = vmul.f32 %v4919_v0, %v4722_v36  ;;  %v1743_v35 = vmul.f32 %v4919_v0, %v4730_v2  ;;  %v1744_v56 = vmul.f32 %v4919_v0, %v4762_v57  ;;  %v2036_v12 = vmul.f32 %v4814_v53, %v4634_v31 }
 0x1e6   : > { %v2037_v44 = vmul.f32 %v4814_v53, %v4638_v5  ;;  %v1689_v28 = vadd.f32 %v1641_v18, %v1588_v54  ;;  %v1690_v43 = vadd.f32 %v1642_v41, %v1589_v34  ;;  %v1691_v16 = vadd.f32 %v1643_v61, %v1590_v48 }
 0x1e7   : > { %v2038_v63 = vmul.f32 %v4814_v53, %v4665_v39  ;;  %v2089_v47 = vmul.f32 %v4826_v49, %v4681_v60  ;;  %v2090_v3 = vmul.f32 %v4826_v49, %v4687_v10  ;;  %v2091_v14 = vmul.f32 %v4826_v49, %v4712_v15 }
 0x1e8   : > { %v2190_v31 = vmul.f32 %v4939_v19, %v4722_v36  ;;  %v1790_v26 = vadd.f32 %v1742_v42, %v1689_v28  ;;  %v1791_v5 = vadd.f32 %v1743_v35, %v1690_v43  ;;  %v1792_v4 = vadd.f32 %v1744_v56, %v1691_v16 }
 0x1e9   : > { %v2191_v21 = vmul.f32 %v4939_v19, %v4730_v2  ;;  %v2137_v54 = vadd.f32 %v2089_v47, %v2036_v12  ;;  %v2138_v39 = vadd.f32 %v2090_v3, %v2037_v44  ;;  %v2139_v34 = vadd.f32 %v2091_v14, %v2038_v63 }
 0x1ea   : > { %v2192_v48 = vmul.f32 %v4939_v19, %v4762_v57  ;;  %v1899_v18 = vrot.slane %v1790_v26, 1  ;;  %v1900_v41 = vrot.slane %v1791_v5, 1  ;;  %v1902_v61 = vrot.slane %v1792_v4, 1 }
 0x1eb   : > { %v817_v40 = vadd.f32 %v4735_v33, %v4884_v51  ;;  %v2238_v17 = vadd.f32 %v2190_v31, %v2137_v54  ;;  %v2239_v1 = vadd.f32 %v2191_v21, %v2138_v39  ;;  %v820_v35 = vadd.f32 %v4735_v33, %v4908_v27  ;;  %v5087_v39 = vld [vmem:[%s5817_s4] ss:$0 sm:$0xff] }
 0x1ec   : > { %v2240_v42 = vadd.f32 %v2192_v48, %v2139_v34  ;;  %v1901_v56 = vsel %vm1868_vm3, %v1899_v18, %v1900_v41  ;;  %v1903_v12 = vsel %vm1868_vm3, %v1900_v41, %v1902_v61  ;;  %v1375_v28 = vmul.f32 %v4837_v8, %v4681_v60 }
 0x1ed   : > { %v929_v44 = vmax.f32 %v817_v40, 0.0  ;;  %v1993_v43 = vadd.f32 %v1901_v56, %v1513_v50  ;;  %v1994_v16 = vadd.f32 %v1903_v12, %v1514_v11  ;;  %v2347_v63 = vrot.slane %v2238_v17, 2 }
 0x1ee   : > { %v2348_v47 = vrot.slane %v2239_v1, 2  ;;  %v2350_v3 = vrot.slane %v2240_v42, 2  ;;  %v930_v14 = vmax.f32 %v820_v35, 0.0  ;;  %v1376_v31 = vmul.f32 %v4837_v8, %v4687_v10 }
 0x1ef   : > { %v5068_v51 = vmin.f32 %v929_v44, 6.0  ;;  %v1413_v27 = vmul.f32 %v4841_v59, %v4722_v36  ;;  %v1414_v40 = vmul.f32 %v4841_v59, %v4730_v2  ;;  %v1483_v50 = vmul.f32 %v4888_v62, %v4779_v13 }
 0x1f0   : > { %v2349_v33 = vsel %vm2316_vm4, %v2347_v63, %v2348_v47  ;;  %v2351_v1 = vsel %vm2316_vm4, %v2348_v47, %v2350_v3  ;;  %v984_v11 = vmin.f32 %v930_v14, 6.0  ;;  %v1484_v26 = vmul.f32 %v4888_v62, %v4823_v22 }
 0x1f1   : > { %v2441_v17 = vadd.f32 %v2349_v33, %v1993_v43  ;;  %v2442_v5 = vadd.f32 %v2351_v1, %v1994_v16  ;;  %v1445_v4 = vadd.f32 %v1413_v27, %v1375_v28  ;;  %v1446_v21 = vadd.f32 %v1414_v40, %v1376_v31 }
 0x1f2   : > { %v1591_v54 = vmul.f32 %v4808_v38, %v4681_v60  ;;  %v5091_v48 = vmul.f32 %v4343_v25, %v984_v11  ;;  %v1592_v18 = vmul.f32 %v4808_v38, %v4687_v10  ;;  %v1593_v41 = vmul.f32 %v4808_v38, %v4712_v15 }
 0x1f3   : > { %v2480_v34 = vadd.f32 %v5087_v39, %v2441_v17  ;;  %v2481_v61 = vadd.f32 %v5087_v39, %v2442_v5  ;;  %v1515_v42 = vadd.f32 %v1483_v50, %v1445_v4  ;;  %v1516_v35 = vadd.f32 %v1484_v26, %v1446_v21 }
 0x1f4   : > { %v1644_v56 = vmul.f32 %v4858_v55, %v4722_v36  ;;  %v1645_v44 = vmul.f32 %v4858_v55, %v4730_v2  ;;  %v1646_v25 = vmul.f32 %v4858_v55, %v4762_v57  ;;  %v1745_v28 = vmul.f32 %v4919_v0, %v4779_v13 }
 0x1f5   : > { %v2512_v12 = vmax.f32 %v2480_v34, 0.0  ;;  %v2513_v43 = vmax.f32 %v2481_v61, 0.0  ;;  %v1746_v63 = vmul.f32 %v4919_v0, %v4823_v22  ;;  %v1747_v47 = vmul.f32 %v4919_v0, %v4869_v29 }
 0x1f6   : > { %v1692_v16 = vadd.f32 %v1644_v56, %v1591_v54  ;;  %v1693_v14 = vadd.f32 %v1645_v44, %v1592_v18  ;;  %v1694_v31 = vadd.f32 %v1646_v25, %v1593_v41  ;;  %v2039_v33 = vmul.f32 %v4814_v53, %v4681_v60 }
 0x1f7   : > { %v2544_v3 = vmin.f32 %v2512_v12, 6.0  ;;  %v2545_v27 = vmin.f32 %v2513_v43, 6.0  ;;  %v2040_v50 = vmul.f32 %v4814_v53, %v4687_v10  ;;  %v2041_v1 = vmul.f32 %v4814_v53, %v4712_v15 }
 0x1f8   : > { %v1793_v40 = vadd.f32 %v1745_v28, %v1692_v16  ;;  %v1794_v17 = vadd.f32 %v1746_v63, %v1693_v14  ;;  %v1795_v11 = vadd.f32 %v1747_v47, %v1694_v31  ;;  %v2092_v26 = vmul.f32 %v4826_v49, %v4722_v36 }
 0x1f9   : > { %v2093_v5 = vmul.f32 %v4826_v49, %v4730_v2  ;;  %v2570_v4 = vpack.c.bf16 %v2545_v27, %v2544_v3  ;;  %v2094_v60 = vmul.f32 %v4826_v49, %v4762_v57  ;;  %v2193_v54 = vmul.f32 %v4939_v19, %v4779_v13 }
 0x1fa   : > { %v1904_v21 = vrot.slane %v1793_v40, 1  ;;  %v1905_v10 = vrot.slane %v1794_v17, 1  ;;  %v1907_v34 = vrot.slane %v1795_v11, 1  ;;  %v2140_v18 = vadd.f32 %v2092_v26, %v2039_v33 }
 0x1fb   : > { %v2141_v15 = vadd.f32 %v2093_v5, %v2040_v50  ;;  %3540 = vmatprep.mubr.bf16.mxu1 %v2570_v4  ;;  %v2142_v41 = vadd.f32 %v2094_v60, %v2041_v1  ;;  %v2194_v61 = vmul.f32 %v4939_v19, %v4823_v22  ;;  %v2195_v56 = vmul.f32 %v4939_v19, %v4869_v29 }
 0x1fc   : > { %v1377_v12 = vmul.f32 %v4837_v8, %v4722_v36  ;;  %v1906_v44 = vsel %vm1868_vm3, %v1904_v21, %v1905_v10  ;;  %v1908_v25 = vsel %vm1868_vm3, %v1905_v10, %v1907_v34  ;;  %v2241_v28 = vadd.f32 %v2193_v54, %v2140_v18 }
 0x1fd   : > { %v1378_v43 = vmul.f32 %v4837_v8, %v4730_v2  ;;  %v1995_v16 = vadd.f32 %v1906_v44, %v1515_v42  ;;  %v1996_v63 = vadd.f32 %v1908_v25, %v1516_v35  ;;  %v2242_v47 = vadd.f32 %v2194_v61, %v2141_v15 }
 0x1fe   : > { %v2243_v3 = vadd.f32 %v2195_v56, %v2142_v41  ;;  %v2352_v14 = vrot.slane %v2241_v28, 2  ;;  %v1415_v31 = vmul.f32 %v4841_v59, %v4779_v13  ;;  %v1416_v33 = vmul.f32 %v4841_v59, %v4823_v22 }
 0x1ff   : > { %v1485_v27 = vmul.f32 %v4888_v62, %v4911_v32  ;;  %v2353_v40 = vrot.slane %v2242_v47, 2  ;;  %v1486_v1 = vmul.f32 %v4888_v62, %v4978_v23  ;;  %v1594_v42 = vmul.f32 %v4808_v38, %v4722_v36 }
 0x200   : > { %v2355_v50 = vrot.slane %v2243_v3, 2  ;;  %v1447_v35 = vadd.f32 %v1415_v31, %v1377_v12  ;;  %v1448_v17 = vadd.f32 %v1416_v33, %v1378_v43  ;;  %v1595_v11 = vmul.f32 %v4808_v38, %v4730_v2 }
 0x201   : > { %v1596_v26 = vmul.f32 %v4808_v38, %v4762_v57  ;;  %v2354_v5 = vsel %vm2316_vm4, %v2352_v14, %v2353_v40  ;;  %v1647_v21 = vmul.f32 %v4858_v55, %v4779_v13  ;;  %v1648_v60 = vmul.f32 %v4858_v55, %v4823_v22 }
 0x202   : > { %v2356_v4 = vsel %vm2316_vm4, %v2353_v40, %v2355_v50  ;;  %v2443_v54 = vadd.f32 %v2354_v5, %v1995_v16  ;;  %v1517_v34 = vadd.f32 %v1485_v27, %v1447_v35  ;;  %v1518_v18 = vadd.f32 %v1486_v1, %v1448_v17 }
 0x203   : > { %v2444_v10 = vadd.f32 %v2356_v4, %v1996_v63  ;;  %v1649_v15 = vmul.f32 %v4858_v55, %v4869_v29  ;;  %v1695_v41 = vadd.f32 %v1647_v21, %v1594_v42  ;;  %v1696_v61 = vadd.f32 %v1648_v60, %v1595_v11 }
 0x204   : > { %v1748_v56 = vmul.f32 %v4919_v0, %v4911_v32  ;;  %v2482_v12 = vadd.f32 %v5087_v39, %v2443_v54  ;;  %v1749_v25 = vmul.f32 %v4919_v0, %v4978_v23  ;;  %v1750_v28 = vmul.f32 %v4919_v0, %v5014_v20 }
 0x205   : > { %v2483_v44 = vadd.f32 %v5087_v39, %v2444_v10  ;;  %v1697_v43 = vadd.f32 %v1649_v15, %v1596_v26  ;;  %v2042_v63 = vmul.f32 %v4814_v53, %v4722_v36  ;;  %v2043_v47 = vmul.f32 %v4814_v53, %v4730_v2 }
 0x206   : > { %v1796_v16 = vadd.f32 %v1748_v56, %v1695_v41  ;;  %v2514_v3 = vmax.f32 %v2482_v12, 0.0  ;;  %v1797_v31 = vadd.f32 %v1749_v25, %v1696_v61  ;;  %v2044_v33 = vmul.f32 %v4814_v53, %v4762_v57 }
 0x207   : > { %v2515_v14 = vmax.f32 %v2483_v44, 0.0  ;;  %v1798_v27 = vadd.f32 %v1750_v28, %v1697_v43  ;;  %v2095_v50 = vmul.f32 %v4826_v49, %v4779_v13  ;;  %v2096_v1 = vmul.f32 %v4826_v49, %v4823_v22 }
 0x208   : > { %v1909_v40 = vrot.slane %v1796_v16, 1  ;;  %v2546_v42 = vmin.f32 %v2514_v3, 6.0  ;;  %v1910_v36 = vrot.slane %v1797_v31, 1  ;;  %v2097_v2 = vmul.f32 %v4826_v49, %v4869_v29 }
 0x209   : > { %v2547_v35 = vmin.f32 %v2515_v14, 6.0  ;;  %v1912_v17 = vrot.slane %v1798_v27, 1  ;;  %v2143_v11 = vadd.f32 %v2095_v50, %v2042_v63  ;;  %v2144_v26 = vadd.f32 %v2096_v1, %v2043_v47 }
 0x20a   : > { %v2196_v57 = vmul.f32 %v4939_v19, %v4911_v32  ;;  %v1911_v4 = vsel %vm1868_vm3, %v1909_v40, %v1910_v36  ;;  %v2145_v21 = vadd.f32 %v2097_v2, %v2044_v33  ;;  %v2197_v60 = vmul.f32 %v4939_v19, %v4978_v23 }
 0x20b   : > { %v2571_v5 = vpack.c.bf16 %v2547_v35, %v2546_v42  ;;  %v1913_v54 = vsel %vm1868_vm3, %v1910_v36, %v1912_v17  ;;  %v1997_v10 = vadd.f32 %v1911_v4, %v1517_v34  ;;  %v2198_v15 = vmul.f32 %v4939_v19, %v5014_v20 }
 0x20c   : > { %v2244_v41 = vadd.f32 %v2196_v57, %v2143_v11  ;;  %v1998_v61 = vadd.f32 %v1913_v54, %v1518_v18  ;;  %v2245_v56 = vadd.f32 %v2197_v60, %v2144_v26  ;;  %v1379_v12 = vmul.f32 %v4837_v8, %v4779_v13 }
 0x20d   : > { %3541 = vmatmul.mubr.bf16.gmra.mxu1 %v2571_v5  ;;  %v1380_v44 = vmul.f32 %v4837_v8, %v4823_v22  ;;  %v2246_v25 = vadd.f32 %v2198_v15, %v2145_v21  ;;  %v1417_v43 = vmul.f32 %v4841_v59, %v4911_v32  ;;  %v1418_v34 = vmul.f32 %v4841_v59, %v4978_v23 }
 0x20e   : > { %v2357_v28 = vrot.slane %v2244_v41, 2  ;;  %v2358_v16 = vrot.slane %v2245_v56, 2  ;;  %v1487_v63 = vmul.f32 %v4888_v62, %v5017_v58  ;;  %v1488_v18 = vmul.f32 %v4888_v62, %v5068_v51 }
 0x20f   : > { %v1597_v47 = vmul.f32 %v4808_v38, %v4779_v13  ;;  %v2360_v3 = vrot.slane %v2246_v25, 2  ;;  %v1449_v14 = vadd.f32 %v1417_v43, %v1379_v12  ;;  %v1450_v31 = vadd.f32 %v1418_v34, %v1380_v44 }
 0x210   : > { %v1598_v33 = vmul.f32 %v4808_v38, %v4823_v22  ;;  %v2359_v27 = vsel %vm2316_vm4, %v2357_v28, %v2358_v16  ;;  %v1599_v40 = vmul.f32 %v4808_v38, %v4869_v29  ;;  %v1650_v50 = vmul.f32 %v4858_v55, %v4911_v32 }
 0x211   : > { %v1651_v1 = vmul.f32 %v4858_v55, %v4978_v23  ;;  %v2361_v42 = vsel %vm2316_vm4, %v2358_v16, %v2360_v3  ;;  %v2445_v35 = vadd.f32 %v2359_v27, %v1997_v10  ;;  %v1519_v36 = vadd.f32 %v1487_v63, %v1449_v14 }
 0x212   : > { %v1520_v2 = vadd.f32 %v1488_v18, %v1450_v31  ;;  %v2446_v17 = vadd.f32 %v2361_v42, %v1998_v61  ;;  %v1652_v11 = vmul.f32 %v4858_v55, %v5014_v20  ;;  %v1698_v26 = vadd.f32 %v1650_v50, %v1597_v47 }
 0x213   : > { %v1699_v57 = vadd.f32 %v1651_v1, %v1598_v33  ;;  %v2484_v5 = vadd.f32 %v5087_v39, %v2445_v35  ;;  %v1751_v4 = vmul.f32 %v4919_v0, %v5017_v58  ;;  %v1752_v21 = vmul.f32 %v4919_v0, %v5068_v51 }
 0x214   : > { %v1753_v60 = vmul.f32 %v4919_v0, %v5091_v48  ;;  %v2485_v54 = vadd.f32 %v5087_v39, %v2446_v17  ;;  %v1700_v10 = vadd.f32 %v1652_v11, %v1599_v40  ;;  %v2045_v15 = vmul.f32 %v4814_v53, %v4779_v13 }
 0x215   : > { %v2046_v41 = vmul.f32 %v4814_v53, %v4823_v22  ;;  %v2516_v61 = vmax.f32 %v2484_v5, 0.0  ;;  %v1799_v56 = vadd.f32 %v1751_v4, %v1698_v26  ;;  %v1800_v12 = vadd.f32 %v1752_v21, %v1699_v57 }
 0x216   : > { %v2047_v44 = vmul.f32 %v4814_v53, %v4869_v29  ;;  %v2517_v25 = vmax.f32 %v2485_v54, 0.0  ;;  %v1801_v28 = vadd.f32 %v1753_v60, %v1700_v10  ;;  %v2098_v43 = vmul.f32 %v4826_v49, %v4911_v32  ;;  %v5898_v54 = vld [vmem:[#allocation45_spill] sm:$0xff] }
 0x217   : > { %v2099_v34 = vmul.f32 %v4826_v49, %v4978_v23  ;;  %v2548_v16 = vmin.f32 %v2516_v61, 6.0  ;;  %v1914_v63 = vrot.slane %v1799_v56, 1  ;;  %v1915_v13 = vrot.slane %v1800_v12, 1 }
 0x218   : > { %v2100_v22 = vmul.f32 %v4826_v49, %v5014_v20  ;;  %v2549_v18 = vmin.f32 %v2517_v25, 6.0  ;;  %v1917_v47 = vrot.slane %v1801_v28, 1  ;;  %v2146_v3 = vadd.f32 %v2098_v43, %v2045_v15 }
 0x219   : > { %v2147_v14 = vadd.f32 %v2099_v34, %v2046_v41  ;;  %v1916_v29 = vsel %vm1868_vm3, %v1914_v63, %v1915_v13  ;;  %v2199_v33 = vmul.f32 %v4939_v19, %v5017_v58  ;;  %v2200_v27 = vmul.f32 %v4939_v19, %v5068_v51 }
 0x21a   : > { %v2148_v31 = vadd.f32 %v2100_v22, %v2047_v44  ;;  %v2572_v40 = vpack.c.bf16 %v2549_v18, %v2548_v16  ;;  %v1918_v50 = vsel %vm1868_vm3, %v1915_v13, %v1917_v47  ;;  %v1999_v1 = vadd.f32 %v1916_v29, %v1519_v36 }
 0x21b   : > { %v2201_v42 = vmul.f32 %v4939_v19, %v5091_v48  ;;  %v2000_v35 = vadd.f32 %v1918_v50, %v1520_v2  ;;  %v2247_v17 = vadd.f32 %v2199_v33, %v2146_v3  ;;  %v2248_v11 = vadd.f32 %v2200_v27, %v2147_v14 }
 0x21c   : > { %v1381_v26 = vmul.f32 %v4837_v8, %v4911_v32  ;;  %3544 = vmatprep.mubr.bf16.mxu1 %v2572_v40  ;;  %v1382_v5 = vmul.f32 %v4837_v8, %v4978_v23  ;;  %v1419_v4 = vmul.f32 %v4841_v59, %v5017_v58  ;;  %v1420_v36 = vmul.f32 %v4841_v59, %v5068_v51 }
 0x21d   : > { %v2249_v57 = vadd.f32 %v2201_v42, %v2148_v31  ;;  %v2362_v21 = vrot.slane %v2247_v17, 2  ;;  %v2363_v60 = vrot.slane %v2248_v11, 2  ;;  %v1489_v2 = vmul.f32 %v4888_v62, %v4350_v46  ;;  %v5899_v31 = vld [vmem:[#allocation46_spill] sm:$0xff] }
 0x21e   : > { %v1490_v10 = vmul.f32 %v4888_v62, %v5898_v54  ;;  %v1451_v41 = vadd.f32 %v1419_v4, %v1381_v26  ;;  %v1452_v61 = vadd.f32 %v1420_v36, %v1382_v5  ;;  %v1600_v56 = vmul.f32 %v4808_v38, %v4911_v32 }
 0x21f   : > { %v2365_v15 = vrot.slane %v2249_v57, 2  ;;  %v2364_v12 = vsel %vm2316_vm4, %v2362_v21, %v2363_v60  ;;  %v1601_v44 = vmul.f32 %v4808_v38, %v4978_v23  ;;  %v1602_v25 = vmul.f32 %v4808_v38, %v5014_v20 }
 0x220   : > { %v1653_v28 = vmul.f32 %v4858_v55, %v5017_v58  ;;  %v2447_v34 = vadd.f32 %v2364_v12, %v1999_v1  ;;  %v1521_v16 = vadd.f32 %v1489_v2, %v1451_v41  ;;  %v1522_v63 = vadd.f32 %v1490_v10, %v1452_v61 }
 0x221   : > { %v2366_v43 = vsel %vm2316_vm4, %v2363_v60, %v2365_v15  ;;  %v1654_v22 = vmul.f32 %v4858_v55, %v5068_v51  ;;  %v1655_v18 = vmul.f32 %v4858_v55, %v5091_v48  ;;  %v1754_v14 = vmul.f32 %v4919_v0, %v4350_v46 }
 0x222   : > { %v2448_v13 = vadd.f32 %v2366_v43, %v2000_v35  ;;  %v1701_v47 = vadd.f32 %v1653_v28, %v1600_v56  ;;  %v2486_v3 = vadd.f32 %v5087_v39, %v2447_v34  ;;  %v1755_v29 = vmul.f32 %v4919_v0, %v5898_v54 }
 0x223   : > { %v1756_v33 = vmul.f32 %v4919_v0, %v5899_v31  ;;  %v1702_v40 = vadd.f32 %v1654_v22, %v1601_v44  ;;  %v1703_v50 = vadd.f32 %v1655_v18, %v1602_v25  ;;  %v2048_v1 = vmul.f32 %v4814_v53, %v4911_v32 }
 0x224   : > { %v2487_v27 = vadd.f32 %v5087_v39, %v2448_v13  ;;  %v2518_v42 = vmax.f32 %v2486_v3, 0.0  ;;  %v1802_v35 = vadd.f32 %v1754_v14, %v1701_v47  ;;  %v2049_v17 = vmul.f32 %v4814_v53, %v4978_v23 }
 0x225   : > { %v2050_v11 = vmul.f32 %v4814_v53, %v5014_v20  ;;  %v1803_v57 = vadd.f32 %v1755_v29, %v1702_v40  ;;  %v1804_v5 = vadd.f32 %v1756_v33, %v1703_v50  ;;  %v2101_v4 = vmul.f32 %v4826_v49, %v5017_v58 }
 0x226   : > { %v2519_v26 = vmax.f32 %v2487_v27, 0.0  ;;  %v2550_v36 = vmin.f32 %v2518_v42, 6.0  ;;  %v1919_v21 = vrot.slane %v1802_v35, 1  ;;  %v2102_v60 = vmul.f32 %v4826_v49, %v5068_v51 }
 0x227   : > { %v2103_v32 = vmul.f32 %v4826_v49, %v5091_v48  ;;  %v1920_v10 = vrot.slane %v1803_v57, 1  ;;  %v1922_v23 = vrot.slane %v1804_v5, 1  ;;  %v2149_v15 = vadd.f32 %v2101_v4, %v2048_v1  ;;  %v5901_v1 = vld [vmem:[#allocation48_spill] sm:$0xff] }
 0x228   : > { %v2551_v2 = vmin.f32 %v2519_v26, 6.0  ;;  %v2150_v41 = vadd.f32 %v2102_v60, %v2049_v17  ;;  %v2202_v61 = vmul.f32 %v4939_v19, %v4350_v46  ;;  %v2203_v56 = vmul.f32 %v4939_v19, %v5898_v54 }
 0x229   : > { %v2151_v20 = vadd.f32 %v2103_v32, %v2050_v11  ;;  %v1921_v44 = vsel %vm1868_vm3, %v1919_v21, %v1920_v10  ;;  %v1923_v25 = vsel %vm1868_vm3, %v1920_v10, %v1922_v23  ;;  %v2204_v28 = vmul.f32 %v4939_v19, %v5899_v31 }
 0x22a   : > { %v2573_v12 = vpack.c.bf16 %v2551_v2, %v2550_v36  ;;  %v2001_v43 = vadd.f32 %v1921_v44, %v1521_v16  ;;  %v2002_v34 = vadd.f32 %v1923_v25, %v1522_v63  ;;  %v2250_v13 = vadd.f32 %v2202_v61, %v2149_v15  ;;  %v5900_v16 = vld [vmem:[#allocation47_spill] sm:$0xff]  ;;  %v5902_v61 = vld [vmem:[#allocation49_spill] sm:$0xff] }
 0x22b   : > { %v2251_v22 = vadd.f32 %v2203_v56, %v2150_v41  ;;  %v2252_v18 = vadd.f32 %v2204_v28, %v2151_v20  ;;  %v1383_v47 = vmul.f32 %v4837_v8, %v5017_v58  ;;  %v1384_v3 = vmul.f32 %v4837_v8, %v5068_v51  ;;  %v5328_v25 = vld [vmem:[#allocation7 + $0x2] ss:$0 sm:$0xff] }
 0x22c   : > { %3545 = vmatmul.mubr.bf16.gmra.mxu1 %v2573_v12  ;;  %v1421_v14 = vmul.f32 %v4841_v59, %v4350_v46  ;;  %v2367_v29 = vrot.slane %v2250_v13, 2  ;;  %v1422_v27 = vmul.f32 %v4841_v59, %v5898_v54  ;;  %v1491_v63 = vmul.f32 %v4888_v62, %v5900_v16 }
 0x22d   : > { %v2368_v33 = vrot.slane %v2251_v22, 2  ;;  %v2370_v40 = vrot.slane %v2252_v18, 2  ;;  %v1492_v42 = vmul.f32 %v4888_v62, %v5901_v1  ;;  %v1603_v35 = vmul.f32 %v4808_v38, %v5017_v58 }
 0x22e   : > { %v1453_v50 = vadd.f32 %v1421_v14, %v1383_v47  ;;  %v1454_v17 = vadd.f32 %v1422_v27, %v1384_v3  ;;  %v1604_v11 = vmul.f32 %v4808_v38, %v5068_v51  ;;  %v1605_v59 = vmul.f32 %v4808_v38, %v5091_v48 }
 0x22f   : > { %v2369_v8 = vsel %vm2316_vm4, %v2367_v29, %v2368_v33  ;;  %v2371_v26 = vsel %vm2316_vm4, %v2368_v33, %v2370_v40  ;;  %v1656_v4 = vmul.f32 %v4858_v55, %v4350_v46  ;;  %v1657_v60 = vmul.f32 %v4858_v55, %v5898_v54  ;;  %v5338_v33 = vld [vmem:[#allocation7 + $0x6] ss:$0 sm:$0xff] }
 0x230   : > { %v2449_v57 = vadd.f32 %v2369_v8, %v2001_v43  ;;  %v1523_v5 = vadd.f32 %v1491_v63, %v1453_v50  ;;  %v2450_v36 = vadd.f32 %v2371_v26, %v2002_v34  ;;  %v1524_v21 = vadd.f32 %v1492_v42, %v1454_v17 }
 0x231   : > { %v1658_v32 = vmul.f32 %v4858_v55, %v5899_v31  ;;  %v1704_v10 = vadd.f32 %v1656_v4, %v1603_v35  ;;  %v1757_v38 = vmul.f32 %v4919_v0, %v5900_v16  ;;  %v1758_v23 = vmul.f32 %v4919_v0, %v5901_v1 }
 0x232   : > { %v2488_v2 = vadd.f32 %v5087_v39, %v2449_v57  ;;  %v2489_v15 = vadd.f32 %v5087_v39, %v2450_v36  ;;  %v1705_v41 = vadd.f32 %v1657_v60, %v1604_v11  ;;  %v1759_v56 = vmul.f32 %v4919_v0, %v5902_v61  ;;  %v5350_v57 = vld [vmem:[#allocation7] ss:$0 sm:$0xff]  ;;  %v5356_v60 = vld [vmem:[#allocation7 + $0x4] ss:$0 sm:$0xff] }
 0x233   : > { %v1706_v20 = vadd.f32 %v1658_v32, %v1605_v59  ;;  %v1805_v44 = vadd.f32 %v1757_v38, %v1704_v10  ;;  %v2051_v55 = vmul.f32 %v4814_v53, %v5017_v58  ;;  %v2052_v28 = vmul.f32 %v5328_v25, %v5068_v51  ;;  %v5903_v10 = vld [vmem:[#allocation50_spill] sm:$0xff] }
 0x234   : > { %v2520_v12 = vmax.f32 %v2488_v2, 0.0  ;;  %v2521_v43 = vmax.f32 %v2489_v15, 0.0  ;;  %v1806_v34 = vadd.f32 %v1758_v23, %v1705_v41  ;;  %v2053_v22 = vmul.f32 %v5328_v25, %v5091_v48  ;;  %v5904_v41 = vld [vmem:[#allocation51_spill] sm:$0xff] }
 0x235   : > { %v1807_v13 = vadd.f32 %v1759_v56, %v1706_v20  ;;  %v1924_v47 = vrot.slane %v1805_v44, 1  ;;  %v2104_v3 = vmul.f32 %v4826_v49, %v4350_v46  ;;  %v2105_v14 = vmul.f32 %v4826_v49, %v5898_v54  ;;  %v5366_v56 = vld [vmem:[#allocation7 + $0x1] ss:$0 sm:$0xff] }
 0x236   : > { %v2552_v18 = vmin.f32 %v2520_v12, 6.0  ;;  %v2553_v53 = vmin.f32 %v2521_v43, 6.0  ;;  %v1925_v58 = vrot.slane %v1806_v34, 1  ;;  %v2106_v51 = vmul.f32 %v5338_v33, %v5899_v31 }
 0x237   : > { %v1927_v29 = vrot.slane %v1807_v13, 1  ;;  %v2152_v27 = vadd.f32 %v2104_v3, %v2051_v55  ;;  %v2153_v63 = vadd.f32 %v2105_v14, %v2052_v28  ;;  %v2205_v48 = vmul.f32 %v4939_v19, %v5900_v16 }
 0x238   : > { %v2206_v40 = vmul.f32 %v4939_v19, %v5901_v1  ;;  %v2574_v50 = vpack.c.bf16 %v2553_v53, %v2552_v18  ;;  %v1926_v42 = vsel %vm1868_vm3, %v1924_v47, %v1925_v58  ;;  %v2154_v35 = vadd.f32 %v2106_v51, %v2053_v22  ;;  %v5375_v22 = vld [vmem:[#allocation7 + $0x5] ss:$0 sm:$0xff] }
 0x239   : > { %v1928_v49 = vsel %vm1868_vm3, %v1925_v58, %v1927_v29  ;;  %v2003_v8 = vadd.f32 %v1926_v42, %v1523_v5  ;;  %v2207_v11 = vmul.f32 %v4939_v19, %v5902_v61  ;;  %v2253_v59 = vadd.f32 %v2205_v48, %v2152_v27 }
 0x23a   : > { %v2004_v17 = vadd.f32 %v1928_v49, %v1524_v21  ;;  %3548 = vmatprep.mubr.bf16.mxu1 %v2574_v50  ;;  %v2254_v26 = vadd.f32 %v2206_v40, %v2153_v63  ;;  %v1385_v4 = vmul.f32 %v5350_v57, %v4350_v46  ;;  %v1386_v36 = vmul.f32 %v5350_v57, %v5898_v54  ;;  %v5905_v50 = vld [vmem:[#allocation52_spill] sm:$0xff] }
 0x23b   : > { %v1423_v5 = vmul.f32 %v5356_v60, %v5900_v16  ;;  %v2255_v21 = vadd.f32 %v2207_v11, %v2154_v35  ;;  %v2372_v32 = vrot.slane %v2253_v59, 2  ;;  %v1424_v2 = vmul.f32 %v5356_v60, %v5901_v1 }
 0x23c   : > { %v1493_v38 = vmul.f32 %v4888_v62, %v5903_v10  ;;  %v2373_v23 = vrot.slane %v2254_v26, 2  ;;  %v1494_v20 = vmul.f32 %v4888_v62, %v5904_v41  ;;  %v1606_v12 = vmul.f32 %v5366_v56, %v4350_v46 }
 0x23d   : > { %v1455_v15 = vadd.f32 %v1423_v5, %v1385_v4  ;;  %v2375_v44 = vrot.slane %v2255_v21, 2  ;;  %v1456_v55 = vadd.f32 %v1424_v2, %v1386_v36  ;;  %v1607_v28 = vmul.f32 %v5366_v56, %v5898_v54 }
 0x23e   : > { %v1608_v43 = vmul.f32 %v5366_v56, %v5899_v31  ;;  %v2374_v34 = vsel %vm2316_vm4, %v2372_v32, %v2373_v23  ;;  %v1659_v62 = vmul.f32 %v5375_v22, %v5900_v16  ;;  %v1660_v18 = vmul.f32 %v5375_v22, %v5901_v1 }
 0x23f   : > { %v1525_v13 = vadd.f32 %v1493_v38, %v1455_v15  ;;  %v2376_v47 = vsel %vm2316_vm4, %v2373_v23, %v2375_v44  ;;  %v2451_v3 = vadd.f32 %v2374_v34, %v2003_v8  ;;  %v1526_v14 = vadd.f32 %v1494_v20, %v1456_v55 }
 0x240   : > { %v1661_v53 = vmul.f32 %v5375_v22, %v5902_v61  ;;  %v2452_v58 = vadd.f32 %v2376_v47, %v2004_v17  ;;  %v1707_v29 = vadd.f32 %v1659_v62, %v1606_v12  ;;  %v1708_v51 = vadd.f32 %v1660_v18, %v1607_v28 }
 0x241   : > { %v1760_v27 = vmul.f32 %v4919_v0, %v5903_v10  ;;  %v2490_v63 = vadd.f32 %v5087_v39, %v2451_v3  ;;  %v1761_v40 = vmul.f32 %v4919_v0, %v5904_v41  ;;  %v1762_v42 = vmul.f32 %v4919_v0, %v5905_v50 }
 0x242   : > { %v1709_v48 = vadd.f32 %v1661_v53, %v1608_v43  ;;  %v2491_v49 = vadd.f32 %v5087_v39, %v2452_v58  ;;  %v2054_v8 = vmul.f32 %v5328_v25, %v4350_v46  ;;  %v2055_v17 = vmul.f32 %v5328_v25, %v5898_v54 }
 0x243   : > { %v1808_v35 = vadd.f32 %v1760_v27, %v1707_v29  ;;  %v2522_v11 = vmax.f32 %v2490_v63, 0.0  ;;  %v1809_v59 = vadd.f32 %v1761_v40, %v1708_v51  ;;  %v2056_v4 = vmul.f32 %v5328_v25, %v5899_v31  ;;  %v5906_v51 = vld [vmem:[#allocation53_spill] sm:$0xff] }
 0x244   : > { %v1810_v26 = vadd.f32 %v1762_v42, %v1709_v48  ;;  %v2523_v36 = vmax.f32 %v2491_v49, 0.0  ;;  %v2107_v0 = vmul.f32 %v5338_v33, %v5900_v16  ;;  %v2108_v21 = vmul.f32 %v5338_v33, %v5901_v1 }
 0x245   : > { %v1929_v5 = vrot.slane %v1808_v35, 1  ;;  %v2554_v32 = vmin.f32 %v2522_v11, 6.0  ;;  %v1930_v2 = vrot.slane %v1809_v59, 1  ;;  %v2109_v54 = vmul.f32 %v5338_v33, %v5902_v61 }
 0x246   : > { %v1932_v46 = vrot.slane %v1810_v26, 1  ;;  %v2555_v38 = vmin.f32 %v2523_v36, 6.0  ;;  %v2155_v23 = vadd.f32 %v2107_v0, %v2054_v8  ;;  %v2156_v15 = vadd.f32 %v2108_v21, %v2055_v17 }
 0x247   : > { %v2208_v31 = vmul.f32 %v4939_v19, %v5903_v10  ;;  %v1931_v20 = vsel %vm1868_vm3, %v1929_v5, %v1930_v2  ;;  %v2157_v44 = vadd.f32 %v2109_v54, %v2056_v4  ;;  %v2209_v55 = vmul.f32 %v4939_v19, %v5904_v41 }
 0x248   : > { %v1933_v12 = vsel %vm1868_vm3, %v1930_v2, %v1932_v46  ;;  %v2575_v28 = vpack.c.bf16 %v2555_v38, %v2554_v32  ;;  %v2005_v43 = vadd.f32 %v1931_v20, %v1525_v13  ;;  %v2210_v62 = vmul.f32 %v4939_v19, %v5905_v50  ;;  %v5441_v38 = vld [vmem:[#allocation7 + $0x9] ss:$0 sm:$0xff] }
 0x249   : > { %v2006_v34 = vadd.f32 %v1933_v12, %v1526_v14  ;;  %v2256_v18 = vadd.f32 %v2208_v31, %v2155_v23  ;;  %v2257_v47 = vadd.f32 %v2209_v55, %v2156_v15  ;;  %v1387_v3 = vmul.f32 %v5350_v57, %v5900_v16  ;;  %v5420_v14 = vld [vmem:[#allocation7 + $0x8] ss:$0 sm:$0xff] }
 0x24a   : > { %v1388_v53 = vmul.f32 %v5350_v57, %v5901_v1  ;;  %3549 = vmatmul.mubr.bf16.gmra.mxu1 %v2575_v28  ;;  %v2258_v58 = vadd.f32 %v2210_v62, %v2157_v44  ;;  %v1425_v29 = vmul.f32 %v5356_v60, %v5903_v10  ;;  %v1426_v13 = vmul.f32 %v5356_v60, %v5904_v41 }
 0x24b   : > { %v1495_v19 = vmul.f32 %v5420_v14, %v5906_v51  ;;  %v2377_v27 = vrot.slane %v2256_v18, 2  ;;  %v2378_v63 = vrot.slane %v2257_v47, 2  ;;  %v1496_v48 = vmul.f32 %v5420_v14, %v4726_v52 }
 0x24c   : > { %v1609_v40 = vmul.f32 %v5366_v56, %v5900_v16  ;;  %v2380_v42 = vrot.slane %v2258_v58, 2  ;;  %v1457_v49 = vadd.f32 %v1425_v29, %v1387_v3  ;;  %v1458_v35 = vadd.f32 %v1426_v13, %v1388_v53 }
 0x24d   : > { %v1610_v8 = vmul.f32 %v5366_v56, %v5901_v1  ;;  %v2379_v17 = vsel %vm2316_vm4, %v2377_v27, %v2378_v63  ;;  %v1611_v11 = vmul.f32 %v5366_v56, %v5902_v61  ;;  %v1662_v59 = vmul.f32 %v5375_v22, %v5903_v10 }
 0x24e   : > { %v1663_v26 = vmul.f32 %v5375_v22, %v5904_v41  ;;  %v2381_v4 = vsel %vm2316_vm4, %v2378_v63, %v2380_v42  ;;  %v2453_v36 = vadd.f32 %v2379_v17, %v2005_v43  ;;  %v1527_v5 = vadd.f32 %v1495_v19, %v1457_v49 }
 0x24f   : > { %v1528_v0 = vadd.f32 %v1496_v48, %v1458_v35  ;;  %v2454_v21 = vadd.f32 %v2381_v4, %v2006_v34  ;;  %v1664_v32 = vmul.f32 %v5375_v22, %v5905_v50  ;;  %v1710_v2 = vadd.f32 %v1662_v59, %v1609_v40  ;;  %v3756_v40 = vld [vmem:[#allocation7 + $0xa] ss:$0 sm:$0xff] }
 0x250   : > { %v1711_v46 = vadd.f32 %v1663_v26, %v1610_v8  ;;  %v2492_v54 = vadd.f32 %v5087_v39, %v2453_v36  ;;  %v1763_v23 = vmul.f32 %v5441_v38, %v5906_v51  ;;  %v1764_v15 = vmul.f32 %v5441_v38, %v4726_v52 }
 0x251   : > { %v1765_v31 = vmul.f32 %v5441_v38, %v4745_v24  ;;  %v2493_v20 = vadd.f32 %v5087_v39, %v2454_v21  ;;  %v1712_v12 = vadd.f32 %v1664_v32, %v1611_v11  ;;  %v2057_v44 = vmul.f32 %v5328_v25, %v5900_v16 }
 0x252   : > { %v2058_v55 = vmul.f32 %v5328_v25, %v5901_v1  ;;  %v2524_v28 = vmax.f32 %v2492_v54, 0.0  ;;  %v1811_v43 = vadd.f32 %v1763_v23, %v1710_v2  ;;  %v1812_v34 = vadd.f32 %v1764_v15, %v1711_v46 }
 0x253   : > { %v2059_v62 = vmul.f32 %v5328_v25, %v5902_v61  ;;  %v2525_v18 = vmax.f32 %v2493_v20, 0.0  ;;  %v1813_v47 = vadd.f32 %v1765_v31, %v1712_v12  ;;  %v2110_v3 = vmul.f32 %v5338_v33, %v5903_v10 }
 0x254   : > { %v2111_v53 = vmul.f32 %v5338_v33, %v5904_v41  ;;  %v2556_v58 = vmin.f32 %v2524_v28, 6.0  ;;  %v1934_v29 = vrot.slane %v1811_v43, 1  ;;  %v1935_v16 = vrot.slane %v1812_v34, 1 }
 0x255   : > { %v2112_v1 = vmul.f32 %v5338_v33, %v5905_v50  ;;  %v2557_v13 = vmin.f32 %v2525_v18, 6.0  ;;  %v1937_v19 = vrot.slane %v1813_v47, 1  ;;  %v2158_v27 = vadd.f32 %v2110_v3, %v2057_v44 }
 0x256   : > { %v2159_v63 = vadd.f32 %v2111_v53, %v2058_v55  ;;  %v1936_v61 = vsel %vm1868_vm3, %v1934_v29, %v1935_v16  ;;  %v2211_v42 = vmul.f32 %v3756_v40, %v5906_v51  ;;  %v2212_v49 = vmul.f32 %v3756_v40, %v4726_v52  ;;  %v3530_v55 = vpop.f32.mrf.mxu1 }
 0x257   : > { %v2160_v48 = vadd.f32 %v2112_v1, %v2059_v62  ;;  %v2576_v35 = vpack.c.bf16 %v2557_v13, %v2556_v58  ;;  %v1938_v8 = vsel %vm1868_vm3, %v1935_v16, %v1937_v19  ;;  %v2007_v17 = vadd.f32 %v1936_v61, %v1527_v5 }
 0x258   : > { %v2213_v11 = vmul.f32 %v3756_v40, %v4745_v24  ;;  %v2008_v59 = vadd.f32 %v1938_v8, %v1528_v0  ;;  %v2259_v50 = vadd.f32 %v2211_v42, %v2158_v27  ;;  %v2260_v26 = vadd.f32 %v2212_v49, %v2159_v63  ;;  %v5907_v24 = vld [vmem:[#allocation54_spill] sm:$0xff]  ;;  %v2685_v19 = vpop.f32.mrf.mxu1 }
 0x259   : > { %v1389_v4 = vmul.f32 %v5350_v57, %v5903_v10  ;;  %3552 = vmatprep.mubr.bf16.mxu1 %v2576_v35  ;;  %v1390_v21 = vmul.f32 %v5350_v57, %v5904_v41  ;;  %v1427_v32 = vmul.f32 %v5356_v60, %v5906_v51  ;;  %v1428_v2 = vmul.f32 %v5356_v60, %v4726_v52  ;;  %v5909_v8 = vld [vmem:[#allocation58_spill] sm:$0xff] }
 0x25a   : > { %v2261_v36 = vadd.f32 %v2213_v11, %v2160_v48  ;;  %v2382_v5 = vrot.slane %v2259_v50, 2  ;;  %v2383_v46 = vrot.slane %v2260_v26, 2  ;;  %v1497_v0 = vmul.f32 %v5420_v14, %v5907_v24  ;;  %v5911_v50 = vld [vmem:[#allocation57_spill] sm:$0xff]  ;;  %v3531_v26 = vpop.f32.mrf.mxu1 }
 0x25b   : > { %v1498_v54 = vmul.f32 %v5420_v14, %v4821_v6  ;;  %v1459_v15 = vadd.f32 %v1427_v32, %v1389_v4  ;;  %v1460_v31 = vadd.f32 %v1428_v2, %v1390_v21  ;;  %v1612_v57 = vmul.f32 %v5366_v56, %v5903_v10  ;;  %v5912_v4 = vld [vmem:[#allocation55_spill] sm:$0xff] }
 0x25c   : > { %v2385_v23 = vrot.slane %v2261_v36, 2  ;;  %v2384_v20 = vsel %vm2316_vm4, %v2382_v5, %v2383_v46  ;;  %v1613_v12 = vmul.f32 %v5366_v56, %v5904_v41  ;;  %v1665_v60 = vmul.f32 %v5375_v22, %v5906_v51 }
 0x25d   : > { %v1666_v44 = vmul.f32 %v5375_v22, %v4726_v52  ;;  %v2455_v28 = vadd.f32 %v2384_v20, %v2007_v17  ;;  %v1529_v43 = vadd.f32 %v1497_v0, %v1459_v15  ;;  %v1530_v34 = vadd.f32 %v1498_v54, %v1460_v31 }
 0x25e   : > { %v2386_v14 = vsel %vm2316_vm4, %v2383_v46, %v2385_v23  ;;  %v1713_v18 = vadd.f32 %v1665_v60, %v1612_v57  ;;  %v1766_v3 = vmul.f32 %v5441_v38, %v5907_v24  ;;  %v1767_v53 = vmul.f32 %v5441_v38, %v4821_v6  ;;  %v5919_v60 = vld [vmem:[#allocation28_spill] sm:$0xff] }
 0x25f   : > { %v2456_v62 = vadd.f32 %v2386_v14, %v2008_v59  ;;  %v1714_v47 = vadd.f32 %v1666_v44, %v1613_v12  ;;  %v2494_v56 = vadd.f32 %v5087_v39, %v2455_v28  ;;  %v2060_v22 = vmul.f32 %v5328_v25, %v5903_v10  ;;  %v5920_v44 = vld [vmem:[#allocation27_spill] sm:$0xff]  ;;  %v5921_v28 = vld [vmem:[#allocation25_spill] sm:$0xff] }
 0x260   : > { %v2061_v58 = vmul.f32 %v5328_v25, %v5904_v41  ;;  %v1814_v16 = vadd.f32 %v1766_v3, %v1713_v18  ;;  %v2113_v1 = vmul.f32 %v5338_v33, %v5906_v51  ;;  %v2114_v13 = vmul.f32 %v5338_v33, %v4726_v52 }
 0x261   : > { %v2495_v29 = vadd.f32 %v5087_v39, %v2456_v62  ;;  %v2526_v27 = vmax.f32 %v2494_v56, 0.0  ;;  %v1815_v63 = vadd.f32 %v1767_v53, %v1714_v47  ;;  %v2214_v38 = vmul.f32 %v3756_v40, %v5907_v24  ;;  %v5923_v47 = vld [vmem:[#allocation56_spill] sm:$0xff] }
 0x262   : > { %v2215_v61 = vmul.f32 %v3756_v40, %v4821_v6  ;;  %v1939_v48 = vrot.slane %v1814_v16, 1  ;;  %v2161_v42 = vadd.f32 %v2113_v1, %v2060_v22  ;;  %v2162_v25 = vadd.f32 %v2114_v13, %v2061_v58  ;;  %v5516_v40 = vld [vmem:[%s5819_s6] ss:$0 sm:$0xff] }
 0x263   : > { %v2527_v10 = vmax.f32 %v2495_v29, 0.0  ;;  %v2558_v41 = vmin.f32 %v2526_v27, 6.0  ;;  %v1940_v49 = vrot.slane %v1815_v63, 1  ;;  %v5908_v35 = vrot.slane %v4982_v7, 1 }
 0x264   : > { %v5910_v51 = vrot.slane %v5909_v8, 1  ;;  %v2012_v52 = vadd.f32 %v5026_v37, %v4980_v9  ;;  %v2262_v11 = vadd.f32 %v2214_v38, %v2161_v42  ;;  %v2263_v59 = vadd.f32 %v2215_v61, %v2162_v25  ;;  %v5915_v9 = vld [vmem:[#allocation59_spill] sm:$0xff]  ;;  %v5928_v8 = vld [vmem:[#allocation33_spill] sm:$0xff] }
 0x265   : > { %v2559_v33 = vmin.f32 %v2527_v10, 6.0  ;;  %v1941_v7 = vsel %vm1868_vm3, %v1939_v48, %v1940_v49  ;;  %v5913_v36 = vrot.slane %v5912_v4, 1  ;;  %v5914_v32 = vrot.slane %v4984_v30, 2  ;;  %v5922_v30 = vld [vmem:[#allocation24_spill] sm:$0xff]  ;;  %v5926_v48 = vld [vmem:[#allocation26_spill] sm:$0xff] }
 0x266   : > { %v1946_v17 = vsel %vm1868_vm3, %v5910_v51, %v5908_v35  ;;  %v5916_v37 = vrot.slane %v5915_v9, 2  ;;  %v5917_v5 = vrot.slane %v5002_v45, 2  ;;  %v2009_v54 = vadd.f32 %v1941_v7, %v1529_v43  ;;  %v5927_v35 = vld [vmem:[#allocation34_spill] sm:$0xff] }
 0x267   : > { %v2011_v6 = vadd.f32 %v1946_v17, %v5911_v50  ;;  %v1943_v21 = vsel %vm1868_vm3, %v1940_v49, %v5913_v36  ;;  %v5918_v46 = vmov %v5914_v32  ;;  %v2577_v0 = vpack.c.bf16 %v2559_v33, %v2558_v41  ;;  %v5931_v50 = vld [vmem:[#allocation35_spill] sm:$0xff] }
 0x268   : > { %v2394_v2 = vsel %vm2316_vm4, %v5916_v37, %v5914_v32  ;;  %v2396_v24 = vsel %vm2316_vm4, %v5918_v46, %v5917_v5  ;;  %v2010_v23 = vadd.f32 %v1943_v21, %v1530_v34  ;;  %v2387_v15 = vrot.slane %v2262_v11, 2  ;;  %v2688_v34 = vpop.f32.mrf.mxu1  ;;  %v5930_v11 = vld [vmem:[#allocation30_spill] sm:$0xff]  ;;  %v5934_v36 = vld [vmem:[#allocation23_spill] sm:$0xff] }
 0x269   : > { %v2388_v31 = vrot.slane %v2263_v59, 2  ;;  %v2459_v57 = vadd.f32 %v2394_v2, %v2011_v6  ;;  %v2460_v20 = vadd.f32 %v2396_v24, %v2012_v52  ;;  %v2694_v12 = vadd.f32 %v3530_v55, %v5516_v40  ;;  %3553 = vmatmul.mubr.bf16.gmra.mxu1 %v2577_v0  ;;  %v5936_v24 = vld [vmem:[#allocation37_spill] sm:$0xff]  ;;  %v5937_v0 = vld [vmem:[#allocation36_spill] sm:$0xff] }
 0x26a   : > { %v2915_v14 = vsel %vm1868_vm3, %v5920_v44, %v5919_v60  ;;  %v2686_v45 = vadd.f32 %v5516_v40, %v2685_v19  ;;  %v2910_v62 = vsel %vm1868_vm3, %v5922_v30, %v5921_v28  ;;  %v2697_v43 = vadd.f32 %v3531_v26, %v5516_v40  ;;  %v5925_v19 = vld [vmem:[#allocation29_spill] sm:$0xff]  ;;  %v5943_v30 = vld [vmem:[#allocation40_spill] sm:$0xff] }
 0x26b   : > { %v2389_v18 = vsel %vm2316_vm4, %v2387_v15, %v2388_v31  ;;  %v5924_v55 = vrot.slane %v5923_v47, 2  ;;  %v2498_v56 = vadd.f32 %v5087_v39, %v2459_v57  ;;  %v2499_v53 = vadd.f32 %v5087_v39, %v2460_v20  ;;  %v5932_v26 = vld [vmem:[#allocation21_spill] sm:$0xff]  ;;  %v5939_v15 = vld [vmem:[#allocation38_spill] sm:$0xff] }
 0x26c   : > { %v2457_v22 = vadd.f32 %v2389_v18, %v2009_v54  ;;  %v3022_v29 = vadd.f32 %v2915_v14, %v2694_v12  ;;  %v3020_v16 = vadd.f32 %v2910_v62, %v2686_v45  ;;  %v2917_v27 = vsel %vm1868_vm3, %v5919_v60, %v5925_v19  ;;  %v5940_v12 = vld [vmem:[#allocation22_spill] sm:$0xff] }
 0x26d   : > { %v2391_v3 = vsel %vm2316_vm4, %v2388_v31, %v5924_v55  ;;  %v2530_v1 = vmax.f32 %v2498_v56, 0.0  ;;  %v2531_v13 = vmax.f32 %v2499_v53, 0.0  ;;  %v2689_v63 = vadd.f32 %v5516_v40, %v2688_v34  ;;  %v5945_v34 = vld [vmem:[#allocation42_spill] sm:$0xff] }
 0x26e   : > { %v2458_v58 = vadd.f32 %v2391_v3, %v2010_v23  ;;  %v2496_v38 = vadd.f32 %v5087_v39, %v2457_v22  ;;  %3054 = vst [vmem:[%s4132_s23 + $0x10] sm:$0xff] %v3022_v29  ;;  %3052 = vst [vmem:[%s4132_s23] sm:$0xff] %v3020_v16  ;;  %v3023_v10 = vadd.f32 %v2917_v27, %v2697_v43  ;;  %v5933_v7 = vunpack.c.l.bf16 %v5932_v26  ;;  %v5938_v23 = vld [vmem:[#allocation39_spill] sm:$0xff]  ;;  %v5946_v3 = vld [vmem:[#allocation44_spill] sm:$0xff] }
 0x26f   : > { %v2912_v42 = vsel %vm1868_vm3, %v5921_v28, %v5926_v48  ;;  %v2562_v25 = vmin.f32 %v2530_v1, 6.0  ;;  %v2563_v41 = vmin.f32 %v2531_v13, 6.0  ;;  %v2925_v51 = vsel %vm1868_vm3, %v5928_v8, %v5927_v35  ;;  %v5942_v28 = vld [vmem:[#allocation41_spill] sm:$0xff]  ;;  %v5944_v43 = vld [vmem:[#allocation43_spill] sm:$0xff]  ;;  %v5947_v22 = vld [vmem:[#allocation32_spill] sm:$0xff] }
 0x270   : > { %v2497_v61 = vadd.f32 %v5087_v39, %v2458_v58  ;;  %v3021_v49 = vadd.f32 %v2912_v42, %v2689_v63  ;;  %v2528_v17 = vmax.f32 %v2496_v38, 0.0  ;;  %3055 = vst [vmem:[%s4132_s23 + $0x18] sm:$0xff] %v3023_v10  ;;  %v3534_v33 = vpop.f32.mrf.mxu1  ;;  %v5929_v39 = vld [vmem:[#allocation31_spill] sm:$0xff]  ;;  %v2927_v6 = vsel %vm1868_vm3, %v5927_v35, %v5931_v50  ;;  %v3757_v19 = vld [vmem:[#allocation2 + $0x80] sm:$0xff]  }
 0x271   : > { %v2920_v59 = vsel %vm1868_vm3, %v5930_v11, %v5929_v39  ;;  %v5570_v4 = vrot.slane %v5933_v7, 1  ;;  %v5935_v21 = vunpack.c.l.bf16 %v5934_v36  ;;  %v2579_v9 = vpack.c.bf16 %v2563_v41, %v2562_v25  ;;  %v5615_v63 = vld [vmem:[#allocation2 + $0x88] sm:$0xff]   ;;  %v5618_v48 = vld [vmem:[#allocation2 + $0x90] sm:$0xff]  }
 0x272   : > { %v2529_v52 = vmax.f32 %v2497_v61, 0.0  ;;  %3053 = vst [vmem:[%s4132_s23 + $0x8] sm:$0xff] %v3021_v49  ;;  %v2710_v37 = vadd.f32 %v3534_v33, %v5516_v40  ;;  %v2560_v2 = vmin.f32 %v2528_v17, 6.0  ;;  %v2701_v46 = vpop.f32.mrf.mxu1  ;;  %v2930_v54 = vsel %vm1868_vm3, %v5937_v0, %v5936_v24  ;;  %v3759_v61 = vld [vmem:[#allocation2 + $0x98] sm:$0xff]   ;;  %v3761_v17 = vld [vmem:[#allocation2 + $0x48] sm:$0xff]  }
 0x273   : > { %v2956_v32 = vrot.slane %v5935_v21, 1  ;;  %v2937_v31 = vsel %vm1868_vm3, %v5939_v15, %v5938_v23  ;;  %v2702_v20 = vadd.f32 %v5516_v40, %v2701_v46  ;;  %v5941_v60 = vunpack.c.h.bf16 %v5940_v12 }
 0x274   : > { %v2561_v5 = vmin.f32 %v2529_v52, 6.0  ;;  %v3026_v57 = vadd.f32 %v2925_v51, %v2710_v37  ;;  %v3535_v45 = vpop.f32.mrf.mxu1  ;;  %v5590_v62 = vsel %vm1868_vm3, %v5943_v30, %v5942_v28  ;;  %v5595_v18 = vsel %vm1868_vm3, %v5945_v34, %v5944_v43 }
 0x275   : > { %v5585_v44 = vrot.slane %v5941_v60, 1  ;;  %v3024_v47 = vadd.f32 %v2920_v59, %v2702_v20  ;;  %v2713_v55 = vadd.f32 %v3535_v45, %v5516_v40  ;;  %v5602_v56 = vsel %vm1868_vm3, %v5946_v3, %v5570_v4  ;;  %v3764_v20 = vld [vmem:[#allocation2 + $0xb0] sm:$0xff]   ;;  %v5649_v45 = vld [vmem:[#allocation2 + $0xa8] sm:$0xff]   ;;  %v5663_v3 = vld [vmem:[#allocation2 + $0xb8] sm:$0xff]  }
 0x276   : > { %v2578_v14 = vpack.c.bf16 %v2561_v5, %v2560_v2  ;;  %3058 = vst [vmem:[%s4132_s23 + $0x30] sm:$0xff] %v3026_v57  ;;  %v2704_v53 = vpop.f32.mrf.mxu1  ;;  %v2922_v58 = vsel %vm1868_vm3, %v5929_v39, %v5947_v22  ;;  %v2842_v27 = vunpack.c.h.bf16 %v3757_v19  ;;  %v2843_v38 = vunpack.c.l.bf16 %v5615_v63  ;;  %v3762_v39 = vld [vmem:[#allocation2 + $0x40] sm:$0xff]   ;;  %v3767_v22 = vld [vmem:[#allocation2 + $0xc8] sm:$0xff]  }
 0x277   : > { %v5609_v29 = vsel %vm1868_vm3, %v5585_v44, %v2956_v32  ;;  %3056 = vst [vmem:[%s4132_s23 + $0x20] sm:$0xff] %v3024_v47  ;;  %v3027_v16 = vadd.f32 %v2927_v6, %v2713_v55  ;;  %v2705_v1 = vadd.f32 %v5516_v40, %v2704_v53  ;;  %v2847_v10 = vunpack.c.l.bf16 %v3759_v61  ;;  %v5639_v5 = vld [vmem:[#allocation2 + $0xa0] sm:$0xff]  }
 0x278   : > { %3556 = vmatprep.mubr.bf16.mxu1 %v2578_v14  ;;  %v2846_v42 = vunpack.c.h.bf16 %v5618_v48  ;;  %v2958_v25 = vrot.slane %v2842_v27, 1  ;;  %v5621_v41 = vrot.slane %v2843_v38, 1  ;;  %v2827_v52 = vunpack.c.l.bf16 %v3761_v17  ;;  %v3770_v17 = vld [vmem:[#allocation2 + $0x58] sm:$0xff]  }
 0x279   : > { %3557 = vmatmul.mubr.bf16.gmra.mxu1 %v2579_v9  ;;  %3059 = vst [vmem:[%s4132_s23 + $0x38] sm:$0xff] %v3027_v16  ;;  %v3025_v13 = vadd.f32 %v2922_v58, %v2705_v1  ;;  %v2966_v49 = vrot.slane %v2847_v10, 1  ;;  %v2826_v11 = vunpack.c.h.bf16 %v3762_v39  ;;  %v2848_v2 = vunpack.c.h.bf16 %v3759_v61 }
 0x27a   : > { %v5623_v35 = vrot.slane %v2846_v42, 1  ;;  %v5627_v8 = vsel %vm1868_vm3, %v2958_v25, %v5621_v41  ;;  %v2933_v33 = vrot.slane %v2827_v52, 1  ;;  %v2849_v46 = vunpack.c.l.bf16 %v5639_v5  ;;  %v3769_v42 = vld [vmem:[#allocation2 + $0x60] sm:$0xff]  }
 0x27b   : > { %3057 = vst [vmem:[%s4132_s23 + $0x28] sm:$0xff] %v3025_v13  ;;  %v2931_v26 = vrot.slane %v2826_v11, 1  ;;  %v2853_v12 = vunpack.c.l.bf16 %v3764_v20  ;;  %v2968_v60 = vrot.slane %v2848_v2, 1  ;;  %v2852_v30 = vunpack.c.h.bf16 %v5649_v45  ;;  %v5668_v13 = vld [vmem:[#allocation2 + $0xc0] sm:$0xff]  }
 0x27c   : > { %v5631_v51 = vsel %vm1868_vm3, %v5623_v35, %v2966_v49  ;;  %v2935_v50 = vsel %vm1868_vm3, %v2933_v33, %v5939_v15  ;;  %v5647_v14 = vrot.slane %v2849_v46, 1  ;;  %v2854_v55 = vunpack.c.h.bf16 %v3764_v20  ;;  %v3771_v46 = vld [vmem:[#allocation2 + $0x78] sm:$0xff]  }
 0x27d   : > { %v2932_v23 = vsel %vm1868_vm3, %v5936_v24, %v2931_v26  ;;  %v2976_v43 = vrot.slane %v2853_v12, 1  ;;  %v5653_v47 = vrot.slane %v2852_v30, 1  ;;  %v2855_v53 = vunpack.c.l.bf16 %v5663_v3 }
 0x27e   : > { %v5657_v24 = vsel %vm1868_vm3, %v2968_v60, %v5647_v14  ;;  %v2859_v58 = vunpack.c.l.bf16 %v3767_v22  ;;  %v2978_v16 = vrot.slane %v2854_v55, 1  ;;  %v2858_v19 = vunpack.c.h.bf16 %v5668_v13 }
 0x27f   : > { %v5666_v1 = vrot.slane %v2855_v53, 1  ;;  %v2833_v25 = vunpack.c.l.bf16 %v3769_v42  ;;  %v2832_v52 = vunpack.c.h.bf16 %v3770_v17 }
 0x280   : > { %v2986_v27 = vrot.slane %v2859_v58, 1  ;;  %v5671_v38 = vrot.slane %v2858_v19, 1  ;;  %v2845_v19 = vunpack.c.l.bf16 %v5618_v48 }
 0x281   : > { %v5675_v61 = vsel %vm1868_vm3, %v2978_v16, %v5666_v1  ;;  %v2943_v49 = vrot.slane %v2833_v25, 1 }
 0x282   : > { %v5679_v10 = vsel %vm1868_vm3, %v5671_v38, %v2986_v27  ;;  %v2963_v27 = vrot.slane %v2845_v19, 1 }
 0x283   : > { %v2945_v39 = vsel %vm1868_vm3, %v2943_v49, %v5945_v34 }
 0x2a0   : > { %v3538_v59 = vpop.f32.mrf.mxu1 }
 0x2a1   : > { %v2726_v6 = vadd.f32 %v3538_v59, %v5516_v40  ;;  %v2941_v59 = vrot.slane %v2832_v52, 1 }
 0x2a2   : > { %v2717_v7 = vpop.f32.mrf.mxu1 }
 0x2a3   : > { %v3030_v36 = vadd.f32 %v2935_v50, %v2726_v6  ;;  %v2718_v21 = vadd.f32 %v5516_v40, %v2717_v7 }
 0x2a4   : > { %v3539_v32 = vpop.f32.mrf.mxu1 }
 0x2a5   : > { %3062 = vst [vmem:[%s4132_s23 + $0x50] sm:$0xff] %v3030_v36  ;;  %v3028_v9 = vadd.f32 %v2930_v54, %v2718_v21  ;;  %v2729_v37 = vadd.f32 %v3539_v32, %v5516_v40 }
 0x2a6   : > { %v2720_v0 = vpop.f32.mrf.mxu1 }
 0x2a7   : > { %3060 = vst [vmem:[%s4132_s23 + $0x40] sm:$0xff] %v3028_v9  ;;  %v3031_v15 = vadd.f32 %v2937_v31, %v2729_v37  ;;  %v2721_v57 = vadd.f32 %v5516_v40, %v2720_v0  ;;  %v5661_v31 = vsel %vm1868_vm3, %v5653_v47, %v2976_v43  ;;  %v2942_v9 = vsel %vm1868_vm3, %v5942_v28, %v2941_v59 }
 0x2a8   : > { %v2839_v0 = vunpack.c.l.bf16 %v3771_v46 }
 0x2a9   : > { %3063 = vst [vmem:[%s4132_s23 + $0x58] sm:$0xff] %v3031_v15  ;;  %v3029_v54 = vadd.f32 %v2932_v23, %v2721_v57 }
 0x2aa   : > { %v2953_v23 = vrot.slane %v2839_v0, 1 }
 0x2ab   : > { %3061 = vst [vmem:[%s4132_s23 + $0x48] sm:$0xff] %v3029_v54 }
 0x2ac   : > { %v2955_v28 = vsel %vm1868_vm3, %v2953_v23, %v5585_v44 }
 0x2cd   : > { %v3542_v33 = vpop.f32.mrf.mxu1 }
 0x2ce   : > { %v2742_v11 = vadd.f32 %v3542_v33, %v5516_v40 }
 0x2cf   : > { %v2733_v50 = vpop.f32.mrf.mxu1 }
 0x2d0   : > { %v3034_v6 = vadd.f32 %v2945_v39, %v2742_v11  ;;  %v2734_v26 = vadd.f32 %v5516_v40, %v2733_v50 }
 0x2d1   : > { %v3543_v7 = vpop.f32.mrf.mxu1 }
 0x2d2   : > { %3066 = vst [vmem:[%s4132_s23 + $0x70] sm:$0xff] %v3034_v6  ;;  %v3032_v36 = vadd.f32 %v5590_v62, %v2734_v26  ;;  %v2745_v21 = vadd.f32 %v3543_v7, %v5516_v40  ;;  %v3772_v62 = vld [vmem:[#allocation2 + $0x70] sm:$0xff]   ;;  %v2851_v6 = vunpack.c.l.bf16 %v5649_v45  ;;  %v2857_v45 = vunpack.c.l.bf16 %v5668_v13 }
 0x2d3   : > { %v2736_v32 = vpop.f32.mrf.mxu1  ;;  %v2838_v15 = vunpack.c.h.bf16 %v3772_v62  ;;  %v2856_v62 = vunpack.c.h.bf16 %v5663_v3 }
 0x2d4   : > { %3064 = vst [vmem:[%s4132_s23 + $0x60] sm:$0xff] %v3032_v36  ;;  %v3035_v34 = vadd.f32 %v5595_v18, %v2745_v21  ;;  %v2737_v37 = vadd.f32 %v5516_v40, %v2736_v32  ;;  %v2973_v26 = vrot.slane %v2851_v6, 1  ;;  %v2983_v23 = vrot.slane %v2857_v45, 1 }
 0x2d5   : > { %v2951_v18 = vrot.slane %v2838_v15, 1 }
 0x2d6   : > { %3067 = vst [vmem:[%s4132_s23 + $0x78] sm:$0xff] %v3035_v34  ;;  %v3033_v2 = vadd.f32 %v2942_v9, %v2737_v37  ;;  %v2975_v36 = vsel %vm1868_vm3, %v2973_v26, %v5653_v47  ;;  %v2985_v15 = vsel %vm1868_vm3, %v2983_v23, %v5671_v38 }
 0x2d7   : > { %v2952_v22 = vsel %vm1868_vm3, %v5570_v4, %v2951_v18  ;;  %v2965_v4 = vsel %vm1868_vm3, %v2963_v27, %v5623_v35 }
 0x2d8   : > { %3065 = vst [vmem:[%s4132_s23 + $0x68] sm:$0xff] %v3033_v2 }
 0x2ec   : > { %v3546_v57 = vpop.f32.mrf.mxu1 }
 0x2ed   : > { %v2758_v20 = vadd.f32 %v3546_v57, %v5516_v40  ;;  %v2981_v57 = vrot.slane %v2856_v62, 1 }
 0x2ee   : > { %v2749_v12 = vpop.f32.mrf.mxu1 }
 0x2ef   : > { %v3038_v54 = vadd.f32 %v2955_v28, %v2758_v20  ;;  %v2750_v60 = vadd.f32 %v5516_v40, %v2749_v12 }
 0x2f0   : > { %v3547_v30 = vpop.f32.mrf.mxu1 }
 0x2f1   : > { %3070 = vst [vmem:[%s4132_s23 + $0x90] sm:$0xff] %v3038_v54  ;;  %v3036_v43 = vadd.f32 %v5602_v56, %v2750_v60  ;;  %v2761_v55 = vadd.f32 %v3547_v30, %v5516_v40  ;;  %v2844_v56 = vunpack.c.h.bf16 %v5615_v63  ;;  %v2982_v54 = vsel %vm1868_vm3, %v5666_v1, %v2981_v57 }
 0x2f2   : > { %v2752_v53 = vpop.f32.mrf.mxu1 }
 0x2f3   : > { %3068 = vst [vmem:[%s4132_s23 + $0x80] sm:$0xff] %v3036_v43  ;;  %v3039_v44 = vadd.f32 %v5609_v29, %v2761_v55  ;;  %v2753_v58 = vadd.f32 %v5516_v40, %v2752_v53  ;;  %v2961_v29 = vrot.slane %v2844_v56, 1 }
 0x2f5   : > { %3071 = vst [vmem:[%s4132_s23 + $0x98] sm:$0xff] %v3039_v44  ;;  %v3037_v16 = vadd.f32 %v2952_v22, %v2753_v58  ;;  %v2962_v11 = vsel %vm1868_vm3, %v5621_v41, %v2961_v29 }
 0x2f7   : > { %3069 = vst [vmem:[%s4132_s23 + $0x88] sm:$0xff] %v3037_v16 }
 0x30a   : > { %v3550_v42 = vpop.f32.mrf.mxu1 }
 0x30b   : > { %v2774_v25 = vadd.f32 %v3550_v42, %v5516_v40 }
 0x30c   : > { %v2765_v49 = vpop.f32.mrf.mxu1 }
 0x30d   : > { %v3042_v17 = vadd.f32 %v2965_v4, %v2774_v25  ;;  %v2766_v52 = vadd.f32 %v5516_v40, %v2765_v49 }
 0x30e   : > { %v3551_v33 = vpop.f32.mrf.mxu1 }
 0x30f   : > { %3074 = vst [vmem:[%s4132_s23 + $0xb0] sm:$0xff] %v3042_v17  ;;  %v3040_v48 = vadd.f32 %v5627_v8, %v2766_v52  ;;  %v2777_v39 = vadd.f32 %v3551_v33, %v5516_v40  ;;  %v2850_v8 = vunpack.c.h.bf16 %v5639_v5 }
 0x310   : > { %v2768_v63 = vpop.f32.mrf.mxu1 }
 0x311   : > { %3072 = vst [vmem:[%s4132_s23 + $0xa0] sm:$0xff] %v3040_v48  ;;  %v3043_v35 = vadd.f32 %v5631_v51, %v2777_v39  ;;  %v2769_v59 = vadd.f32 %v5516_v40, %v2768_v63  ;;  %v2971_v51 = vrot.slane %v2850_v8, 1 }
 0x313   : > { %3075 = vst [vmem:[%s4132_s23 + $0xb8] sm:$0xff] %v3043_v35  ;;  %v3041_v50 = vadd.f32 %v2962_v11, %v2769_v59  ;;  %v2972_v47 = vsel %vm1868_vm3, %v5647_v14, %v2971_v51 }
 0x315   : > { %3073 = vst [vmem:[%s4132_s23 + $0xa8] sm:$0xff] %v3041_v50 }
 0x329   : > { %v3554_v7 = vpop.f32.mrf.mxu1 }
 0x32a   : > { %v2790_v41 = vadd.f32 %v3554_v7, %v5516_v40 }
 0x32b   : > { %v2781_v21 = vpop.f32.mrf.mxu1 }
 0x32c   : > { %v3046_v32 = vadd.f32 %v2975_v36, %v2790_v41  ;;  %v2782_v9 = vadd.f32 %v5516_v40, %v2781_v21 }
 0x32d   : > { %v3555_v34 = vpop.f32.mrf.mxu1 }
 0x32e   : > { %3078 = vst [vmem:[%s4132_s23 + $0xd0] sm:$0xff] %v3046_v32  ;;  %v3044_v37 = vadd.f32 %v5657_v24, %v2782_v9  ;;  %v2793_v5 = vadd.f32 %v3555_v34, %v5516_v40 }
 0x32f   : > { %v2784_v2 = vpop.f32.mrf.mxu1 }
 0x330   : > { %3076 = vst [vmem:[%s4132_s23 + $0xc0] sm:$0xff] %v3044_v37  ;;  %v3047_v46 = vadd.f32 %v5661_v31, %v2793_v5  ;;  %v2785_v0 = vadd.f32 %v5516_v40, %v2784_v2 }
 0x332   : > { %3079 = vst [vmem:[%s4132_s23 + $0xd8] sm:$0xff] %v3047_v46  ;;  %v3045_v13 = vadd.f32 %v2972_v47, %v2785_v0 }
 0x334   : > { %3077 = vst [vmem:[%s4132_s23 + $0xc8] sm:$0xff] %v3045_v13 }
 0x339   : > { %v3558_v24 = vpop.f32.mrf.mxu1 }
 0x33a   : > { %v2806_v14 = vadd.f32 %v3558_v24, %v5516_v40 }
 0x33b   : > { %v2797_v28 = vpop.f32.mrf.mxu1 }
 0x33c   : > { %v3050_v31 = vadd.f32 %v2985_v15, %v2806_v14  ;;  %v2798_v20 = vadd.f32 %v5516_v40, %v2797_v28 }
 0x33d   : > { %v3559_v18 = vpop.f32.mrf.mxu1 }
 0x33e   : > { %3082 = vst [vmem:[%s4132_s23 + $0xf0] sm:$0xff] %v3050_v31  ;;  %v3048_v3 = vadd.f32 %v5675_v61, %v2798_v20  ;;  %v2809_v12 = vadd.f32 %v3559_v18, %v5516_v40 }
 0x33f   : > { %v2800_v38 = vpop.f32.mrf.mxu1 }
 0x340   : > { %3080 = vst [vmem:[%s4132_s23 + $0xe0] sm:$0xff] %v3048_v3  ;;  %v3051_v60 = vadd.f32 %v5679_v10, %v2809_v12  ;;  %v2801_v30 = vadd.f32 %v5516_v40, %v2800_v38 }
 0x342   : > { %3083 = vst [vmem:[%s4132_s23 + $0xf8] sm:$0xff] %v3051_v60  ;;  %v3049_v61 = vadd.f32 %v2982_v54, %v2801_v30 }
 0x344   : > { %3081 = vst [vmem:[%s4132_s23 + $0xe8] sm:$0xff] %v3049_v61 }
 0x345   : > { %3886 = shalt.err (!%p3883_p0)
}
 0x346   : > { %s3887_s23 = scalar_lea.hbm %s5760_s19, 4096  ;;  %s3891_s10 = scalar_lea.hbm %s5820_s7, 8192 }
 0x347   : > { %p3888_p3 = scmp.ne.s32.totalorder %s5760_s19, %s3887_s23  ;;  %p3892_p9 = scmp.lt.s32.totalorder %s5760_s19, %s5820_s7 }
 0x348   : > { %p3893_p12 = scmp.lt.s32.totalorder %s3891_s10, %s3887_s23 }
 0x349   : > { %p3889_p6 = pnand %p3888_p3, %p4052_p4 }
 0x34a   : > { %p3894_p1 = por %p3893_p12, %p3892_p9 }
 0x34b   : > { %p3890_p7 = pneg %p3889_p6 }
 0x34d   : > { %p3895_p8 = pnand %p3894_p1, %p3890_p7 }
 0x34f   : > { %3898 = shalt.err (!%p3895_p8)
}
 0x350   : > { %s3970_s1 = smov 128   ;;  %s3971_s27 = smov 8  }
 0x351   : > { %3588 = dma.vmem_to_hbm [thread:$0]  (%p4052_p4), %s5762_s12, 4096, %s5760_s19, %s5768_s15, %s3970_s1, %s3970_s1, %s3971_s27  }
 0x352 PF: > { %p3610_p2 = scmp.ge.s32.totalorder %s3959_s29, 2  ;;  %s3116_s30 = sand.u32 1, %s3939_s24  }
 0x353   : > { %p5949_p5 = scmp.ne.s32.totalorder %s5853_s13, 0  ;;  %s3117_s17 = scalar_lea.sflag [#allocation6], %s3116_s30 }
 0x355   : > { %p3601_p10 = pnand %p3610_p2, %p5949_p5 }
 0x357   : > { %p3602_p11 = pneg %p3601_p10 }
 0x359   : > { %3934 = dma.done.wait (%p3602_p11), %s3117_s17, 4096  }
 0x35a   : > { %3936 = vsyncadd (%p3602_p11), %s3117_s17, 4294963200  ;;  %s22_s29 = sadd.s32 1, %s3959_s29   ;;  %s5950_s24 = smov %s3943_s25 }
 0x35b   : > { %p19_p13 = scmp.ge.s32.totalorder %s22_s29, 4   ;;  %s5951_s25 = smov %s3947_s26 }
 0x35c   : > { %s5952_s26 = smov %s4065_s14  ;;  %s5953_s27 = smov %s3955_s28 }
 0x35d   : > { %s5954_s28 = smov %s5956_s9  ;;  %21 = sbr.rel (!%p19_p13) target bundleno = 8 (0x8), region = 114 }
 0x362   :  { %3122 = vsyncpa [#allocation5], 1 }
 0x363   :  { %3124 = vsyncpa [#allocation5 + $0x1], 1 }
 0x364   :  { %3125 = vsyncpa [#allocation8], 1 }
 0x365   :  { %3126 = vsyncpa [#allocation6], 1 }
 0x366   :  { %3128 = vsyncpa [#allocation6 + $0x1], 1 }
 0x367   :  { %3129 = vsyncmov [#allocation3] }
 0x36a   :  { %s3130_s11 = vpop.sfrf %3129 }
 0x36b   :  { %p3324_p4 = scmp.ne.s32.totalorder %s3130_s11, 0 }
 0x36d   :  { %3134 = shalt.err (%p3324_p4)  }
 0x36e   :  { %3136 = vsyncmov [#allocation3 + $0x1] }
 0x371   :  { %s3137_s13 = vpop.sfrf %3136 }
 0x372   :  { %p3325_p0 = scmp.ne.s32.totalorder %s3137_s13, 0 }
 0x374   :  { %3141 = shalt.err (%p3325_p0)  }

</bundles_post_ra>
